<compile_context>
chip_gen: v5e
topology: v5e:2x2
jax: 0.10.0
libtpu: 0.0.40
codegen_flags: <defaults>
</compile_context>

<pallas_src>
import functools
import math

import numpy as np

import jax
import jax.numpy as jnp
from jax.experimental import pallas as pl
from jax.experimental.pallas import tpu as pltpu


# ----------------------------------------------------------------------------
# DFT / IDFT matrices (half-spectrum axis padded to W, ortho scales folded in)
# ----------------------------------------------------------------------------
def _dft_matrices(H, W):
    Wf = W // 2 + 1
    s = 1.0 / math.sqrt(H * W)

    kh = np.arange(H)
    ang_h = 2.0 * np.pi * np.outer(kh, kh) / H          # symmetric (H, H)
    fr = np.cos(ang_h) * s                              # forward F_H (ortho folded)
    fi = -np.sin(ang_h) * s
    er = np.cos(ang_h)                                  # inverse along H (exp(+i))
    ei = np.sin(ang_h)

    lw = np.arange(W)
    ang_w = 2.0 * np.pi * np.outer(lw, lw) / W          # symmetric (W, W)
    col_mask = (lw < Wf).astype(np.float64)             # kill padded half-spectrum cols
    gr = np.cos(ang_w) * col_mask[None, :]              # forward G (W, Wf->padded W)
    gi = -np.sin(ang_w) * col_mask[None, :]

    # Hermitian weights for the C2R inverse along W (DC/Nyquist weight 1, rest 2)
    wgt = np.where(lw == 0, 1.0, 2.0)
    if W % 2 == 0:
        wgt = np.where(lw == W // 2, 1.0, wgt)
    wgt = wgt * col_mask * s                            # inverse ortho scale folded in
    cw = np.cos(ang_w) * wgt[:, None]                   # (W, W), rows >= Wf zeroed
    sw = np.sin(ang_w) * wgt[:, None]

    f32 = lambda a: jnp.asarray(a, jnp.float32)
    return tuple(f32(a) for a in (gr, gi, fr, fi, er, ei, cw, sw))


# ----------------------------------------------------------------------------
# Fused kernel: rfft2 -> 1x1 conv (+bias) -> LeakyReLU -> irfft2, per batch
# ----------------------------------------------------------------------------
def _fourier_unit_kernel(w_ref, b_ref, x_ref,
                         gr_ref, gi_ref, fr_ref, fi_ref,
                         er_ref, ei_ref, cw_ref, sw_ref,
                         out_ref, *, C, neg_slope):
    dot = functools.partial(jnp.dot, preferred_element_type=jnp.float32,
                            precision=jax.lax.Precision.HIGHEST)

    gr = gr_ref[...]
    gi = gi_ref[...]
    fr = fr_ref[...]
    fi = fi_ref[...]
    er = er_ref[...]
    ei = ei_ref[...]
    cw = cw_ref[...]
    sw = sw_ref[...]

    # --- forward rfft2 ('ortho') via DFT matmuls, per channel ----------------
    # channel order matches torch's stack/permute/view: [Re c0, Im c0, Re c1, ...]
    spec = []
    for c in range(C):
        xc = x_ref[0, c, :, :]                       # (H, W)
        p = dot(xc, gr)                              # (H, W)  cols >= Wf are zero
        q = dot(xc, gi)
        spec.append(dot(fr, p) - dot(fi, q))         # Re part
        spec.append(dot(fr, q) + dot(fi, p))         # Im part

    # --- 1x1 conv over the 2C stacked channels + bias + LeakyReLU ------------
    C2 = 2 * C
    mixed = []
    for o in range(C2):
        acc = spec[0] * w_ref[o, 0]                  # init with first tap (no zeros+add)
        for ci in range(1, C2):
            acc = acc + spec[ci] * w_ref[o, ci]
        acc = acc + b_ref[o]
        mixed.append(jnp.maximum(acc, neg_slope * acc))   # LeakyReLU(0.2)

    # --- inverse irfft2 ('ortho') via IDFT matmuls, per channel --------------
    for c in range(C):
        zr = mixed[2 * c]
        zi = mixed[2 * c + 1]
        ur = dot(er, zr) - dot(ei, zi)               # complex IFFT along H
        ui = dot(er, zi) + dot(ei, zr)
        out_ref[0, c, :, :] = dot(ur, cw) - dot(ui, sw)   # Hermitian C2R along W


# ----------------------------------------------------------------------------
# Wrapper
# ----------------------------------------------------------------------------
def fourier_unit_forward(x, weight, bias, neg_slope=0.2):
    # x: (B, C, H, W) f32; weight: (2C, 2C) (= Conv2d(2C,2C,1) weight squeezed);
    # bias: (2C,)
    x = x.astype(jnp.float32)
    B, C, H, W = x.shape
    mats = _dft_matrices(H, W)                       # gr, gi, fr, fi, er, ei, cw, sw

    kern = functools.partial(_fourier_unit_kernel, C=C, neg_slope=neg_slope)
    smem = pl.BlockSpec(memory_space=pltpu.MemorySpace.SMEM)
    full2d = lambda n: pl.BlockSpec((n, n), lambda b: (0, 0))

    return pl.pallas_call(
        kern,
        out_shape=jax.ShapeDtypeStruct((B, C, H, W), jnp.float32),
        grid=(B,),
        in_specs=[
            smem,                                               # conv weight (2C, 2C)
            smem,                                               # conv bias   (2C,)
            pl.BlockSpec((1, C, H, W), lambda b: (b, 0, 0, 0)),  # x
            full2d(W), full2d(W),                               # gr, gi
            full2d(H), full2d(H),                               # fr, fi
            full2d(H), full2d(H),                               # er, ei
            full2d(W), full2d(W),                               # cw, sw
        ],
        out_specs=pl.BlockSpec((1, C, H, W), lambda b: (b, 0, 0, 0)),
        compiler_params=pltpu.CompilerParams(dimension_semantics=("parallel",)),
    )(weight.astype(jnp.float32), bias.astype(jnp.float32), x, *mats)


# ----------------------------------------------------------------------------
# Pure-JAX reference mirroring the PyTorch module (jnp.fft == torch.fft here)
# ----------------------------------------------------------------------------
def ref_forward(x, weight, bias, neg_slope=0.2):
    B, C, H, W = x.shape
    ff = jnp.fft.rfft2(x, norm="ortho")                          # (B, C, H, Wf) complex
    st = jnp.stack([ff.real, ff.imag], axis=2)                   # (B, C, 2, H, Wf)
    ci = st.reshape(B, 2 * C, H, st.shape[-1])                   # interleaved re/im channels
    co = jnp.einsum("oc,bchw->bohw", weight, ci,
                    precision=jax.lax.Precision.HIGHEST) + bias[None, :, None, None]
    co = jnp.where(co >= 0, co, neg_slope * co)                  # LeakyReLU(0.2)
    co = co.reshape(B, C, 2, H, co.shape[-1])
    z = co[:, :, 0] + 1j * co[:, :, 1]
    return jnp.fft.irfft2(z, s=(H, W), norm="ortho")             # (B, C, H, W) f32


if __name__ == "__main__":
    B, C, H, W = 2, 4, 16, 16        # embed_dim=4 -> Conv2d(8, 8, 1)
    key = jax.random.PRNGKey(0)
    kx, kw, kb = jax.random.split(key, 3)
    x = jax.random.normal(kx, (B, C, H, W), jnp.float32)
    weight = 0.25 * jax.random.normal(kw, (2 * C, 2 * C), jnp.float32)
    bias = 0.05 * jax.random.normal(kb, (2 * C,), jnp.float32)

    out = fourier_unit_forward(x, weight, bias)
    out = jax.block_until_ready(out)
    assert out.shape == (B, C, H, W)

    ref = ref_forward(x, weight, bias)
    max_err = float(jnp.max(jnp.abs(out - ref)))
    if not bool(jnp.allclose(out, ref, rtol=2e-2, atol=2e-2)):
        raise AssertionError(f"Pallas/reference mismatch, max abs err = {max_err}")

    print("KERNEL_OK")
</pallas_src>

<mosaic_0001>
module attributes {stable_mosaic.version = 11 : i64} {
  func.func @_fourier_unit_kernel(%arg0: i32, %arg1: memref<8x8xf32, #tpu.memory_space<smem>>, %arg2: memref<8xf32, #tpu.memory_space<smem>>, %arg3: memref<1x4x16x16xf32, #tpu.memory_space<vmem>>, %arg4: memref<16x16xf32, #tpu.memory_space<vmem>>, %arg5: memref<16x16xf32, #tpu.memory_space<vmem>>, %arg6: memref<16x16xf32, #tpu.memory_space<vmem>>, %arg7: memref<16x16xf32, #tpu.memory_space<vmem>>, %arg8: memref<16x16xf32, #tpu.memory_space<vmem>>, %arg9: memref<16x16xf32, #tpu.memory_space<vmem>>, %arg10: memref<16x16xf32, #tpu.memory_space<vmem>>, %arg11: memref<16x16xf32, #tpu.memory_space<vmem>>, %arg12: memref<1x4x16x16xf32, #tpu.memory_space<vmem>>) attributes {dimension_semantics = [#tpu.dimension_semantics<parallel>], iteration_bounds = array<i64: 2>, scalar_prefetch = 0 : i64, scratch_operands = 0 : i64, tpu.core_type = #tpu.core_type<tc>, window_params = [{transform_indices = @transform_0, window_bounds = array<i64: 8, 8>}, {transform_indices = @transform_1, window_bounds = array<i64: 8>}, {transform_indices = @transform_2, window_bounds = array<i64: 1, 4, 16, 16>}, {pipeline_mode = #tpu.pipeline_mode<synchronous>, transform_indices = @transform_3, window_bounds = array<i64: 16, 16>}, {pipeline_mode = #tpu.pipeline_mode<synchronous>, transform_indices = @transform_4, window_bounds = array<i64: 16, 16>}, {pipeline_mode = #tpu.pipeline_mode<synchronous>, transform_indices = @transform_5, window_bounds = array<i64: 16, 16>}, {pipeline_mode = #tpu.pipeline_mode<synchronous>, transform_indices = @transform_6, window_bounds = array<i64: 16, 16>}, {pipeline_mode = #tpu.pipeline_mode<synchronous>, transform_indices = @transform_7, window_bounds = array<i64: 16, 16>}, {pipeline_mode = #tpu.pipeline_mode<synchronous>, transform_indices = @transform_8, window_bounds = array<i64: 16, 16>}, {pipeline_mode = #tpu.pipeline_mode<synchronous>, transform_indices = @transform_9, window_bounds = array<i64: 16, 16>}, {pipeline_mode = #tpu.pipeline_mode<synchronous>, transform_indices = @transform_10, window_bounds = array<i64: 16, 16>}, {transform_indices = @transform_11, window_bounds = array<i64: 1, 4, 16, 16>}]} {
    %c0 = arith.constant 0 : index
    %c0_0 = arith.constant 0 : index
    %0 = vector.load %arg4[%c0, %c0_0] : memref<16x16xf32, #tpu.memory_space<vmem>>, vector<16x16xf32>
    %c0_1 = arith.constant 0 : index
    %c0_2 = arith.constant 0 : index
    %1 = vector.load %arg5[%c0_1, %c0_2] : memref<16x16xf32, #tpu.memory_space<vmem>>, vector<16x16xf32>
    %c0_3 = arith.constant 0 : index
    %c0_4 = arith.constant 0 : index
    %2 = vector.load %arg6[%c0_3, %c0_4] : memref<16x16xf32, #tpu.memory_space<vmem>>, vector<16x16xf32>
    %c0_5 = arith.constant 0 : index
    %c0_6 = arith.constant 0 : index
    %3 = vector.load %arg7[%c0_5, %c0_6] : memref<16x16xf32, #tpu.memory_space<vmem>>, vector<16x16xf32>
    %c0_7 = arith.constant 0 : index
    %c0_8 = arith.constant 0 : index
    %4 = vector.load %arg8[%c0_7, %c0_8] : memref<16x16xf32, #tpu.memory_space<vmem>>, vector<16x16xf32>
    %c0_9 = arith.constant 0 : index
    %c0_10 = arith.constant 0 : index
    %5 = vector.load %arg9[%c0_9, %c0_10] : memref<16x16xf32, #tpu.memory_space<vmem>>, vector<16x16xf32>
    %c0_11 = arith.constant 0 : index
    %c0_12 = arith.constant 0 : index
    %6 = vector.load %arg10[%c0_11, %c0_12] : memref<16x16xf32, #tpu.memory_space<vmem>>, vector<16x16xf32>
    %c0_13 = arith.constant 0 : index
    %c0_14 = arith.constant 0 : index
    %7 = vector.load %arg11[%c0_13, %c0_14] : memref<16x16xf32, #tpu.memory_space<vmem>>, vector<16x16xf32>
    %c0_15 = arith.constant 0 : index
    %c0_16 = arith.constant 0 : index
    %c0_17 = arith.constant 0 : index
    %c0_18 = arith.constant 0 : index
    %8 = vector.load %arg3[%c0_15, %c0_16, %c0_17, %c0_18] : memref<1x4x16x16xf32, #tpu.memory_space<vmem>>, vector<1x1x16x16xf32>
    %9 = vector.shape_cast %8 : vector<1x1x16x16xf32> to vector<16x16xf32>
    %cst = arith.constant dense<0.000000e+00> : vector<16x16xf32>
    %10 = tpu.matmul %9, %0, %cst {dimension_numbers = #tpu.dot_dimension_numbers<[1], [0], [0], [1], [0, 0, 1, 1], [], []>, precision = #tpu.contract_precision<fp32>} : vector<16x16xf32>, vector<16x16xf32>, vector<16x16xf32> -> vector<16x16xf32>
    %cst_19 = arith.constant dense<0.000000e+00> : vector<16x16xf32>
    %11 = tpu.matmul %9, %1, %cst_19 {dimension_numbers = #tpu.dot_dimension_numbers<[1], [0], [0], [1], [0, 0, 1, 1], [], []>, precision = #tpu.contract_precision<fp32>} : vector<16x16xf32>, vector<16x16xf32>, vector<16x16xf32> -> vector<16x16xf32>
    %cst_20 = arith.constant dense<0.000000e+00> : vector<16x16xf32>
    %12 = tpu.matmul %2, %10, %cst_20 {dimension_numbers = #tpu.dot_dimension_numbers<[1], [0], [0], [1], [0, 0, 1, 1], [], []>, precision = #tpu.contract_precision<fp32>} : vector<16x16xf32>, vector<16x16xf32>, vector<16x16xf32> -> vector<16x16xf32>
    %cst_21 = arith.constant dense<0.000000e+00> : vector<16x16xf32>
    %13 = tpu.matmul %3, %11, %cst_21 {dimension_numbers = #tpu.dot_dimension_numbers<[1], [0], [0], [1], [0, 0, 1, 1], [], []>, precision = #tpu.contract_precision<fp32>} : vector<16x16xf32>, vector<16x16xf32>, vector<16x16xf32> -> vector<16x16xf32>
    %14 = arith.subf %12, %13 : vector<16x16xf32>
    %cst_22 = arith.constant dense<0.000000e+00> : vector<16x16xf32>
    %15 = tpu.matmul %2, %11, %cst_22 {dimension_numbers = #tpu.dot_dimension_numbers<[1], [0], [0], [1], [0, 0, 1, 1], [], []>, precision = #tpu.contract_precision<fp32>} : vector<16x16xf32>, vector<16x16xf32>, vector<16x16xf32> -> vector<16x16xf32>
    %cst_23 = arith.constant dense<0.000000e+00> : vector<16x16xf32>
    %16 = tpu.matmul %3, %10, %cst_23 {dimension_numbers = #tpu.dot_dimension_numbers<[1], [0], [0], [1], [0, 0, 1, 1], [], []>, precision = #tpu.contract_precision<fp32>} : vector<16x16xf32>, vector<16x16xf32>, vector<16x16xf32> -> vector<16x16xf32>
    %17 = arith.addf %15, %16 : vector<16x16xf32>
    %c0_24 = arith.constant 0 : index
    %c1 = arith.constant 1 : index
    %c0_25 = arith.constant 0 : index
    %c0_26 = arith.constant 0 : index
    %18 = vector.load %arg3[%c0_24, %c1, %c0_25, %c0_26] : memref<1x4x16x16xf32, #tpu.memory_space<vmem>>, vector<1x1x16x16xf32>
    %19 = vector.shape_cast %18 : vector<1x1x16x16xf32> to vector<16x16xf32>
    %cst_27 = arith.constant dense<0.000000e+00> : vector<16x16xf32>
    %20 = tpu.matmul %19, %0, %cst_27 {dimension_numbers = #tpu.dot_dimension_numbers<[1], [0], [0], [1], [0, 0, 1, 1], [], []>, precision = #tpu.contract_precision<fp32>} : vector<16x16xf32>, vector<16x16xf32>, vector<16x16xf32> -> vector<16x16xf32>
    %cst_28 = arith.constant dense<0.000000e+00> : vector<16x16xf32>
    %21 = tpu.matmul %19, %1, %cst_28 {dimension_numbers = #tpu.dot_dimension_numbers<[1], [0], [0], [1], [0, 0, 1, 1], [], []>, precision = #tpu.contract_precision<fp32>} : vector<16x16xf32>, vector<16x16xf32>, vector<16x16xf32> -> vector<16x16xf32>
    %cst_29 = arith.constant dense<0.000000e+00> : vector<16x16xf32>
    %22 = tpu.matmul %2, %20, %cst_29 {dimension_numbers = #tpu.dot_dimension_numbers<[1], [0], [0], [1], [0, 0, 1, 1], [], []>, precision = #tpu.contract_precision<fp32>} : vector<16x16xf32>, vector<16x16xf32>, vector<16x16xf32> -> vector<16x16xf32>
    %cst_30 = arith.constant dense<0.000000e+00> : vector<16x16xf32>
    %23 = tpu.matmul %3, %21, %cst_30 {dimension_numbers = #tpu.dot_dimension_numbers<[1], [0], [0], [1], [0, 0, 1, 1], [], []>, precision = #tpu.contract_precision<fp32>} : vector<16x16xf32>, vector<16x16xf32>, vector<16x16xf32> -> vector<16x16xf32>
    %24 = arith.subf %22, %23 : vector<16x16xf32>
    %cst_31 = arith.constant dense<0.000000e+00> : vector<16x16xf32>
    %25 = tpu.matmul %2, %21, %cst_31 {dimension_numbers = #tpu.dot_dimension_numbers<[1], [0], [0], [1], [0, 0, 1, 1], [], []>, precision = #tpu.contract_precision<fp32>} : vector<16x16xf32>, vector<16x16xf32>, vector<16x16xf32> -> vector<16x16xf32>
    %cst_32 = arith.constant dense<0.000000e+00> : vector<16x16xf32>
    %26 = tpu.matmul %3, %20, %cst_32 {dimension_numbers = #tpu.dot_dimension_numbers<[1], [0], [0], [1], [0, 0, 1, 1], [], []>, precision = #tpu.contract_precision<fp32>} : vector<16x16xf32>, vector<16x16xf32>, vector<16x16xf32> -> vector<16x16xf32>
    %27 = arith.addf %25, %26 : vector<16x16xf32>
    %c0_33 = arith.constant 0 : index
    %c2 = arith.constant 2 : index
    %c0_34 = arith.constant 0 : index
    %c0_35 = arith.constant 0 : index
    %28 = vector.load %arg3[%c0_33, %c2, %c0_34, %c0_35] : memref<1x4x16x16xf32, #tpu.memory_space<vmem>>, vector<1x1x16x16xf32>
    %29 = vector.shape_cast %28 : vector<1x1x16x16xf32> to vector<16x16xf32>
    %cst_36 = arith.constant dense<0.000000e+00> : vector<16x16xf32>
    %30 = tpu.matmul %29, %0, %cst_36 {dimension_numbers = #tpu.dot_dimension_numbers<[1], [0], [0], [1], [0, 0, 1, 1], [], []>, precision = #tpu.contract_precision<fp32>} : vector<16x16xf32>, vector<16x16xf32>, vector<16x16xf32> -> vector<16x16xf32>
    %cst_37 = arith.constant dense<0.000000e+00> : vector<16x16xf32>
    %31 = tpu.matmul %29, %1, %cst_37 {dimension_numbers = #tpu.dot_dimension_numbers<[1], [0], [0], [1], [0, 0, 1, 1], [], []>, precision = #tpu.contract_precision<fp32>} : vector<16x16xf32>, vector<16x16xf32>, vector<16x16xf32> -> vector<16x16xf32>
    %cst_38 = arith.constant dense<0.000000e+00> : vector<16x16xf32>
    %32 = tpu.matmul %2, %30, %cst_38 {dimension_numbers = #tpu.dot_dimension_numbers<[1], [0], [0], [1], [0, 0, 1, 1], [], []>, precision = #tpu.contract_precision<fp32>} : vector<16x16xf32>, vector<16x16xf32>, vector<16x16xf32> -> vector<16x16xf32>
    %cst_39 = arith.constant dense<0.000000e+00> : vector<16x16xf32>
    %33 = tpu.matmul %3, %31, %cst_39 {dimension_numbers = #tpu.dot_dimension_numbers<[1], [0], [0], [1], [0, 0, 1, 1], [], []>, precision = #tpu.contract_precision<fp32>} : vector<16x16xf32>, vector<16x16xf32>, vector<16x16xf32> -> vector<16x16xf32>
    %34 = arith.subf %32, %33 : vector<16x16xf32>
    %cst_40 = arith.constant dense<0.000000e+00> : vector<16x16xf32>
    %35 = tpu.matmul %2, %31, %cst_40 {dimension_numbers = #tpu.dot_dimension_numbers<[1], [0], [0], [1], [0, 0, 1, 1], [], []>, precision = #tpu.contract_precision<fp32>} : vector<16x16xf32>, vector<16x16xf32>, vector<16x16xf32> -> vector<16x16xf32>
    %cst_41 = arith.constant dense<0.000000e+00> : vector<16x16xf32>
    %36 = tpu.matmul %3, %30, %cst_41 {dimension_numbers = #tpu.dot_dimension_numbers<[1], [0], [0], [1], [0, 0, 1, 1], [], []>, precision = #tpu.contract_precision<fp32>} : vector<16x16xf32>, vector<16x16xf32>, vector<16x16xf32> -> vector<16x16xf32>
    %37 = arith.addf %35, %36 : vector<16x16xf32>
    %c0_42 = arith.constant 0 : index
    %c3 = arith.constant 3 : index
    %c0_43 = arith.constant 0 : index
    %c0_44 = arith.constant 0 : index
    %38 = vector.load %arg3[%c0_42, %c3, %c0_43, %c0_44] : memref<1x4x16x16xf32, #tpu.memory_space<vmem>>, vector<1x1x16x16xf32>
    %39 = vector.shape_cast %38 : vector<1x1x16x16xf32> to vector<16x16xf32>
    %cst_45 = arith.constant dense<0.000000e+00> : vector<16x16xf32>
    %40 = tpu.matmul %39, %0, %cst_45 {dimension_numbers = #tpu.dot_dimension_numbers<[1], [0], [0], [1], [0, 0, 1, 1], [], []>, precision = #tpu.contract_precision<fp32>} : vector<16x16xf32>, vector<16x16xf32>, vector<16x16xf32> -> vector<16x16xf32>
    %cst_46 = arith.constant dense<0.000000e+00> : vector<16x16xf32>
    %41 = tpu.matmul %39, %1, %cst_46 {dimension_numbers = #tpu.dot_dimension_numbers<[1], [0], [0], [1], [0, 0, 1, 1], [], []>, precision = #tpu.contract_precision<fp32>} : vector<16x16xf32>, vector<16x16xf32>, vector<16x16xf32> -> vector<16x16xf32>
    %cst_47 = arith.constant dense<0.000000e+00> : vector<16x16xf32>
    %42 = tpu.matmul %2, %40, %cst_47 {dimension_numbers = #tpu.dot_dimension_numbers<[1], [0], [0], [1], [0, 0, 1, 1], [], []>, precision = #tpu.contract_precision<fp32>} : vector<16x16xf32>, vector<16x16xf32>, vector<16x16xf32> -> vector<16x16xf32>
    %cst_48 = arith.constant dense<0.000000e+00> : vector<16x16xf32>
    %43 = tpu.matmul %3, %41, %cst_48 {dimension_numbers = #tpu.dot_dimension_numbers<[1], [0], [0], [1], [0, 0, 1, 1], [], []>, precision = #tpu.contract_precision<fp32>} : vector<16x16xf32>, vector<16x16xf32>, vector<16x16xf32> -> vector<16x16xf32>
    %44 = arith.subf %42, %43 : vector<16x16xf32>
    %cst_49 = arith.constant dense<0.000000e+00> : vector<16x16xf32>
    %45 = tpu.matmul %2, %41, %cst_49 {dimension_numbers = #tpu.dot_dimension_numbers<[1], [0], [0], [1], [0, 0, 1, 1], [], []>, precision = #tpu.contract_precision<fp32>} : vector<16x16xf32>, vector<16x16xf32>, vector<16x16xf32> -> vector<16x16xf32>
    %cst_50 = arith.constant dense<0.000000e+00> : vector<16x16xf32>
    %46 = tpu.matmul %3, %40, %cst_50 {dimension_numbers = #tpu.dot_dimension_numbers<[1], [0], [0], [1], [0, 0, 1, 1], [], []>, precision = #tpu.contract_precision<fp32>} : vector<16x16xf32>, vector<16x16xf32>, vector<16x16xf32> -> vector<16x16xf32>
    %47 = arith.addf %45, %46 : vector<16x16xf32>
    %c0_51 = arith.constant 0 : index
    %c0_52 = arith.constant 0 : index
    %48 = memref.load %arg1[%c0_51, %c0_52] : memref<8x8xf32, #tpu.memory_space<smem>>
    %49 = vector.broadcast %48 : f32 to vector<16x16xf32>
    %50 = arith.mulf %14, %49 : vector<16x16xf32>
    %c0_53 = arith.constant 0 : index
    %c1_54 = arith.constant 1 : index
    %51 = memref.load %arg1[%c0_53, %c1_54] : memref<8x8xf32, #tpu.memory_space<smem>>
    %52 = vector.broadcast %51 : f32 to vector<16x16xf32>
    %53 = arith.mulf %17, %52 : vector<16x16xf32>
    %54 = arith.addf %50, %53 : vector<16x16xf32>
    %c0_55 = arith.constant 0 : index
    %c2_56 = arith.constant 2 : index
    %55 = memref.load %arg1[%c0_55, %c2_56] : memref<8x8xf32, #tpu.memory_space<smem>>
    %56 = vector.broadcast %55 : f32 to vector<16x16xf32>
    %57 = arith.mulf %24, %56 : vector<16x16xf32>
    %58 = arith.addf %54, %57 : vector<16x16xf32>
    %c0_57 = arith.constant 0 : index
    %c3_58 = arith.constant 3 : index
    %59 = memref.load %arg1[%c0_57, %c3_58] : memref<8x8xf32, #tpu.memory_space<smem>>
    %60 = vector.broadcast %59 : f32 to vector<16x16xf32>
    %61 = arith.mulf %27, %60 : vector<16x16xf32>
    %62 = arith.addf %58, %61 : vector<16x16xf32>
    %c0_59 = arith.constant 0 : index
    %c4 = arith.constant 4 : index
    %63 = memref.load %arg1[%c0_59, %c4] : memref<8x8xf32, #tpu.memory_space<smem>>
    %64 = vector.broadcast %63 : f32 to vector<16x16xf32>
    %65 = arith.mulf %34, %64 : vector<16x16xf32>
    %66 = arith.addf %62, %65 : vector<16x16xf32>
    %c0_60 = arith.constant 0 : index
    %c5 = arith.constant 5 : index
    %67 = memref.load %arg1[%c0_60, %c5] : memref<8x8xf32, #tpu.memory_space<smem>>
    %68 = vector.broadcast %67 : f32 to vector<16x16xf32>
    %69 = arith.mulf %37, %68 : vector<16x16xf32>
    %70 = arith.addf %66, %69 : vector<16x16xf32>
    %c0_61 = arith.constant 0 : index
    %c6 = arith.constant 6 : index
    %71 = memref.load %arg1[%c0_61, %c6] : memref<8x8xf32, #tpu.memory_space<smem>>
    %72 = vector.broadcast %71 : f32 to vector<16x16xf32>
    %73 = arith.mulf %44, %72 : vector<16x16xf32>
    %74 = arith.addf %70, %73 : vector<16x16xf32>
    %c0_62 = arith.constant 0 : index
    %c7 = arith.constant 7 : index
    %75 = memref.load %arg1[%c0_62, %c7] : memref<8x8xf32, #tpu.memory_space<smem>>
    %76 = vector.broadcast %75 : f32 to vector<16x16xf32>
    %77 = arith.mulf %47, %76 : vector<16x16xf32>
    %78 = arith.addf %74, %77 : vector<16x16xf32>
    %c0_63 = arith.constant 0 : index
    %79 = memref.load %arg2[%c0_63] : memref<8xf32, #tpu.memory_space<smem>>
    %80 = vector.broadcast %79 : f32 to vector<16x16xf32>
    %81 = arith.addf %78, %80 : vector<16x16xf32>
    %cst_64 = arith.constant 2.000000e-01 : f32
    %82 = vector.broadcast %cst_64 : f32 to vector<16x16xf32>
    %83 = arith.mulf %82, %81 : vector<16x16xf32>
    %84 = arith.maximumf %81, %83 : vector<16x16xf32>
    %c1_65 = arith.constant 1 : index
    %c0_66 = arith.constant 0 : index
    %85 = memref.load %arg1[%c1_65, %c0_66] : memref<8x8xf32, #tpu.memory_space<smem>>
    %86 = vector.broadcast %85 : f32 to vector<16x16xf32>
    %87 = arith.mulf %14, %86 : vector<16x16xf32>
    %c1_67 = arith.constant 1 : index
    %c1_68 = arith.constant 1 : index
    %88 = memref.load %arg1[%c1_67, %c1_68] : memref<8x8xf32, #tpu.memory_space<smem>>
    %89 = vector.broadcast %88 : f32 to vector<16x16xf32>
    %90 = arith.mulf %17, %89 : vector<16x16xf32>
    %91 = arith.addf %87, %90 : vector<16x16xf32>
    %c1_69 = arith.constant 1 : index
    %c2_70 = arith.constant 2 : index
    %92 = memref.load %arg1[%c1_69, %c2_70] : memref<8x8xf32, #tpu.memory_space<smem>>
    %93 = vector.broadcast %92 : f32 to vector<16x16xf32>
    %94 = arith.mulf %24, %93 : vector<16x16xf32>
    %95 = arith.addf %91, %94 : vector<16x16xf32>
    %c1_71 = arith.constant 1 : index
    %c3_72 = arith.constant 3 : index
    %96 = memref.load %arg1[%c1_71, %c3_72] : memref<8x8xf32, #tpu.memory_space<smem>>
    %97 = vector.broadcast %96 : f32 to vector<16x16xf32>
    %98 = arith.mulf %27, %97 : vector<16x16xf32>
    %99 = arith.addf %95, %98 : vector<16x16xf32>
    %c1_73 = arith.constant 1 : index
    %c4_74 = arith.constant 4 : index
    %100 = memref.load %arg1[%c1_73, %c4_74] : memref<8x8xf32, #tpu.memory_space<smem>>
    %101 = vector.broadcast %100 : f32 to vector<16x16xf32>
    %102 = arith.mulf %34, %101 : vector<16x16xf32>
    %103 = arith.addf %99, %102 : vector<16x16xf32>
    %c1_75 = arith.constant 1 : index
    %c5_76 = arith.constant 5 : index
    %104 = memref.load %arg1[%c1_75, %c5_76] : memref<8x8xf32, #tpu.memory_space<smem>>
    %105 = vector.broadcast %104 : f32 to vector<16x16xf32>
    %106 = arith.mulf %37, %105 : vector<16x16xf32>
    %107 = arith.addf %103, %106 : vector<16x16xf32>
    %c1_77 = arith.constant 1 : index
    %c6_78 = arith.constant 6 : index
    %108 = memref.load %arg1[%c1_77, %c6_78] : memref<8x8xf32, #tpu.memory_space<smem>>
    %109 = vector.broadcast %108 : f32 to vector<16x16xf32>
    %110 = arith.mulf %44, %109 : vector<16x16xf32>
    %111 = arith.addf %107, %110 : vector<16x16xf32>
    %c1_79 = arith.constant 1 : index
    %c7_80 = arith.constant 7 : index
    %112 = memref.load %arg1[%c1_79, %c7_80] : memref<8x8xf32, #tpu.memory_space<smem>>
    %113 = vector.broadcast %112 : f32 to vector<16x16xf32>
    %114 = arith.mulf %47, %113 : vector<16x16xf32>
    %115 = arith.addf %111, %114 : vector<16x16xf32>
    %c1_81 = arith.constant 1 : index
    %116 = memref.load %arg2[%c1_81] : memref<8xf32, #tpu.memory_space<smem>>
    %117 = vector.broadcast %116 : f32 to vector<16x16xf32>
    %118 = arith.addf %115, %117 : vector<16x16xf32>
    %cst_82 = arith.constant 2.000000e-01 : f32
    %119 = vector.broadcast %cst_82 : f32 to vector<16x16xf32>
    %120 = arith.mulf %119, %118 : vector<16x16xf32>
    %121 = arith.maximumf %118, %120 : vector<16x16xf32>
    %c2_83 = arith.constant 2 : index
    %c0_84 = arith.constant 0 : index
    %122 = memref.load %arg1[%c2_83, %c0_84] : memref<8x8xf32, #tpu.memory_space<smem>>
    %123 = vector.broadcast %122 : f32 to vector<16x16xf32>
    %124 = arith.mulf %14, %123 : vector<16x16xf32>
    %c2_85 = arith.constant 2 : index
    %c1_86 = arith.constant 1 : index
    %125 = memref.load %arg1[%c2_85, %c1_86] : memref<8x8xf32, #tpu.memory_space<smem>>
    %126 = vector.broadcast %125 : f32 to vector<16x16xf32>
    %127 = arith.mulf %17, %126 : vector<16x16xf32>
    %128 = arith.addf %124, %127 : vector<16x16xf32>
    %c2_87 = arith.constant 2 : index
    %c2_88 = arith.constant 2 : index
    %129 = memref.load %arg1[%c2_87, %c2_88] : memref<8x8xf32, #tpu.memory_space<smem>>
    %130 = vector.broadcast %129 : f32 to vector<16x16xf32>
    %131 = arith.mulf %24, %130 : vector<16x16xf32>
    %132 = arith.addf %128, %131 : vector<16x16xf32>
    %c2_89 = arith.constant 2 : index
    %c3_90 = arith.constant 3 : index
    %133 = memref.load %arg1[%c2_89, %c3_90] : memref<8x8xf32, #tpu.memory_space<smem>>
    %134 = vector.broadcast %133 : f32 to vector<16x16xf32>
    %135 = arith.mulf %27, %134 : vector<16x16xf32>
    %136 = arith.addf %132, %135 : vector<16x16xf32>
    %c2_91 = arith.constant 2 : index
    %c4_92 = arith.constant 4 : index
    %137 = memref.load %arg1[%c2_91, %c4_92] : memref<8x8xf32, #tpu.memory_space<smem>>
    %138 = vector.broadcast %137 : f32 to vector<16x16xf32>
    %139 = arith.mulf %34, %138 : vector<16x16xf32>
    %140 = arith.addf %136, %139 : vector<16x16xf32>
    %c2_93 = arith.constant 2 : index
    %c5_94 = arith.constant 5 : index
    %141 = memref.load %arg1[%c2_93, %c5_94] : memref<8x8xf32, #tpu.memory_space<smem>>
    %142 = vector.broadcast %141 : f32 to vector<16x16xf32>
    %143 = arith.mulf %37, %142 : vector<16x16xf32>
    %144 = arith.addf %140, %143 : vector<16x16xf32>
    %c2_95 = arith.constant 2 : index
    %c6_96 = arith.constant 6 : index
    %145 = memref.load %arg1[%c2_95, %c6_96] : memref<8x8xf32, #tpu.memory_space<smem>>
    %146 = vector.broadcast %145 : f32 to vector<16x16xf32>
    %147 = arith.mulf %44, %146 : vector<16x16xf32>
    %148 = arith.addf %144, %147 : vector<16x16xf32>
    %c2_97 = arith.constant 2 : index
    %c7_98 = arith.constant 7 : index
    %149 = memref.load %arg1[%c2_97, %c7_98] : memref<8x8xf32, #tpu.memory_space<smem>>
    %150 = vector.broadcast %149 : f32 to vector<16x16xf32>
    %151 = arith.mulf %47, %150 : vector<16x16xf32>
    %152 = arith.addf %148, %151 : vector<16x16xf32>
    %c2_99 = arith.constant 2 : index
    %153 = memref.load %arg2[%c2_99] : memref<8xf32, #tpu.memory_space<smem>>
    %154 = vector.broadcast %153 : f32 to vector<16x16xf32>
    %155 = arith.addf %152, %154 : vector<16x16xf32>
    %cst_100 = arith.constant 2.000000e-01 : f32
    %156 = vector.broadcast %cst_100 : f32 to vector<16x16xf32>
    %157 = arith.mulf %156, %155 : vector<16x16xf32>
    %158 = arith.maximumf %155, %157 : vector<16x16xf32>
    %c3_101 = arith.constant 3 : index
    %c0_102 = arith.constant 0 : index
    %159 = memref.load %arg1[%c3_101, %c0_102] : memref<8x8xf32, #tpu.memory_space<smem>>
    %160 = vector.broadcast %159 : f32 to vector<16x16xf32>
    %161 = arith.mulf %14, %160 : vector<16x16xf32>
    %c3_103 = arith.constant 3 : index
    %c1_104 = arith.constant 1 : index
    %162 = memref.load %arg1[%c3_103, %c1_104] : memref<8x8xf32, #tpu.memory_space<smem>>
    %163 = vector.broadcast %162 : f32 to vector<16x16xf32>
    %164 = arith.mulf %17, %163 : vector<16x16xf32>
    %165 = arith.addf %161, %164 : vector<16x16xf32>
    %c3_105 = arith.constant 3 : index
    %c2_106 = arith.constant 2 : index
    %166 = memref.load %arg1[%c3_105, %c2_106] : memref<8x8xf32, #tpu.memory_space<smem>>
    %167 = vector.broadcast %166 : f32 to vector<16x16xf32>
    %168 = arith.mulf %24, %167 : vector<16x16xf32>
    %169 = arith.addf %165, %168 : vector<16x16xf32>
    %c3_107 = arith.constant 3 : index
    %c3_108 = arith.constant 3 : index
    %170 = memref.load %arg1[%c3_107, %c3_108] : memref<8x8xf32, #tpu.memory_space<smem>>
    %171 = vector.broadcast %170 : f32 to vector<16x16xf32>
    %172 = arith.mulf %27, %171 : vector<16x16xf32>
    %173 = arith.addf %169, %172 : vector<16x16xf32>
    %c3_109 = arith.constant 3 : index
    %c4_110 = arith.constant 4 : index
    %174 = memref.load %arg1[%c3_109, %c4_110] : memref<8x8xf32, #tpu.memory_space<smem>>
    %175 = vector.broadcast %174 : f32 to vector<16x16xf32>
    %176 = arith.mulf %34, %175 : vector<16x16xf32>
    %177 = arith.addf %173, %176 : vector<16x16xf32>
    %c3_111 = arith.constant 3 : index
    %c5_112 = arith.constant 5 : index
    %178 = memref.load %arg1[%c3_111, %c5_112] : memref<8x8xf32, #tpu.memory_space<smem>>
    %179 = vector.broadcast %178 : f32 to vector<16x16xf32>
    %180 = arith.mulf %37, %179 : vector<16x16xf32>
    %181 = arith.addf %177, %180 : vector<16x16xf32>
    %c3_113 = arith.constant 3 : index
    %c6_114 = arith.constant 6 : index
    %182 = memref.load %arg1[%c3_113, %c6_114] : memref<8x8xf32, #tpu.memory_space<smem>>
    %183 = vector.broadcast %182 : f32 to vector<16x16xf32>
    %184 = arith.mulf %44, %183 : vector<16x16xf32>
    %185 = arith.addf %181, %184 : vector<16x16xf32>
    %c3_115 = arith.constant 3 : index
    %c7_116 = arith.constant 7 : index
    %186 = memref.load %arg1[%c3_115, %c7_116] : memref<8x8xf32, #tpu.memory_space<smem>>
    %187 = vector.broadcast %186 : f32 to vector<16x16xf32>
    %188 = arith.mulf %47, %187 : vector<16x16xf32>
    %189 = arith.addf %185, %188 : vector<16x16xf32>
    %c3_117 = arith.constant 3 : index
    %190 = memref.load %arg2[%c3_117] : memref<8xf32, #tpu.memory_space<smem>>
    %191 = vector.broadcast %190 : f32 to vector<16x16xf32>
    %192 = arith.addf %189, %191 : vector<16x16xf32>
    %cst_118 = arith.constant 2.000000e-01 : f32
    %193 = vector.broadcast %cst_118 : f32 to vector<16x16xf32>
    %194 = arith.mulf %193, %192 : vector<16x16xf32>
    %195 = arith.maximumf %192, %194 : vector<16x16xf32>
    %c4_119 = arith.constant 4 : index
    %c0_120 = arith.constant 0 : index
    %196 = memref.load %arg1[%c4_119, %c0_120] : memref<8x8xf32, #tpu.memory_space<smem>>
    %197 = vector.broadcast %196 : f32 to vector<16x16xf32>
    %198 = arith.mulf %14, %197 : vector<16x16xf32>
    %c4_121 = arith.constant 4 : index
    %c1_122 = arith.constant 1 : index
    %199 = memref.load %arg1[%c4_121, %c1_122] : memref<8x8xf32, #tpu.memory_space<smem>>
    %200 = vector.broadcast %199 : f32 to vector<16x16xf32>
    %201 = arith.mulf %17, %200 : vector<16x16xf32>
    %202 = arith.addf %198, %201 : vector<16x16xf32>
    %c4_123 = arith.constant 4 : index
    %c2_124 = arith.constant 2 : index
    %203 = memref.load %arg1[%c4_123, %c2_124] : memref<8x8xf32, #tpu.memory_space<smem>>
    %204 = vector.broadcast %203 : f32 to vector<16x16xf32>
    %205 = arith.mulf %24, %204 : vector<16x16xf32>
    %206 = arith.addf %202, %205 : vector<16x16xf32>
    %c4_125 = arith.constant 4 : index
    %c3_126 = arith.constant 3 : index
    %207 = memref.load %arg1[%c4_125, %c3_126] : memref<8x8xf32, #tpu.memory_space<smem>>
    %208 = vector.broadcast %207 : f32 to vector<16x16xf32>
    %209 = arith.mulf %27, %208 : vector<16x16xf32>
    %210 = arith.addf %206, %209 : vector<16x16xf32>
    %c4_127 = arith.constant 4 : index
    %c4_128 = arith.constant 4 : index
    %211 = memref.load %arg1[%c4_127, %c4_128] : memref<8x8xf32, #tpu.memory_space<smem>>
    %212 = vector.broadcast %211 : f32 to vector<16x16xf32>
    %213 = arith.mulf %34, %212 : vector<16x16xf32>
    %214 = arith.addf %210, %213 : vector<16x16xf32>
    %c4_129 = arith.constant 4 : index
    %c5_130 = arith.constant 5 : index
    %215 = memref.load %arg1[%c4_129, %c5_130] : memref<8x8xf32, #tpu.memory_space<smem>>
    %216 = vector.broadcast %215 : f32 to vector<16x16xf32>
    %217 = arith.mulf %37, %216 : vector<16x16xf32>
    %218 = arith.addf %214, %217 : vector<16x16xf32>
    %c4_131 = arith.constant 4 : index
    %c6_132 = arith.constant 6 : index
    %219 = memref.load %arg1[%c4_131, %c6_132] : memref<8x8xf32, #tpu.memory_space<smem>>
    %220 = vector.broadcast %219 : f32 to vector<16x16xf32>
    %221 = arith.mulf %44, %220 : vector<16x16xf32>
    %222 = arith.addf %218, %221 : vector<16x16xf32>
    %c4_133 = arith.constant 4 : index
    %c7_134 = arith.constant 7 : index
    %223 = memref.load %arg1[%c4_133, %c7_134] : memref<8x8xf32, #tpu.memory_space<smem>>
    %224 = vector.broadcast %223 : f32 to vector<16x16xf32>
    %225 = arith.mulf %47, %224 : vector<16x16xf32>
    %226 = arith.addf %222, %225 : vector<16x16xf32>
    %c4_135 = arith.constant 4 : index
    %227 = memref.load %arg2[%c4_135] : memref<8xf32, #tpu.memory_space<smem>>
    %228 = vector.broadcast %227 : f32 to vector<16x16xf32>
    %229 = arith.addf %226, %228 : vector<16x16xf32>
    %cst_136 = arith.constant 2.000000e-01 : f32
    %230 = vector.broadcast %cst_136 : f32 to vector<16x16xf32>
    %231 = arith.mulf %230, %229 : vector<16x16xf32>
    %232 = arith.maximumf %229, %231 : vector<16x16xf32>
    %c5_137 = arith.constant 5 : index
    %c0_138 = arith.constant 0 : index
    %233 = memref.load %arg1[%c5_137, %c0_138] : memref<8x8xf32, #tpu.memory_space<smem>>
    %234 = vector.broadcast %233 : f32 to vector<16x16xf32>
    %235 = arith.mulf %14, %234 : vector<16x16xf32>
    %c5_139 = arith.constant 5 : index
    %c1_140 = arith.constant 1 : index
    %236 = memref.load %arg1[%c5_139, %c1_140] : memref<8x8xf32, #tpu.memory_space<smem>>
    %237 = vector.broadcast %236 : f32 to vector<16x16xf32>
    %238 = arith.mulf %17, %237 : vector<16x16xf32>
    %239 = arith.addf %235, %238 : vector<16x16xf32>
    %c5_141 = arith.constant 5 : index
    %c2_142 = arith.constant 2 : index
    %240 = memref.load %arg1[%c5_141, %c2_142] : memref<8x8xf32, #tpu.memory_space<smem>>
    %241 = vector.broadcast %240 : f32 to vector<16x16xf32>
    %242 = arith.mulf %24, %241 : vector<16x16xf32>
    %243 = arith.addf %239, %242 : vector<16x16xf32>
    %c5_143 = arith.constant 5 : index
    %c3_144 = arith.constant 3 : index
    %244 = memref.load %arg1[%c5_143, %c3_144] : memref<8x8xf32, #tpu.memory_space<smem>>
    %245 = vector.broadcast %244 : f32 to vector<16x16xf32>
    %246 = arith.mulf %27, %245 : vector<16x16xf32>
    %247 = arith.addf %243, %246 : vector<16x16xf32>
    %c5_145 = arith.constant 5 : index
    %c4_146 = arith.constant 4 : index
    %248 = memref.load %arg1[%c5_145, %c4_146] : memref<8x8xf32, #tpu.memory_space<smem>>
    %249 = vector.broadcast %248 : f32 to vector<16x16xf32>
    %250 = arith.mulf %34, %249 : vector<16x16xf32>
    %251 = arith.addf %247, %250 : vector<16x16xf32>
    %c5_147 = arith.constant 5 : index
    %c5_148 = arith.constant 5 : index
    %252 = memref.load %arg1[%c5_147, %c5_148] : memref<8x8xf32, #tpu.memory_space<smem>>
    %253 = vector.broadcast %252 : f32 to vector<16x16xf32>
    %254 = arith.mulf %37, %253 : vector<16x16xf32>
    %255 = arith.addf %251, %254 : vector<16x16xf32>
    %c5_149 = arith.constant 5 : index
    %c6_150 = arith.constant 6 : index
    %256 = memref.load %arg1[%c5_149, %c6_150] : memref<8x8xf32, #tpu.memory_space<smem>>
    %257 = vector.broadcast %256 : f32 to vector<16x16xf32>
    %258 = arith.mulf %44, %257 : vector<16x16xf32>
    %259 = arith.addf %255, %258 : vector<16x16xf32>
    %c5_151 = arith.constant 5 : index
    %c7_152 = arith.constant 7 : index
    %260 = memref.load %arg1[%c5_151, %c7_152] : memref<8x8xf32, #tpu.memory_space<smem>>
    %261 = vector.broadcast %260 : f32 to vector<16x16xf32>
    %262 = arith.mulf %47, %261 : vector<16x16xf32>
    %263 = arith.addf %259, %262 : vector<16x16xf32>
    %c5_153 = arith.constant 5 : index
    %264 = memref.load %arg2[%c5_153] : memref<8xf32, #tpu.memory_space<smem>>
    %265 = vector.broadcast %264 : f32 to vector<16x16xf32>
    %266 = arith.addf %263, %265 : vector<16x16xf32>
    %cst_154 = arith.constant 2.000000e-01 : f32
    %267 = vector.broadcast %cst_154 : f32 to vector<16x16xf32>
    %268 = arith.mulf %267, %266 : vector<16x16xf32>
    %269 = arith.maximumf %266, %268 : vector<16x16xf32>
    %c6_155 = arith.constant 6 : index
    %c0_156 = arith.constant 0 : index
    %270 = memref.load %arg1[%c6_155, %c0_156] : memref<8x8xf32, #tpu.memory_space<smem>>
    %271 = vector.broadcast %270 : f32 to vector<16x16xf32>
    %272 = arith.mulf %14, %271 : vector<16x16xf32>
    %c6_157 = arith.constant 6 : index
    %c1_158 = arith.constant 1 : index
    %273 = memref.load %arg1[%c6_157, %c1_158] : memref<8x8xf32, #tpu.memory_space<smem>>
    %274 = vector.broadcast %273 : f32 to vector<16x16xf32>
    %275 = arith.mulf %17, %274 : vector<16x16xf32>
    %276 = arith.addf %272, %275 : vector<16x16xf32>
    %c6_159 = arith.constant 6 : index
    %c2_160 = arith.constant 2 : index
    %277 = memref.load %arg1[%c6_159, %c2_160] : memref<8x8xf32, #tpu.memory_space<smem>>
    %278 = vector.broadcast %277 : f32 to vector<16x16xf32>
    %279 = arith.mulf %24, %278 : vector<16x16xf32>
    %280 = arith.addf %276, %279 : vector<16x16xf32>
    %c6_161 = arith.constant 6 : index
    %c3_162 = arith.constant 3 : index
    %281 = memref.load %arg1[%c6_161, %c3_162] : memref<8x8xf32, #tpu.memory_space<smem>>
    %282 = vector.broadcast %281 : f32 to vector<16x16xf32>
    %283 = arith.mulf %27, %282 : vector<16x16xf32>
    %284 = arith.addf %280, %283 : vector<16x16xf32>
    %c6_163 = arith.constant 6 : index
    %c4_164 = arith.constant 4 : index
    %285 = memref.load %arg1[%c6_163, %c4_164] : memref<8x8xf32, #tpu.memory_space<smem>>
    %286 = vector.broadcast %285 : f32 to vector<16x16xf32>
    %287 = arith.mulf %34, %286 : vector<16x16xf32>
    %288 = arith.addf %284, %287 : vector<16x16xf32>
    %c6_165 = arith.constant 6 : index
    %c5_166 = arith.constant 5 : index
    %289 = memref.load %arg1[%c6_165, %c5_166] : memref<8x8xf32, #tpu.memory_space<smem>>
    %290 = vector.broadcast %289 : f32 to vector<16x16xf32>
    %291 = arith.mulf %37, %290 : vector<16x16xf32>
    %292 = arith.addf %288, %291 : vector<16x16xf32>
    %c6_167 = arith.constant 6 : index
    %c6_168 = arith.constant 6 : index
    %293 = memref.load %arg1[%c6_167, %c6_168] : memref<8x8xf32, #tpu.memory_space<smem>>
    %294 = vector.broadcast %293 : f32 to vector<16x16xf32>
    %295 = arith.mulf %44, %294 : vector<16x16xf32>
    %296 = arith.addf %292, %295 : vector<16x16xf32>
    %c6_169 = arith.constant 6 : index
    %c7_170 = arith.constant 7 : index
    %297 = memref.load %arg1[%c6_169, %c7_170] : memref<8x8xf32, #tpu.memory_space<smem>>
    %298 = vector.broadcast %297 : f32 to vector<16x16xf32>
    %299 = arith.mulf %47, %298 : vector<16x16xf32>
    %300 = arith.addf %296, %299 : vector<16x16xf32>
    %c6_171 = arith.constant 6 : index
    %301 = memref.load %arg2[%c6_171] : memref<8xf32, #tpu.memory_space<smem>>
    %302 = vector.broadcast %301 : f32 to vector<16x16xf32>
    %303 = arith.addf %300, %302 : vector<16x16xf32>
    %cst_172 = arith.constant 2.000000e-01 : f32
    %304 = vector.broadcast %cst_172 : f32 to vector<16x16xf32>
    %305 = arith.mulf %304, %303 : vector<16x16xf32>
    %306 = arith.maximumf %303, %305 : vector<16x16xf32>
    %c7_173 = arith.constant 7 : index
    %c0_174 = arith.constant 0 : index
    %307 = memref.load %arg1[%c7_173, %c0_174] : memref<8x8xf32, #tpu.memory_space<smem>>
    %308 = vector.broadcast %307 : f32 to vector<16x16xf32>
    %309 = arith.mulf %14, %308 : vector<16x16xf32>
    %c7_175 = arith.constant 7 : index
    %c1_176 = arith.constant 1 : index
    %310 = memref.load %arg1[%c7_175, %c1_176] : memref<8x8xf32, #tpu.memory_space<smem>>
    %311 = vector.broadcast %310 : f32 to vector<16x16xf32>
    %312 = arith.mulf %17, %311 : vector<16x16xf32>
    %313 = arith.addf %309, %312 : vector<16x16xf32>
    %c7_177 = arith.constant 7 : index
    %c2_178 = arith.constant 2 : index
    %314 = memref.load %arg1[%c7_177, %c2_178] : memref<8x8xf32, #tpu.memory_space<smem>>
    %315 = vector.broadcast %314 : f32 to vector<16x16xf32>
    %316 = arith.mulf %24, %315 : vector<16x16xf32>
    %317 = arith.addf %313, %316 : vector<16x16xf32>
    %c7_179 = arith.constant 7 : index
    %c3_180 = arith.constant 3 : index
    %318 = memref.load %arg1[%c7_179, %c3_180] : memref<8x8xf32, #tpu.memory_space<smem>>
    %319 = vector.broadcast %318 : f32 to vector<16x16xf32>
    %320 = arith.mulf %27, %319 : vector<16x16xf32>
    %321 = arith.addf %317, %320 : vector<16x16xf32>
    %c7_181 = arith.constant 7 : index
    %c4_182 = arith.constant 4 : index
    %322 = memref.load %arg1[%c7_181, %c4_182] : memref<8x8xf32, #tpu.memory_space<smem>>
    %323 = vector.broadcast %322 : f32 to vector<16x16xf32>
    %324 = arith.mulf %34, %323 : vector<16x16xf32>
    %325 = arith.addf %321, %324 : vector<16x16xf32>
    %c7_183 = arith.constant 7 : index
    %c5_184 = arith.constant 5 : index
    %326 = memref.load %arg1[%c7_183, %c5_184] : memref<8x8xf32, #tpu.memory_space<smem>>
    %327 = vector.broadcast %326 : f32 to vector<16x16xf32>
    %328 = arith.mulf %37, %327 : vector<16x16xf32>
    %329 = arith.addf %325, %328 : vector<16x16xf32>
    %c7_185 = arith.constant 7 : index
    %c6_186 = arith.constant 6 : index
    %330 = memref.load %arg1[%c7_185, %c6_186] : memref<8x8xf32, #tpu.memory_space<smem>>
    %331 = vector.broadcast %330 : f32 to vector<16x16xf32>
    %332 = arith.mulf %44, %331 : vector<16x16xf32>
    %333 = arith.addf %329, %332 : vector<16x16xf32>
    %c7_187 = arith.constant 7 : index
    %c7_188 = arith.constant 7 : index
    %334 = memref.load %arg1[%c7_187, %c7_188] : memref<8x8xf32, #tpu.memory_space<smem>>
    %335 = vector.broadcast %334 : f32 to vector<16x16xf32>
    %336 = arith.mulf %47, %335 : vector<16x16xf32>
    %337 = arith.addf %333, %336 : vector<16x16xf32>
    %c7_189 = arith.constant 7 : index
    %338 = memref.load %arg2[%c7_189] : memref<8xf32, #tpu.memory_space<smem>>
    %339 = vector.broadcast %338 : f32 to vector<16x16xf32>
    %340 = arith.addf %337, %339 : vector<16x16xf32>
    %cst_190 = arith.constant 2.000000e-01 : f32
    %341 = vector.broadcast %cst_190 : f32 to vector<16x16xf32>
    %342 = arith.mulf %341, %340 : vector<16x16xf32>
    %343 = arith.maximumf %340, %342 : vector<16x16xf32>
    %cst_191 = arith.constant dense<0.000000e+00> : vector<16x16xf32>
    %344 = tpu.matmul %4, %84, %cst_191 {dimension_numbers = #tpu.dot_dimension_numbers<[1], [0], [0], [1], [0, 0, 1, 1], [], []>, precision = #tpu.contract_precision<fp32>} : vector<16x16xf32>, vector<16x16xf32>, vector<16x16xf32> -> vector<16x16xf32>
    %cst_192 = arith.constant dense<0.000000e+00> : vector<16x16xf32>
    %345 = tpu.matmul %5, %121, %cst_192 {dimension_numbers = #tpu.dot_dimension_numbers<[1], [0], [0], [1], [0, 0, 1, 1], [], []>, precision = #tpu.contract_precision<fp32>} : vector<16x16xf32>, vector<16x16xf32>, vector<16x16xf32> -> vector<16x16xf32>
    %346 = arith.subf %344, %345 : vector<16x16xf32>
    %cst_193 = arith.constant dense<0.000000e+00> : vector<16x16xf32>
    %347 = tpu.matmul %4, %121, %cst_193 {dimension_numbers = #tpu.dot_dimension_numbers<[1], [0], [0], [1], [0, 0, 1, 1], [], []>, precision = #tpu.contract_precision<fp32>} : vector<16x16xf32>, vector<16x16xf32>, vector<16x16xf32> -> vector<16x16xf32>
    %cst_194 = arith.constant dense<0.000000e+00> : vector<16x16xf32>
    %348 = tpu.matmul %5, %84, %cst_194 {dimension_numbers = #tpu.dot_dimension_numbers<[1], [0], [0], [1], [0, 0, 1, 1], [], []>, precision = #tpu.contract_precision<fp32>} : vector<16x16xf32>, vector<16x16xf32>, vector<16x16xf32> -> vector<16x16xf32>
    %349 = arith.addf %347, %348 : vector<16x16xf32>
    %cst_195 = arith.constant dense<0.000000e+00> : vector<16x16xf32>
    %350 = tpu.matmul %346, %6, %cst_195 {dimension_numbers = #tpu.dot_dimension_numbers<[1], [0], [0], [1], [0, 0, 1, 1], [], []>, precision = #tpu.contract_precision<fp32>} : vector<16x16xf32>, vector<16x16xf32>, vector<16x16xf32> -> vector<16x16xf32>
    %cst_196 = arith.constant dense<0.000000e+00> : vector<16x16xf32>
    %351 = tpu.matmul %349, %7, %cst_196 {dimension_numbers = #tpu.dot_dimension_numbers<[1], [0], [0], [1], [0, 0, 1, 1], [], []>, precision = #tpu.contract_precision<fp32>} : vector<16x16xf32>, vector<16x16xf32>, vector<16x16xf32> -> vector<16x16xf32>
    %352 = arith.subf %350, %351 : vector<16x16xf32>
    %c0_197 = arith.constant 0 : index
    %c0_198 = arith.constant 0 : index
    %c0_199 = arith.constant 0 : index
    %c0_200 = arith.constant 0 : index
    %353 = vector.load %arg12[%c0_197, %c0_198, %c0_199, %c0_200] : memref<1x4x16x16xf32, #tpu.memory_space<vmem>>, vector<1x1x16x16xf32>
    %354 = vector.shape_cast %353 : vector<1x1x16x16xf32> to vector<16x16xf32>
    %355 = vector.shape_cast %352 : vector<16x16xf32> to vector<1x1x16x16xf32>
    tpu.vector_store %arg12[%c0_197, %c0_198, %c0_199, %c0_200], %355 {strides = array<i32>} : memref<1x4x16x16xf32, #tpu.memory_space<vmem>>, vector<1x1x16x16xf32>,
    %cst_201 = arith.constant dense<0.000000e+00> : vector<16x16xf32>
    %356 = tpu.matmul %4, %158, %cst_201 {dimension_numbers = #tpu.dot_dimension_numbers<[1], [0], [0], [1], [0, 0, 1, 1], [], []>, precision = #tpu.contract_precision<fp32>} : vector<16x16xf32>, vector<16x16xf32>, vector<16x16xf32> -> vector<16x16xf32>
    %cst_202 = arith.constant dense<0.000000e+00> : vector<16x16xf32>
    %357 = tpu.matmul %5, %195, %cst_202 {dimension_numbers = #tpu.dot_dimension_numbers<[1], [0], [0], [1], [0, 0, 1, 1], [], []>, precision = #tpu.contract_precision<fp32>} : vector<16x16xf32>, vector<16x16xf32>, vector<16x16xf32> -> vector<16x16xf32>
    %358 = arith.subf %356, %357 : vector<16x16xf32>
    %cst_203 = arith.constant dense<0.000000e+00> : vector<16x16xf32>
    %359 = tpu.matmul %4, %195, %cst_203 {dimension_numbers = #tpu.dot_dimension_numbers<[1], [0], [0], [1], [0, 0, 1, 1], [], []>, precision = #tpu.contract_precision<fp32>} : vector<16x16xf32>, vector<16x16xf32>, vector<16x16xf32> -> vector<16x16xf32>
    %cst_204 = arith.constant dense<0.000000e+00> : vector<16x16xf32>
    %360 = tpu.matmul %5, %158, %cst_204 {dimension_numbers = #tpu.dot_dimension_numbers<[1], [0], [0], [1], [0, 0, 1, 1], [], []>, precision = #tpu.contract_precision<fp32>} : vector<16x16xf32>, vector<16x16xf32>, vector<16x16xf32> -> vector<16x16xf32>
    %361 = arith.addf %359, %360 : vector<16x16xf32>
    %cst_205 = arith.constant dense<0.000000e+00> : vector<16x16xf32>
    %362 = tpu.matmul %358, %6, %cst_205 {dimension_numbers = #tpu.dot_dimension_numbers<[1], [0], [0], [1], [0, 0, 1, 1], [], []>, precision = #tpu.contract_precision<fp32>} : vector<16x16xf32>, vector<16x16xf32>, vector<16x16xf32> -> vector<16x16xf32>
    %cst_206 = arith.constant dense<0.000000e+00> : vector<16x16xf32>
    %363 = tpu.matmul %361, %7, %cst_206 {dimension_numbers = #tpu.dot_dimension_numbers<[1], [0], [0], [1], [0, 0, 1, 1], [], []>, precision = #tpu.contract_precision<fp32>} : vector<16x16xf32>, vector<16x16xf32>, vector<16x16xf32> -> vector<16x16xf32>
    %364 = arith.subf %362, %363 : vector<16x16xf32>
    %c0_207 = arith.constant 0 : index
    %c1_208 = arith.constant 1 : index
    %c0_209 = arith.constant 0 : index
    %c0_210 = arith.constant 0 : index
    %365 = vector.load %arg12[%c0_207, %c1_208, %c0_209, %c0_210] : memref<1x4x16x16xf32, #tpu.memory_space<vmem>>, vector<1x1x16x16xf32>
    %366 = vector.shape_cast %365 : vector<1x1x16x16xf32> to vector<16x16xf32>
    %367 = vector.shape_cast %364 : vector<16x16xf32> to vector<1x1x16x16xf32>
    tpu.vector_store %arg12[%c0_207, %c1_208, %c0_209, %c0_210], %367 {strides = array<i32>} : memref<1x4x16x16xf32, #tpu.memory_space<vmem>>, vector<1x1x16x16xf32>,
    %cst_211 = arith.constant dense<0.000000e+00> : vector<16x16xf32>
    %368 = tpu.matmul %4, %232, %cst_211 {dimension_numbers = #tpu.dot_dimension_numbers<[1], [0], [0], [1], [0, 0, 1, 1], [], []>, precision = #tpu.contract_precision<fp32>} : vector<16x16xf32>, vector<16x16xf32>, vector<16x16xf32> -> vector<16x16xf32>
    %cst_212 = arith.constant dense<0.000000e+00> : vector<16x16xf32>
    %369 = tpu.matmul %5, %269, %cst_212 {dimension_numbers = #tpu.dot_dimension_numbers<[1], [0], [0], [1], [0, 0, 1, 1], [], []>, precision = #tpu.contract_precision<fp32>} : vector<16x16xf32>, vector<16x16xf32>, vector<16x16xf32> -> vector<16x16xf32>
    %370 = arith.subf %368, %369 : vector<16x16xf32>
    %cst_213 = arith.constant dense<0.000000e+00> : vector<16x16xf32>
    %371 = tpu.matmul %4, %269, %cst_213 {dimension_numbers = #tpu.dot_dimension_numbers<[1], [0], [0], [1], [0, 0, 1, 1], [], []>, precision = #tpu.contract_precision<fp32>} : vector<16x16xf32>, vector<16x16xf32>, vector<16x16xf32> -> vector<16x16xf32>
    %cst_214 = arith.constant dense<0.000000e+00> : vector<16x16xf32>
    %372 = tpu.matmul %5, %232, %cst_214 {dimension_numbers = #tpu.dot_dimension_numbers<[1], [0], [0], [1], [0, 0, 1, 1], [], []>, precision = #tpu.contract_precision<fp32>} : vector<16x16xf32>, vector<16x16xf32>, vector<16x16xf32> -> vector<16x16xf32>
    %373 = arith.addf %371, %372 : vector<16x16xf32>
    %cst_215 = arith.constant dense<0.000000e+00> : vector<16x16xf32>
    %374 = tpu.matmul %370, %6, %cst_215 {dimension_numbers = #tpu.dot_dimension_numbers<[1], [0], [0], [1], [0, 0, 1, 1], [], []>, precision = #tpu.contract_precision<fp32>} : vector<16x16xf32>, vector<16x16xf32>, vector<16x16xf32> -> vector<16x16xf32>
    %cst_216 = arith.constant dense<0.000000e+00> : vector<16x16xf32>
    %375 = tpu.matmul %373, %7, %cst_216 {dimension_numbers = #tpu.dot_dimension_numbers<[1], [0], [0], [1], [0, 0, 1, 1], [], []>, precision = #tpu.contract_precision<fp32>} : vector<16x16xf32>, vector<16x16xf32>, vector<16x16xf32> -> vector<16x16xf32>
    %376 = arith.subf %374, %375 : vector<16x16xf32>
    %c0_217 = arith.constant 0 : index
    %c2_218 = arith.constant 2 : index
    %c0_219 = arith.constant 0 : index
    %c0_220 = arith.constant 0 : index
    %377 = vector.load %arg12[%c0_217, %c2_218, %c0_219, %c0_220] : memref<1x4x16x16xf32, #tpu.memory_space<vmem>>, vector<1x1x16x16xf32>
    %378 = vector.shape_cast %377 : vector<1x1x16x16xf32> to vector<16x16xf32>
    %379 = vector.shape_cast %376 : vector<16x16xf32> to vector<1x1x16x16xf32>
    tpu.vector_store %arg12[%c0_217, %c2_218, %c0_219, %c0_220], %379 {strides = array<i32>} : memref<1x4x16x16xf32, #tpu.memory_space<vmem>>, vector<1x1x16x16xf32>,
    %cst_221 = arith.constant dense<0.000000e+00> : vector<16x16xf32>
    %380 = tpu.matmul %4, %306, %cst_221 {dimension_numbers = #tpu.dot_dimension_numbers<[1], [0], [0], [1], [0, 0, 1, 1], [], []>, precision = #tpu.contract_precision<fp32>} : vector<16x16xf32>, vector<16x16xf32>, vector<16x16xf32> -> vector<16x16xf32>
    %cst_222 = arith.constant dense<0.000000e+00> : vector<16x16xf32>
    %381 = tpu.matmul %5, %343, %cst_222 {dimension_numbers = #tpu.dot_dimension_numbers<[1], [0], [0], [1], [0, 0, 1, 1], [], []>, precision = #tpu.contract_precision<fp32>} : vector<16x16xf32>, vector<16x16xf32>, vector<16x16xf32> -> vector<16x16xf32>
    %382 = arith.subf %380, %381 : vector<16x16xf32>
    %cst_223 = arith.constant dense<0.000000e+00> : vector<16x16xf32>
    %383 = tpu.matmul %4, %343, %cst_223 {dimension_numbers = #tpu.dot_dimension_numbers<[1], [0], [0], [1], [0, 0, 1, 1], [], []>, precision = #tpu.contract_precision<fp32>} : vector<16x16xf32>, vector<16x16xf32>, vector<16x16xf32> -> vector<16x16xf32>
    %cst_224 = arith.constant dense<0.000000e+00> : vector<16x16xf32>
    %384 = tpu.matmul %5, %306, %cst_224 {dimension_numbers = #tpu.dot_dimension_numbers<[1], [0], [0], [1], [0, 0, 1, 1], [], []>, precision = #tpu.contract_precision<fp32>} : vector<16x16xf32>, vector<16x16xf32>, vector<16x16xf32> -> vector<16x16xf32>
    %385 = arith.addf %383, %384 : vector<16x16xf32>
    %cst_225 = arith.constant dense<0.000000e+00> : vector<16x16xf32>
    %386 = tpu.matmul %382, %6, %cst_225 {dimension_numbers = #tpu.dot_dimension_numbers<[1], [0], [0], [1], [0, 0, 1, 1], [], []>, precision = #tpu.contract_precision<fp32>} : vector<16x16xf32>, vector<16x16xf32>, vector<16x16xf32> -> vector<16x16xf32>
    %cst_226 = arith.constant dense<0.000000e+00> : vector<16x16xf32>
    %387 = tpu.matmul %385, %7, %cst_226 {dimension_numbers = #tpu.dot_dimension_numbers<[1], [0], [0], [1], [0, 0, 1, 1], [], []>, precision = #tpu.contract_precision<fp32>} : vector<16x16xf32>, vector<16x16xf32>, vector<16x16xf32> -> vector<16x16xf32>
    %388 = arith.subf %386, %387 : vector<16x16xf32>
    %c0_227 = arith.constant 0 : index
    %c3_228 = arith.constant 3 : index
    %c0_229 = arith.constant 0 : index
    %c0_230 = arith.constant 0 : index
    %389 = vector.load %arg12[%c0_227, %c3_228, %c0_229, %c0_230] : memref<1x4x16x16xf32, #tpu.memory_space<vmem>>, vector<1x1x16x16xf32>
    %390 = vector.shape_cast %389 : vector<1x1x16x16xf32> to vector<16x16xf32>
    %391 = vector.shape_cast %388 : vector<16x16xf32> to vector<1x1x16x16xf32>
    tpu.vector_store %arg12[%c0_227, %c3_228, %c0_229, %c0_230], %391 {strides = array<i32>} : memref<1x4x16x16xf32, #tpu.memory_space<vmem>>, vector<1x1x16x16xf32>,
    return
  }
  func.func @transform_0(%arg0: i32) -> (i32, i32) {
    %c0_i32 = arith.constant 0 : i32
    %c0_i32_0 = arith.constant 0 : i32
    %c0_i32_1 = arith.constant 0 : i32
    return %c0_i32, %c0_i32_0 : i32, i32
  }
  func.func @transform_1(%arg0: i32) -> i32 {
    %c0_i32 = arith.constant 0 : i32
    %c0_i32_0 = arith.constant 0 : i32
    return %c0_i32 : i32
  }
  func.func @transform_2(%arg0: i32) -> (i32, i32, i32, i32) {
    %c0_i32 = arith.constant 0 : i32
    %c0_i32_0 = arith.constant 0 : i32
    %c0_i32_1 = arith.constant 0 : i32
    %c0_i32_2 = arith.constant 0 : i32
    return %arg0, %c0_i32, %c0_i32_0, %c0_i32_1 : i32, i32, i32, i32
  }
  func.func @transform_3(%arg0: i32) -> (i32, i32) {
    %c0_i32 = arith.constant 0 : i32
    %c0_i32_0 = arith.constant 0 : i32
    %c0_i32_1 = arith.constant 0 : i32
    return %c0_i32, %c0_i32_0 : i32, i32
  }
  func.func @transform_4(%arg0: i32) -> (i32, i32) {
    %c0_i32 = arith.constant 0 : i32
    %c0_i32_0 = arith.constant 0 : i32
    %c0_i32_1 = arith.constant 0 : i32
    return %c0_i32, %c0_i32_0 : i32, i32
  }
  func.func @transform_5(%arg0: i32) -> (i32, i32) {
    %c0_i32 = arith.constant 0 : i32
    %c0_i32_0 = arith.constant 0 : i32
    %c0_i32_1 = arith.constant 0 : i32
    return %c0_i32, %c0_i32_0 : i32, i32
  }
  func.func @transform_6(%arg0: i32) -> (i32, i32) {
    %c0_i32 = arith.constant 0 : i32
    %c0_i32_0 = arith.constant 0 : i32
    %c0_i32_1 = arith.constant 0 : i32
    return %c0_i32, %c0_i32_0 : i32, i32
  }
  func.func @transform_7(%arg0: i32) -> (i32, i32) {
    %c0_i32 = arith.constant 0 : i32
    %c0_i32_0 = arith.constant 0 : i32
    %c0_i32_1 = arith.constant 0 : i32
    return %c0_i32, %c0_i32_0 : i32, i32
  }
  func.func @transform_8(%arg0: i32) -> (i32, i32) {
    %c0_i32 = arith.constant 0 : i32
    %c0_i32_0 = arith.constant 0 : i32
    %c0_i32_1 = arith.constant 0 : i32
    return %c0_i32, %c0_i32_0 : i32, i32
  }
  func.func @transform_9(%arg0: i32) -> (i32, i32) {
    %c0_i32 = arith.constant 0 : i32
    %c0_i32_0 = arith.constant 0 : i32
    %c0_i32_1 = arith.constant 0 : i32
    return %c0_i32, %c0_i32_0 : i32, i32
  }
  func.func @transform_10(%arg0: i32) -> (i32, i32) {
    %c0_i32 = arith.constant 0 : i32
    %c0_i32_0 = arith.constant 0 : i32
    %c0_i32_1 = arith.constant 0 : i32
    return %c0_i32, %c0_i32_0 : i32, i32
  }
  func.func @transform_11(%arg0: i32) -> (i32, i32, i32, i32) {
    %c0_i32 = arith.constant 0 : i32
    %c0_i32_0 = arith.constant 0 : i32
    %c0_i32_1 = arith.constant 0 : i32
    %c0_i32_2 = arith.constant 0 : i32
    return %arg0, %c0_i32, %c0_i32_0, %c0_i32_1 : i32, i32, i32, i32
  }
}

</mosaic_0001>

<bundles_post_ra>
// kernel: tpu_custom_call.1
= control target key start
LH: loop header
LB: loop body
LE: loop exit
PB: predicated region body
PF: predicated region fallthrough
CT: control target
= control target key end

     0   :  { %s13572_s0 = inlined_call_operand.hbm [shape: f32[8,8], index: 0, kind: input, shape index: {}]   ;;  %s13573_s1 = inlined_call_operand.hbm [shape: f32[8], index: 1, kind: input, shape index: {}]   ;;  %s13574_s2 = inlined_call_operand.hbm [shape: f32[2,4,16,16], index: 2, kind: input, shape index: {}]   ;;  %s13575_s3 = inlined_call_operand.hbm [shape: f32[16,16], index: 3, kind: input, shape index: {}]   ;;  %s13576_s4 = inlined_call_operand.hbm [shape: f32[16,16], index: 4, kind: input, shape index: {}]   ;;  %s13577_s5 = inlined_call_operand.hbm [shape: f32[16,16], index: 5, kind: input, shape index: {}]   ;;  %s13578_s6 = inlined_call_operand.hbm [shape: f32[16,16], index: 6, kind: input, shape index: {}]   ;;  %s13579_s7 = inlined_call_operand.hbm [shape: f32[16,16], index: 7, kind: input, shape index: {}]   ;;  %s13580_s8 = inlined_call_operand.hbm [shape: f32[16,16], index: 8, kind: input, shape index: {}]   ;;  %s13581_s9 = inlined_call_operand.hbm [shape: f32[16,16], index: 9, kind: input, shape index: {}]   ;;  %s13582_s10 = inlined_call_operand.hbm [shape: f32[16,16], index: 10, kind: input, shape index: {}]   ;;  %s13583_s11 = inlined_call_operand.hbm [shape: f32[2,4,16,16], index: 11, kind: output, shape index: {}]  }
   0x1   :  { %13645 = sst [smem:[#allocation50_spill]] %s13572_s0 }
   0x2   :  { %13646 = sst [smem:[#allocation51_spill]] %s13573_s1 }
   0x3   :  { %13647 = sst [smem:[#allocation52_spill]] %s13575_s3 }
   0x4   :  { %13648 = sst [smem:[#allocation53_spill]] %s13576_s4 }
   0x5   :  { %13649 = sst [smem:[#allocation54_spill]] %s13577_s5 }
   0x6   :  { %13650 = sst [smem:[#allocation55_spill]] %s13578_s6 }
   0x7   :  { %16 = vsyncpa [#allocation5], 0 }
   0x8   :  { %17 = vsyncpa [#allocation7], 0 }
   0x9   :  { %18 = vsyncpa [#allocation3], 0 }
   0xa   :  { %20 = vsyncpa [#allocation3 + $0x1], 0 }
   0xb   :  { %21 = vsyncpa [#allocation10], 0 }
   0xc   :  { %22 = vsyncpa [#allocation13], 0 }
   0xd   :  { %23 = vsyncpa [#allocation16], 0 }
   0xe   :  { %24 = vsyncpa [#allocation19], 0 }
   0xf   :  { %25 = vsyncpa [#allocation4], 0 }
  0x10   :  { %27 = vsyncpa [#allocation4 + $0x1], 0  ;;  %s11199_s17 = smov 0   ;;  %s11201_s18 = smov 0  }
  0x11   :  { %s11203_s19 = smov 0   ;;  %s11205_s20 = smov 0  }
  0x12 LB: > { %s13651_s3 = sld [smem:[#allocation52_spill]]  ;;  %s11223_s24 = sadd.s32 4294967295, %s11123_s20   ;;  %s11123_s20 = sphi %s11205_s20, %s13768_s20   ;;  %s11119_s19 = sphi %s11203_s19, %s13767_s19   ;;  %s11115_s18 = sphi %s11201_s18, %s13766_s18   ;;  %s11111_s17 = sphi %s11199_s17, %s13765_s17  }
  0x13   : > { %p10465_p0 = scmp.ge.s32.totalorder %s11123_s20, 1  ;;  %p96_p1 = scmp.eq.s32.totalorder %s11223_s24, 0 }
  0x14   : > { %p300_p2 = scmp.lt.s32.totalorder %s11123_s20, 3  ;;  %s11125_s26 = smov [#allocation9]  }
  0x15   : > { %s333_s27 = sshll.u32 %s11125_s26, 4  ;;  %s13653_s5 = sld [smem:[#allocation54_spill]]  ;;  %s334_s27 = int_to_ptr.vmem [resolvable:$true] %s333_s27 }
  0x16   : > { %p11228_p3 = pnand %p10465_p0, %p300_p2  ;;  %s387_s15 = sshll.u32 %s13579_s7, 4  ;;  %s388_s15 = int_to_ptr.hbm [resolvable:$true] %s387_s15 }
  0x17   : > { %s11126_s16 = smov [#allocation12]   ;;  %s13584_s22 = smov 128  }
  0x18   : > { %s331_s23 = sshll.u32 %s13651_s3, 4  ;;  %p10626_p4 = pneg %p11228_p3  ;;  %s332_s23 = int_to_ptr.hbm [resolvable:$true] %s331_s23 }
  0x19   : > { %s361_s21 = sshll.u32 %s11126_s16, 4  ;;  %s13585_s26 = smov 8   ;;  %s362_s21 = int_to_ptr.vmem [resolvable:$true] %s361_s21 }
  0x1a   : > { %p11240_p6 = pnand %p10626_p4, %p96_p1  ;;  %s415_s13 = sshll.u32 %s13581_s9, 4  ;;  %s416_s13 = int_to_ptr.hbm [resolvable:$true] %s415_s13 }
  0x1b   : > { %s359_s30 = sshll.u32 %s13653_s5, 4  ;;  %s11129_s14 = smov [#allocation15]   ;;  %s360_s30 = int_to_ptr.hbm [resolvable:$true] %s359_s30 }
  0x1c   : > { %10635 = dma.hbm_to_vmem [thread:$0]  (!%p11240_p6), %s332_s23, 256, %s334_s27, [#allocation10], %s13584_s22, %s13584_s22, %s13585_s26  }
  0x1d   : > { %10641 = dma.hbm_to_vmem [thread:$0]  (!%p11240_p6), %s360_s30, 256, %s362_s21, [#allocation13], %s13584_s22, %s13584_s22, %s13585_s26  }
  0x1e   : > { %s389_s16 = sshll.u32 %s11129_s14, 4  ;;  %s11130_s23 = smov [#allocation18]   ;;  %s390_s16 = int_to_ptr.vmem [resolvable:$true] %s389_s16 }
  0x1f   : > { %10647 = dma.hbm_to_vmem [thread:$0]  (!%p11240_p6), %s388_s15, 256, %s390_s16, [#allocation16], %s13584_s22, %s13584_s22, %s13585_s26  }
  0x20   : > { %s417_s27 = sshll.u32 %s11130_s23, 4  ;;  %s13655_s0 = sld [smem:[#allocation50_spill]]  ;;  %s418_s27 = int_to_ptr.vmem [resolvable:$true] %s417_s27 }
  0x21   : > { %10653 = dma.hbm_to_vmem [thread:$0]  (!%p11240_p6), %s416_s13, 256, %s418_s27, [#allocation19], %s13584_s22, %s13584_s22, %s13585_s26  }
  0x22   : > { %s13656_s1 = sld [smem:[#allocation51_spill]]  ;;  %s11131_s14 = smov [#allocation2]  }
  0x23   : > { %s11132_s15 = smov [#allocation6]   ;;  %s13657_s4 = sld [smem:[#allocation53_spill]] }
  0x24   : > { %s11133_s23 = smov [#allocation11]   ;;  %s13658_s6 = sld [smem:[#allocation55_spill]] }
  0x25   : > { %s429_s5 = sshll.u32 %s13582_s10, 4  ;;  %s11136_s13 = smov [#allocation20]   ;;  %s430_s5 = int_to_ptr.hbm [resolvable:$true] %s429_s5 }
  0x26   : > { %s312_s30 = sshll.u32 %s13655_s0, 4  ;;  %s347_s0 = sshll.u32 %s11133_s23, 4  ;;  %s313_s30 = int_to_ptr.hbm [resolvable:$true] %s312_s30  ;;  %s348_s0 = int_to_ptr.vmem [resolvable:$true] %s347_s0 }
  0x27   : > { %10629 = dma.hbm_to_smem (!%p11240_p6), %s313_s30, 128, %s11131_s14, [#allocation5]  }
  0x28   : > { %s322_s29 = sshll.u32 %s13656_s1, 4  ;;  %s11134_s30 = smov [#allocation14]   ;;  %s323_s29 = int_to_ptr.hbm [resolvable:$true] %s322_s29 }
  0x29   : > { %10632 = dma.hbm_to_smem (!%p11240_p6), %s323_s29, 16, %s11132_s15, [#allocation7]  }
  0x2a   : > { %s345_s16 = sshll.u32 %s13657_s4, 4  ;;  %s373_s21 = sshll.u32 %s13658_s6, 4  ;;  %s346_s16 = int_to_ptr.hbm [resolvable:$true] %s345_s16  ;;  %s374_s21 = int_to_ptr.hbm [resolvable:$true] %s373_s21 }
  0x2b   : > { %10638 = dma.hbm_to_vmem [thread:$0]  (!%p11240_p6), %s346_s16, 256, %s348_s0, [#allocation10], %s13584_s22, %s13584_s22, %s13585_s26  }
  0x2c   : > { %s375_s28 = sshll.u32 %s11134_s30, 4  ;;  %s401_s15 = sshll.u32 %s13580_s8, 4  ;;  %s376_s28 = int_to_ptr.vmem [resolvable:$true] %s375_s28  ;;  %s402_s15 = int_to_ptr.hbm [resolvable:$true] %s401_s15 }
  0x2d   : > { %10644 = dma.hbm_to_vmem [thread:$0]  (!%p11240_p6), %s374_s21, 256, %s376_s28, [#allocation13], %s13584_s22, %s13584_s22, %s13585_s26  }
  0x2e   : > { %s11135_s16 = smov [#allocation17]   ;;  %s431_s27 = sshll.u32 %s11136_s13, 4  ;;  %s432_s27 = int_to_ptr.vmem [resolvable:$true] %s431_s27 }
  0x2f   : > { %s403_s23 = sshll.u32 %s11135_s16, 4  ;;  %s10464_s21 = sadd.s32 4294967294, %s11123_s20   ;;  %s404_s23 = int_to_ptr.vmem [resolvable:$true] %s403_s23 }
  0x30   : > { %10650 = dma.hbm_to_vmem [thread:$0]  (!%p11240_p6), %s402_s15, 256, %s404_s23, [#allocation16], %s13584_s22, %s13584_s22, %s13585_s26  }
  0x31   : > { %10656 = dma.hbm_to_vmem [thread:$0]  (!%p11240_p6), %s430_s5, 256, %s432_s27, [#allocation19], %s13584_s22, %s13584_s22, %s13585_s26  }
  0x32   : > { %s11314_s30 = sadd.s32 1, %s11123_s20   ;;  %s82_s29 = sadd.s32 1, %s11119_s19 }
  0x33   : > { %s79_s28 = ssub.s32 %s11123_s20, %s11314_s30  ;;  %p89_p8 = scmp.ne.s32.totalorder %s11119_s19, %s11115_s18 }
  0x34   : > { %p80_p7 = scmp.eq.s32.totalorder %s79_s28, 0  ;;  %p90_p9 = scmp.eq.s32.totalorder %s11123_s20, 0 }
  0x35   : > { %p95_p10 = scmp.ne.s32.totalorder %s11115_s18, %s11111_s17  ;;  %p287_p13 = scmp.eq.s32.totalorder %s11223_s24, 1 }
  0x36   : > { %s11325_s14 = scalar_select %p80_p7, %s11119_s19, %s82_s29  }
  0x37   : > { %p11327_p11 = por %p90_p9, %p89_p8  ;;  %p11333_p12 = por %p96_p1, %p95_p10 }
  0x38   : > { %p293_p0 = scmp.eq.s32.totalorder %s10464_s21, 1  ;;  %p10675_p2 = scmp.lt.s32.totalorder %s11123_s20, 2 }
  0x39   : > { %s445_s0 = sand.u32 1, %s11119_s19   ;;  %p11340_p4 = por %p287_p13, %p89_p8 }
  0x3a   : > { %p11344_p6 = por %p293_p0, %p95_p10  ;;  %s10477_s16 = sshll.u32 %s445_s0, 6 }
  0x3b   : > { %s10580_s23 = sshll.u32 %s11123_s20, 6  ;;  %s449_s29 = scalar_lea.vmem [#allocation8], %s10477_s16 }
  0x3c   : > { %s454_s28 = scalar_lea.hbm %s13574_s2, %s10580_s23  ;;  %s457_s22 = sshll.u32 %s449_s29, 4  ;;  %s458_s22 = int_to_ptr.vmem [resolvable:$true] %s457_s22 }
  0x3d   : > { %s455_s26 = sshll.u32 %s454_s28, 4  ;;  %p11354_p7 = pnand %p10675_p2, %p11327_p11  ;;  %s456_s26 = int_to_ptr.hbm [resolvable:$true] %s455_s26 }
  0x3e   : > { %s446_s1 = scalar_lea.sflag [#allocation3], %s445_s0  ;;  %s11003_s4 = sshra.s32 %s456_s26, 4  ;;  %s11004_s4 = int_to_ptr.hbm [resolvable:$true] %s11003_s4 }
  0x3f   : > { %s11005_s6 = scalar_lea.hbm %s11004_s4, 64  ;;  %p11007_p9 = pneg %p11354_p7 }
  0x40   : > { %p11006_p8 = scmp.ne.s32.totalorder %s11004_s4, %s11005_s6  ;;  %s11010_s13 = scalar_lea.hbm %s13574_s2, 128 }
  0x41   : > { %p11011_p11 = scmp.lt.s32.totalorder %s11004_s4, %s13574_s2  ;;  %p11012_p0 = scmp.lt.s32.totalorder %s11010_s13, %s11005_s6 }
  0x42   : > { %p11008_p10 = pnand %p11007_p9, %p11006_p8 }
  0x43   : > { %p11013_p2 = por %p11012_p0, %p11011_p11 }
  0x44   : > { %p11009_p13 = pneg %p11008_p10 }
  0x46   : > { %p11014_p5 = pnand %p11013_p2, %p11009_p13 }
  0x48   : > { %11017 = shalt.err (!%p11014_p5)
}
  0x49   : > { %s13664_s0 = smov 8   ;;  %s13665_s28 = smov 128  }
  0x4a   : > { %10660 = dma.hbm_to_vmem [thread:$0]  (!%p11354_p7), %s456_s26, 1024, %s458_s22, %s446_s1, %s13665_s28, %s13665_s28, %s13664_s0  }
  0x4b   : > { %469 = sbr.rel (%p11228_p3) target bundleno = 2499 (0x9c3), region = 64 }
  0x50   : > { %11078 = dma.done.wait (%p96_p1), [#allocation5], 128  }
  0x51   : > { %11080 = vsyncadd (%p96_p1), [#allocation5], 4294967168 }
  0x52   : > { %11082 = dma.done.wait (%p96_p1), [#allocation7], 16  }
  0x53   : > { %11084 = vsyncadd (%p96_p1), [#allocation7], 4294967280  ;;  %s11382_s4 = sand.u32 1, %s11115_s18  }
  0x54   : > { %s10483_s1 = sshll.u32 %s11382_s4, 6  ;;  %s482_s6 = scalar_lea.sflag [#allocation3], %s11382_s4 }
  0x55   : > { %s11388_s25 = scalar_lea.vmem [#allocation8], %s10483_s1 }
  0x56   : > { %11086 = dma.done.wait (%p11333_p12), %s482_s6, 1024  }
  0x57   : > { %11088 = vsyncadd (%p11333_p12), %s482_s6, 4294966272 }
  0x58   : > { %11090 = dma.done.wait (%p96_p1), [#allocation10], 512  }
  0x59   : > { %11092 = vsyncadd (%p96_p1), [#allocation10], 4294966784 }
  0x5a   : > { %11094 = dma.done.wait (%p96_p1), [#allocation13], 512  }
  0x5b   : > { %11096 = vsyncadd (%p96_p1), [#allocation13], 4294966784 }
  0x5c   : > { %11098 = dma.done.wait (%p96_p1), [#allocation16], 512  }
  0x5d   : > { %11100 = vsyncadd (%p96_p1), [#allocation16], 4294966784 }
  0x5e   : > { %11102 = dma.done.wait (%p96_p1), [#allocation19], 512  }
  0x5f   : > { %11104 = vsyncadd (%p96_p1), [#allocation19], 4294966784 }
  0x60   : > { %531 = sfence }
  0x61   : > { %v567_v0 = vld [vmem:[#allocation9 + $0x8] sm:$0xff]  ;;  %v566_v1 = vld [vmem:[#allocation9] sm:$0xff]  ;;  %vm584_vm0 = vcmask 130048   ;;  %v569_v7 = vld [vmem:[#allocation11 + $0x8] sm:$0xff]  ;;  %s11717_s22 = sld [smem:[#allocation2 + $0x100]] }
  0x62   : > { %v582_v2 = vld [vmem:[%s11388_s25] sm:$0xff]  ;;  %v11411_v3 = vand.u32 4294901760, %v567_v0  ;;  %v11413_v4 = vand.u32 4294901760, %v566_v1  ;;  %v583_v6 = vld [vmem:[%s11388_s25 + $0x8] sm:$0xff]  ;;  %v568_v8 = vld [vmem:[#allocation11] sm:$0xff]  ;;  %v11420_v11 = vand.u32 4294901760, %v569_v7 }
  0x63   : > { %v586_v5 = vsel %vm584_vm0, %v582_v2, 0  ;;  %v589_v10 = vsel %vm584_vm0, %v583_v6, 0  ;;  %v11422_v12 = vand.u32 4294901760, %v568_v8  ;;  %v570_v44 = vld [vmem:[#allocation12] sm:$0xff]  ;;  %v571_v54 = vld [vmem:[#allocation12 + $0x8] sm:$0xff]  ;;  %s11719_s26 = sld [smem:[#allocation2 + $0x180]] }
  0x64   : > { %13666 = vst [vmem:[#allocation30_spill] sm:$0xff] %v11411_v3  ;;  %v11417_v9 = vand.u32 4294901760, %v586_v5  ;;  %v11425_v13 = vsub.f32 %v567_v0, %v11411_v3  ;;  %707 = vmatpush.msra.mxu3 %v11411_v3  ;;  %606 = vmatpush.msra.mxu0 %v11411_v3  ;;  %v11430_v14 = vsub.f32 %v566_v1, %v11413_v4  ;;  %v11432_v15 = vand.u32 4294901760, %v589_v10  ;;  %s11721_s15 = sld [smem:[#allocation2 + $0x200]] }
  0x65   : > { %13667 = vst [vmem:[#allocation31_spill] sm:$0xff] %v11413_v4  ;;  %v11436_v17 = vsub.f32 %v569_v7, %v11420_v11  ;;  %v11439_v18 = vsub.f32 %v568_v8, %v11422_v12  ;;  %v972_v49 = vsel %vm584_vm0, %v570_v44, 0  ;;  %v975_v62 = vsel %vm584_vm0, %v571_v54, 0  ;;  %s11723_s29 = sld [smem:[#allocation2 + $0x280]] }
  0x66   : > { %13668 = vst [vmem:[#allocation32_spill] sm:$0xff] %v11420_v11  ;;  %v610_v16 = vsub.f32 %v586_v5, %v11417_v9  ;;  %677 = vmatpush.msra.mxu2 %v11425_v13  ;;  %709 = vmatpush.msra.mxu3 %v11413_v4  ;;  %v11444_v19 = vand.u32 4294901760, %v11425_v13  ;;  %v11447_v20 = vand.u32 4294901760, %v11430_v14  ;;  %v618_v21 = vsub.f32 %v589_v10, %v11432_v15  ;;  %s11725_s21 = sld [smem:[#allocation2 + $0x300]] }
  0x67   : > { %13669 = vst [vmem:[#allocation33_spill] sm:$0xff] %v11422_v12  ;;  %608 = vmatpush.msra.mxu0 %v11413_v4  ;;  %v11452_v23 = vand.u32 4294901760, %v11436_v17  ;;  %v11455_v24 = vand.u32 4294901760, %v11439_v18  ;;  %v11505_v50 = vand.u32 4294901760, %v972_v49  ;;  %v11514_v0 = vand.u32 4294901760, %v975_v62  ;;  %s11727_s16 = sld [smem:[#allocation2 + $0x380]] }
  0x68   : > { %13670 = vst [vmem:[#allocation34_spill] sm:$0xff] %v11425_v13  ;;  %v611_v22 = vand.u32 4294901760, %v610_v16  ;;  %680 = vmatpush.msra.mxu2 %v11430_v14  ;;  %v643_v25 = vsub.f32 %v11425_v13, %v11444_v19  ;;  %v649_v26 = vsub.f32 %v11430_v14, %v11447_v20  ;;  %v619_v28 = vand.u32 4294901760, %v618_v21  ;;  %s11729_s23 = sld [smem:[#allocation2 + $0x101]] }
  0x69   : > { %13671 = vst [vmem:[#allocation35_spill] sm:$0xff] %v11430_v14  ;;  %740 = vmatpush.msrb.mxu0 %v11444_v19  ;;  %683 = vmatmul.f32.vlgmr.msra.gmra.mxu2 %v610_v16  ;;  %v833_v29 = vsub.f32 %v11436_v17, %v11452_v23  ;;  %v839_v30 = vsub.f32 %v11439_v18, %v11455_v24  ;;  %s11731_s13 = sld [smem:[#allocation2 + $0x181]] }
  0x6a   : > { %13672 = vst [vmem:[#allocation36_spill] sm:$0xff] %v11436_v17  ;;  %713 = vmatmul.f32.vlgmr.msra.gmra.mxu3 %v611_v22  ;;  %v612_v27 = vsub.f32 %v610_v16, %v611_v22  ;;  %v11467_v31 = vand.u32 4294901760, %v643_v25  ;;  %v11469_v32 = vand.u32 4294901760, %v649_v26  ;;  %796 = vmatpush.msrb.mxu2 %v11420_v11  ;;  %v620_v36 = vsub.f32 %v618_v21, %v619_v28  ;;  %s11733_s27 = sld [smem:[#allocation2 + $0x201]] }
  0x6b   : > { %13673 = vst [vmem:[#allocation37_spill] sm:$0xff] %v11439_v18  ;;  %744 = vmatpush.msrb.mxu0 %v11447_v20  ;;  %v11473_v34 = vand.u32 4294901760, %v833_v29  ;;  %v11475_v35 = vand.u32 4294901760, %v839_v30  ;;  %v11508_v58 = vsub.f32 %v972_v49, %v11505_v50  ;;  %v11521_v10 = vsub.f32 %v975_v62, %v11514_v0  ;;  %v573_v49 = vld [vmem:[#allocation14 + $0x8] sm:$0xff]  ;;  %s11736_s12 = sld [smem:[#allocation2 + $0x281]] }
  0x6c   : > { %13674 = vst [vmem:[#allocation38_spill] sm:$0xff] %v11444_v19  ;;  %v613_v33 = vand.u32 4294901760, %v612_v27  ;;  %645 = vmatpush.msra.mxu1 %v11467_v31  ;;  %798 = vmatpush.msrb.mxu2 %v11422_v12  ;;  %v621_v37 = vand.u32 4294901760, %v620_v36  ;;  %s11738_s0 = sld [smem:[#allocation2 + $0x301]] }
  0x6d   : > { %13675 = vst [vmem:[#allocation39_spill] sm:$0xff] %v11447_v20  ;;  %835 = vmatpush.msrb.mxu3 %v11473_v34  ;;  %v11512_v63 = vand.u32 4294901760, %v11508_v58  ;;  %v11531_v27 = vand.u32 4294901760, %v11521_v10  ;;  %s11743_s28 = sld [smem:[#allocation2 + $0x381]] }
  0x6e   : > { %13676 = vst [vmem:[#allocation40_spill] sm:$0xff] %v11452_v23  ;;  %614 = vmatmul.f32.vlgmr.msra.gmra.mxu0 %v613_v33  ;;  %651 = vmatpush.msra.mxu1 %v11469_v32  ;;  %s11961_s6 = sld [smem:[#allocation2 + $0x102]] }
  0x6f   : > { %13677 = vst [vmem:[#allocation41_spill] sm:$0xff] %v11455_v24  ;;  %930 = vmatpush.msra.mxu2 %v11452_v23  ;;  %653 = vmatmul.f32.vlgmr.msra.gmra.mxu1 %v11417_v9 }
  0x70   : > { %13678 = vst [vmem:[#allocation42_spill] sm:$0xff] %v11467_v31  ;;  %841 = vmatpush.msrb.mxu3 %v11475_v35  ;;  %769 = vmatpush.msrb.mxu1 %v11411_v3 }
  0x71   : > { %13679 = vst [vmem:[#allocation43_spill] sm:$0xff] %v11469_v32  ;;  %867 = vmatpush.msra.mxu0 %v11436_v17  ;;  %688 = vmatmul.f32.gmra.mxu2 %v618_v21 }
  0x72   : > { %13680 = vst [vmem:[#allocation44_spill] sm:$0xff] %v11473_v34  ;;  %719 = vmatmul.f32.gmra.mxu3 %v619_v28  ;;  %771 = vmatpush.msrb.mxu1 %v11413_v4 }
  0x73   : > { %13681 = vst [vmem:[#allocation45_spill] sm:$0xff] %v11475_v35  ;;  %934 = vmatpush.msra.mxu2 %v11455_v24  ;;  %959 = vmatpush.msra.mxu3 %v11420_v11 }
  0x74   : > { %870 = vmatpush.msra.mxu0 %v11439_v18  ;;  %897 = vmatpush.msra.mxu1 %v11420_v11 }
  0x75   : > { %961 = vmatpush.msra.mxu3 %v11422_v12 }
  0x76   : > { %622 = vmatmul.f32.gmra.mxu0 %v621_v37  ;;  %899 = vmatpush.msra.mxu1 %v11422_v12 }
  0x77   : > { %657 = vmatmul.f32.gmra.mxu1 %v11432_v15 }
  0x79   : > { %804 = vmatmul.f32.vlgmr.msrb.gmra.mxu2 %v613_v33 }
  0x7a   : > { %843 = vmatmul.f32.vlgmr.msrb.gmra.mxu3 %v11417_v9 }
  0x7e   : > { %746 = vmatmul.f32.vlgmr.msrb.gmra.mxu0 %v11417_v9 }
  0x7f   : > { %773 = vmatmul.f32.vlgmr.msrb.gmra.mxu1 %v11417_v9 }
  0x81   : > { %812 = vmatmul.f32.gmra.mxu2 %v621_v37 }
  0x82   : > { %847 = vmatmul.f32.gmra.mxu3 %v11432_v15 }
  0x86   : > { %750 = vmatmul.f32.gmra.mxu0 %v11432_v15 }
  0x87   : > { %777 = vmatmul.f32.gmra.mxu1 %v11432_v15 }
  0x89   : > { %936 = vmatmul.f32.vlgmr.msra.gmra.mxu2 %v11417_v9 }
  0x8a   : > { %963 = vmatmul.f32.vlgmr.msra.gmra.mxu3 %v11417_v9  ;;  %v998_v9 = vsub.f32 %v11508_v58, %v11512_v63 }
  0x8c   : > { %v11528_v26 = vand.u32 4294901760, %v998_v9 }
  0x8e   : > { %873 = vmatmul.f32.vlgmr.msra.gmra.mxu0 %v610_v16 }
  0x8f   : > { %903 = vmatmul.f32.vlgmr.msra.gmra.mxu1 %v611_v22  ;;  %v572_v22 = vld [vmem:[#allocation14] sm:$0xff] }
  0x90   : > { %v1168_v33 = vsel %vm584_vm0, %v572_v22, 0 }
  0x91   : > { %940 = vmatmul.f32.gmra.mxu2 %v11432_v15 }
  0x92   : > { %967 = vmatmul.f32.gmra.mxu3 %v11432_v15 }
  0x96   : > { %878 = vmatmul.f32.gmra.mxu0 %v618_v21 }
  0x97   : > { %909 = vmatmul.f32.gmra.mxu1 %v619_v28 }
  0xeb   : > { %v615_v38 = vpop.f32.mrf.mxu0 }
  0xec   : > { %v654_v39 = vpop.f32.mrf.mxu1  ;;  %v684_v40 = vpop.f32.mrf.mxu2 }
  0xed   : > { %v714_v41 = vpop.f32.mrf.mxu3  ;;  %v655_v42 = vadd.f32 %v654_v39, %v615_v38 }
  0xef   : > { %v685_v47 = vadd.f32 %v684_v40, %v655_v42  ;;  %v11551_v42 = vand.u32 4294901760, %v1168_v33 }
  0xf1   : > { %v715_v51 = vadd.f32 %v714_v41, %v685_v47  ;;  %v1006_v41 = vsub.f32 %v11521_v10, %v11531_v27 }
  0xf3   : > { %v623_v43 = vpop.f32.mrf.mxu0 }
  0xf4   : > { %v658_v45 = vpop.f32.mrf.mxu1  ;;  %v689_v46 = vpop.f32.mrf.mxu2 }
  0xf5   : > { %v720_v48 = vpop.f32.mrf.mxu3  ;;  %v659_v52 = vadd.f32 %v658_v45, %v623_v43 }
  0xf7   : > { %v690_v59 = vadd.f32 %v689_v46, %v659_v52  ;;  %v11565_v52 = vsub.f32 %v1168_v33, %v11551_v42 }
  0xf9   : > { %v721_v1 = vadd.f32 %v720_v48, %v690_v59  ;;  %v11571_v62 = vand.u32 4294901760, %v11565_v52 }
  0xfb   : > { %v747_v53 = vpop.f32.mrf.mxu0  ;;  %v1194_v9 = vsub.f32 %v11565_v52, %v11571_v62 }
  0xfc   : > { %v748_v55 = vadd.f32 %v747_v53, %v715_v51  ;;  %v774_v56 = vpop.f32.mrf.mxu1  ;;  %v805_v57 = vpop.f32.mrf.mxu2  ;;  %v11562_v51 = vand.u32 4294901760, %v1006_v41 }
  0xfd   : > { %v844_v61 = vpop.f32.mrf.mxu3  ;;  %v11591_v33 = vand.u32 4294901760, %v1194_v9 }
  0xfe   : > { %v775_v60 = vadd.f32 %v774_v56, %v748_v55  ;;  %v845_v28 = vadd.f32 %v844_v61, %v805_v57  ;;  %v1171_v57 = vsel %vm584_vm0, %v573_v49, 0 }
 0x100   : > { %v11516_v2 = vand.u32 4294901760, %v775_v60 }
 0x102   : > { %v11524_v15 = vsub.f32 %v775_v60, %v11516_v2 }
 0x103   : > { %v751_v5 = vpop.f32.mrf.mxu0 }
 0x104   : > { %v752_v6 = vadd.f32 %v751_v5, %v721_v1  ;;  %v778_v7 = vpop.f32.mrf.mxu1  ;;  %v813_v8 = vpop.f32.mrf.mxu2  ;;  %v11539_v30 = vand.u32 4294901760, %v11524_v15  ;;  %v11574_v5 = vand.u32 4294901760, %v1171_v57 }
 0x105   : > { %v848_v21 = vpop.f32.mrf.mxu3 }
 0x106   : > { %v779_v16 = vadd.f32 %v778_v7, %v752_v6  ;;  %v1035_v46 = vsub.f32 %v11524_v15, %v11539_v30  ;;  %v849_v53 = vadd.f32 %v848_v21, %v813_v8  ;;  %v11584_v21 = vsub.f32 %v1171_v57, %v11574_v5 }
 0x108   : > { %v11526_v25 = vand.u32 4294901760, %v779_v16  ;;  %v1036_v54 = vand.u32 4294901760, %v1035_v46 }
 0x10a   : > { %v11534_v29 = vsub.f32 %v779_v16, %v11526_v25  ;;  %992 = vmatpush.msrb.mxu0 %v11526_v25  ;;  %1093 = vmatpush.msrb.mxu3 %v11526_v25 }
 0x10b   : > { %v874_v36 = vpop.f32.mrf.mxu0 }
 0x10c   : > { %v875_v37 = vadd.f32 %v874_v36, %v845_v28  ;;  %994 = vmatpush.msrb.mxu0 %v11516_v2  ;;  %1063 = vmatpush.msrb.mxu2 %v11534_v29  ;;  %v11545_v38 = vand.u32 4294901760, %v11534_v29  ;;  %v904_v39 = vpop.f32.mrf.mxu1  ;;  %v937_v40 = vpop.f32.mrf.mxu2 }
 0x10d   : > { %1095 = vmatpush.msrb.mxu3 %v11516_v2  ;;  %1000 = vmatmul.f32.vlgmr.msrb.gmra.mxu0 %v11528_v26  ;;  %v964_v44 = vpop.f32.mrf.mxu3 }
 0x10e   : > { %v905_v43 = vadd.f32 %v904_v39, %v875_v37  ;;  %1066 = vmatpush.msrb.mxu2 %v11524_v15  ;;  %1126 = vmatpush.msra.mxu0 %v11545_v38  ;;  %v1029_v45 = vsub.f32 %v11534_v29, %v11545_v38  ;;  %v11597_v37 = vand.u32 4294901760, %v11584_v21 }
 0x10f   : > { %1069 = vmatmul.f32.vlgmr.msrb.gmra.mxu2 %v11508_v58  ;;  %1099 = vmatmul.f32.vlgmr.msrb.gmra.mxu3 %v11512_v63 }
 0x110   : > { %v938_v47 = vadd.f32 %v937_v40, %v905_v43  ;;  %1130 = vmatpush.msra.mxu0 %v11539_v30  ;;  %v1030_v48 = vand.u32 4294901760, %v1029_v45  ;;  %v1202_v43 = vsub.f32 %v11584_v21, %v11597_v37 }
 0x112   : > { %1031 = vmatpush.msrb.mxu1 %v1030_v48  ;;  %v965_v55 = vadd.f32 %v964_v44, %v938_v47  ;;  %v11608_v46 = vand.u32 4294901760, %v1202_v43 }
 0x113   : > { %v879_v56 = vpop.f32.mrf.mxu0 }
 0x114   : > { %v880_v59 = vadd.f32 %v879_v56, %v849_v53  ;;  %1037 = vmatpush.msrb.mxu1 %v1036_v54  ;;  %v910_v60 = vpop.f32.mrf.mxu1  ;;  %v941_v61 = vpop.f32.mrf.mxu2  ;;  %v11576_v6 = vand.u32 4294901760, %v965_v55 }
 0x115   : > { %1008 = vmatmul.f32.gmra.mxu0 %v11562_v51  ;;  %1039 = vmatmul.f32.vlgmr.msrb.gmra.mxu1 %v11505_v50  ;;  %v968_v7 = vpop.f32.mrf.mxu3 }
 0x116   : > { %v911_v1 = vadd.f32 %v910_v60, %v880_v59  ;;  %1155 = vmatpush.msra.mxu1 %v11526_v25  ;;  %v1229_v22 = vsub.f32 %v965_v55, %v11576_v6 }
 0x117   : > { %1074 = vmatmul.f32.gmra.mxu2 %v11521_v10  ;;  %1105 = vmatmul.f32.gmra.mxu3 %v11531_v27 }
 0x118   : > { %v942_v8 = vadd.f32 %v941_v61, %v911_v1  ;;  %1157 = vmatpush.msra.mxu1 %v11516_v2  ;;  %v1230_v39 = vand.u32 4294901760, %v1229_v22 }
 0x11a   : > { %v969_v16 = vadd.f32 %v968_v7, %v942_v8  ;;  %v1231_v44 = vsub.f32 %v1229_v22, %v1230_v39 }
 0x11c   : > { %v11587_v28 = vand.u32 4294901760, %v969_v16  ;;  %v1232_v47 = vand.u32 4294901760, %v1231_v44 }
 0x11d   : > { %1043 = vmatmul.f32.gmra.mxu1 %v11514_v0  ;;  %1132 = vmatmul.f32.vlgmr.msra.gmra.mxu0 %v11505_v50 }
 0x11e   : > { %v1223_v36 = vsub.f32 %v969_v16, %v11587_v28  ;;  %1188 = vmatpush.msra.mxu2 %v11587_v28  ;;  %1289 = vmatpush.msrb.mxu1 %v11587_v28 }
 0x120   : > { %1190 = vmatpush.msra.mxu2 %v11576_v6  ;;  %1259 = vmatpush.msrb.mxu0 %v1223_v36  ;;  %v1224_v40 = vand.u32 4294901760, %v1223_v36 }
 0x121   : > { %1291 = vmatpush.msrb.mxu1 %v11576_v6  ;;  %1196 = vmatmul.f32.vlgmr.msra.gmra.mxu2 %v11591_v33 }
 0x122   : > { %1262 = vmatpush.msrb.mxu0 %v1229_v22  ;;  %1322 = vmatpush.msrb.mxu2 %v1224_v40  ;;  %v1225_v41 = vsub.f32 %v1223_v36, %v1224_v40 }
 0x124   : > { %1380 = vmatpush.msra.mxu0 %v11526_v25  ;;  %1326 = vmatpush.msrb.mxu2 %v1230_v39  ;;  %v1226_v45 = vand.u32 4294901760, %v1225_v41 }
 0x125   : > { %1136 = vmatmul.f32.gmra.mxu0 %v11514_v0  ;;  %1159 = vmatmul.f32.vlgmr.msra.gmra.mxu1 %v11505_v50 }
 0x126   : > { %1382 = vmatpush.msra.mxu0 %v11516_v2  ;;  %1419 = vmatpush.msra.mxu1 %v1030_v48 }
 0x127   : > { %1451 = vmatpush.msra.mxu2 %v11534_v29  ;;  %1227 = vmatpush.msra.mxu3 %v1226_v45  ;;  %v10494_v29 = vld [vmem:[%s11388_s25 + $0x18] sm:$0xff] }
 0x128   : > { %1425 = vmatpush.msra.mxu1 %v1036_v54 }
 0x129   : > { %1454 = vmatpush.msra.mxu2 %v11524_v15  ;;  %1233 = vmatpush.msra.mxu3 %v1232_v47 }
 0x12a   : > { %1204 = vmatmul.f32.gmra.mxu2 %v11608_v46  ;;  %1235 = vmatmul.f32.vlgmr.msra.gmra.mxu3 %v11551_v42 }
 0x12b   : > { %1351 = vmatpush.msrb.mxu3 %v11587_v28 }
 0x12d   : > { %1353 = vmatpush.msrb.mxu3 %v11576_v6  ;;  %1163 = vmatmul.f32.gmra.mxu1 %v11514_v0 }
 0x12e   : > { %1265 = vmatmul.f32.vlgmr.msrb.gmra.mxu0 %v11565_v52 }
 0x12f   : > { %1481 = vmatpush.msra.mxu3 %v11526_v25  ;;  %1514 = vmatpush.msrb.mxu0 %v11545_v38  ;;  %v1752_v38 = vsel %vm584_vm0, %v10494_v29, 0 }
 0x130   : > { %v1780_v49 = vand.u32 4294901760, %v1752_v38 }
 0x131   : > { %1483 = vmatpush.msra.mxu3 %v11516_v2  ;;  %1518 = vmatpush.msrb.mxu0 %v11539_v30 }
 0x132   : > { %1239 = vmatmul.f32.gmra.mxu3 %v11574_v5  ;;  %1328 = vmatmul.f32.vlgmr.msrb.gmra.mxu2 %v11551_v42  ;;  %v1781_v54 = vsub.f32 %v1752_v38, %v1780_v49 }
 0x133   : > { %1570 = vmatpush.msrb.mxu2 %v11587_v28 }
 0x134   : > { %v1782_v56 = vand.u32 4294901760, %v1781_v54 }
 0x135   : > { %1572 = vmatpush.msrb.mxu2 %v11576_v6  ;;  %1295 = vmatmul.f32.vlgmr.msrb.gmra.mxu1 %v11571_v62 }
 0x136   : > { %1270 = vmatmul.f32.gmra.mxu0 %v11584_v21  ;;  %1543 = vmatpush.msrb.mxu1 %v11526_v25  ;;  %v1783_v57 = vsub.f32 %v1781_v54, %v1782_v56 }
 0x138   : > { %1545 = vmatpush.msrb.mxu1 %v11516_v2  ;;  %v10493_v2 = vld [vmem:[%s11388_s25 + $0x10] sm:$0xff]  ;;  %v1784_v59 = vand.u32 4294901760, %v1783_v57 }
 0x139   : > { %v1749_v15 = vsel %vm584_vm0, %v10493_v2, 0 }
 0x13a   : > { %1332 = vmatmul.f32.gmra.mxu2 %v11574_v5  ;;  %1355 = vmatmul.f32.vlgmr.msrb.gmra.mxu3 %v11551_v42  ;;  %v11660_v25 = vand.u32 4294901760, %v1749_v15 }
 0x13b   : > { %1609 = vmatpush.msrb.mxu3 %v1226_v45 }
 0x13c   : > { %v1773_v30 = vsub.f32 %v1749_v15, %v11660_v25 }
 0x13d   : > { %1615 = vmatpush.msrb.mxu3 %v1232_v47  ;;  %1301 = vmatmul.f32.gmra.mxu1 %v11597_v37 }
 0x13e   : > { %1388 = vmatmul.f32.vlgmr.msra.gmra.mxu0 %v11591_v33  ;;  %v1774_v48 = vand.u32 4294901760, %v1773_v30 }
 0x13f   : > { %1641 = vmatpush.msra.mxu0 %v1223_v36 }
 0x140   : > { %v1775_v53 = vsub.f32 %v1773_v30, %v1774_v48 }
 0x141   : > { %1644 = vmatpush.msra.mxu0 %v1229_v22 }
 0x142   : > { %1359 = vmatmul.f32.gmra.mxu3 %v11574_v5  ;;  %1457 = vmatmul.f32.vlgmr.msra.gmra.mxu2 %v11565_v52  ;;  %v1776_v55 = vand.u32 4294901760, %v1775_v53 }
 0x143   : > { %1704 = vmatpush.msra.mxu2 %v1224_v40 }
 0x145   : > { %1708 = vmatpush.msra.mxu2 %v1230_v39  ;;  %1427 = vmatmul.f32.vlgmr.msra.gmra.mxu1 %v11551_v42 }
 0x146   : > { %1671 = vmatpush.msra.mxu1 %v11587_v28  ;;  %1396 = vmatmul.f32.gmra.mxu0 %v11608_v46 }
 0x148   : > { %1673 = vmatpush.msra.mxu1 %v11576_v6 }
 0x14a   : > { %1462 = vmatmul.f32.gmra.mxu2 %v11584_v21  ;;  %1487 = vmatmul.f32.vlgmr.msra.gmra.mxu3 %v11571_v62 }
 0x14b   : > { %1733 = vmatpush.msra.mxu3 %v11587_v28 }
 0x14d   : > { %1735 = vmatpush.msra.mxu3 %v11576_v6  ;;  %1431 = vmatmul.f32.gmra.mxu1 %v11574_v5 }
 0x14e   : > { %1520 = vmatmul.f32.vlgmr.msrb.gmra.mxu0 %v11551_v42 }
 0x14f   : > { %1769 = vmatpush.msrb.mxu0 %v11411_v3 }
 0x151   : > { %1771 = vmatpush.msrb.mxu0 %v11413_v4 }
 0x152   : > { %1493 = vmatmul.f32.gmra.mxu3 %v11597_v37  ;;  %1578 = vmatmul.f32.vlgmr.msrb.gmra.mxu2 %v11528_v26 }
 0x153   : > { %1840 = vmatpush.msrb.mxu2 %v11425_v13 }
 0x155   : > { %1547 = vmatmul.f32.vlgmr.msrb.gmra.mxu1 %v11551_v42  ;;  %1843 = vmatpush.msrb.mxu2 %v11430_v14 }
 0x156   : > { %1524 = vmatmul.f32.gmra.mxu0 %v11574_v5  ;;  %1808 = vmatpush.msrb.mxu1 %v11467_v31 }
 0x158   : > { %1814 = vmatpush.msrb.mxu1 %v11469_v32 }
 0x15a   : > { %1586 = vmatmul.f32.gmra.mxu2 %v11562_v51  ;;  %1617 = vmatmul.f32.vlgmr.msrb.gmra.mxu3 %v11505_v50 }
 0x15b   : > { %1870 = vmatpush.msrb.mxu3 %v11411_v3 }
 0x15d   : > { %1551 = vmatmul.f32.gmra.mxu1 %v11574_v5  ;;  %1872 = vmatpush.msrb.mxu3 %v11413_v4 }
 0x15e   : > { %1647 = vmatmul.f32.vlgmr.msra.gmra.mxu0 %v11508_v58 }
 0x15f   : > { %1903 = vmatpush.msra.mxu0 %v11444_v19 }
 0x161   : > { %1907 = vmatpush.msra.mxu0 %v11447_v20 }
 0x162   : > { %1621 = vmatmul.f32.gmra.mxu3 %v11514_v0  ;;  %1710 = vmatmul.f32.vlgmr.msra.gmra.mxu2 %v11505_v50 }
 0x163   : > { %1959 = vmatpush.msra.mxu2 %v11420_v11 }
 0x165   : > { %1677 = vmatmul.f32.vlgmr.msra.gmra.mxu1 %v11512_v63  ;;  %1961 = vmatpush.msra.mxu2 %v11422_v12 }
 0x166   : > { %1652 = vmatmul.f32.gmra.mxu0 %v11521_v10  ;;  %1932 = vmatpush.msra.mxu1 %v11411_v3 }
 0x168   : > { %1934 = vmatpush.msra.mxu1 %v11413_v4 }
 0x16a   : > { %1714 = vmatmul.f32.gmra.mxu2 %v11514_v0  ;;  %1737 = vmatmul.f32.vlgmr.msra.gmra.mxu3 %v11505_v50 }
 0x16b   : > { %1998 = vmatpush.msra.mxu3 %v11473_v34 }
 0x16d   : > { %1683 = vmatmul.f32.gmra.mxu1 %v11531_v27  ;;  %2004 = vmatpush.msra.mxu3 %v11475_v35 }
 0x16e   : > { %1777 = vmatmul.f32.vlgmr.msrb.gmra.mxu0 %v1776_v55 }
 0x16f   : > { %2030 = vmatpush.msrb.mxu0 %v11436_v17 }
 0x171   : > { %2033 = vmatpush.msrb.mxu0 %v11439_v18 }
 0x172   : > { %1741 = vmatmul.f32.gmra.mxu3 %v11514_v0  ;;  %1846 = vmatmul.f32.vlgmr.msrb.gmra.mxu2 %v1773_v30 }
 0x173   : > { %2093 = vmatpush.msrb.mxu2 %v11452_v23 }
 0x175   : > { %1816 = vmatmul.f32.vlgmr.msrb.gmra.mxu1 %v11660_v25  ;;  %2097 = vmatpush.msrb.mxu2 %v11455_v24 }
 0x176   : > { %1785 = vmatmul.f32.gmra.mxu0 %v1784_v59  ;;  %2060 = vmatpush.msrb.mxu1 %v11420_v11 }
 0x178   : > { %2062 = vmatpush.msrb.mxu1 %v11422_v12 }
 0x17a   : > { %1851 = vmatmul.f32.gmra.mxu2 %v1781_v54  ;;  %1876 = vmatmul.f32.vlgmr.msrb.gmra.mxu3 %v1774_v48 }
 0x17b   : > { %2122 = vmatpush.msrb.mxu3 %v11420_v11 }
 0x17d   : > { %1820 = vmatmul.f32.gmra.mxu1 %v1780_v49  ;;  %2124 = vmatpush.msrb.mxu3 %v11422_v12 }
 0x17e   : > { %1909 = vmatmul.f32.vlgmr.msra.gmra.mxu0 %v11660_v25 }
 0x182   : > { %1882 = vmatmul.f32.gmra.mxu3 %v1782_v56  ;;  %1967 = vmatmul.f32.vlgmr.msra.gmra.mxu2 %v1776_v55 }
 0x185   : > { %1936 = vmatmul.f32.vlgmr.msra.gmra.mxu1 %v11660_v25 }
 0x186   : > { %1913 = vmatmul.f32.gmra.mxu0 %v1780_v49 }
 0x18a   : > { %1975 = vmatmul.f32.gmra.mxu2 %v1784_v59  ;;  %2006 = vmatmul.f32.vlgmr.msra.gmra.mxu3 %v11660_v25  ;;  %v1001_v60 = vpop.f32.mrf.mxu0 }
 0x18d   : > { %1940 = vmatmul.f32.gmra.mxu1 %v1780_v49 }
 0x18e   : > { %2036 = vmatmul.f32.vlgmr.msrb.gmra.mxu0 %v1773_v30 }
 0x192   : > { %2010 = vmatmul.f32.gmra.mxu3 %v1780_v49  ;;  %2099 = vmatmul.f32.vlgmr.msrb.gmra.mxu2 %v11660_v25  ;;  %v1040_v61 = vpop.f32.mrf.mxu1  ;;  %v1009_v1 = vpop.f32.mrf.mxu0 }
 0x193   : > { %v1070_v6 = vpop.f32.mrf.mxu2  ;;  %v1100_v9 = vpop.f32.mrf.mxu3  ;;  %v1041_v11 = vadd.f32 %v1040_v61, %v1001_v60 }
 0x195   : > { %2066 = vmatmul.f32.vlgmr.msrb.gmra.mxu1 %v1774_v48  ;;  %v1071_v31 = vadd.f32 %v1070_v6, %v1041_v11 }
 0x196   : > { %2041 = vmatmul.f32.gmra.mxu0 %v1781_v54 }
 0x19a   : > { %2103 = vmatmul.f32.gmra.mxu2 %v1780_v49  ;;  %2126 = vmatmul.f32.vlgmr.msrb.gmra.mxu3 %v11660_v25  ;;  %v1044_v7 = vpop.f32.mrf.mxu1  ;;  %v11699_v8 = vpop.f32.mrf.mxu0 }
 0x19b   : > { %v1075_v16 = vpop.f32.mrf.mxu2  ;;  %v11705_v39 = vpop.f32.mrf.mxu3 }
 0x19d   : > { %2072 = vmatmul.f32.gmra.mxu1 %v1782_v56 }
 0x1a2   : > { %2130 = vmatmul.f32.gmra.mxu3 %v1780_v49  ;;  %v11701_v22 = vpop.f32.mrf.mxu1  ;;  %v11703_v28 = vpop.f32.mrf.mxu0 }
 0x1a4   : > { %v1197_v36 = vpop.f32.mrf.mxu2 }
 0x1aa   : > { %v11707_v40 = vpop.f32.mrf.mxu1 }
 0x1ab   : > { %v1266_v41 = vpop.f32.mrf.mxu0 }
 0x1ad   : > { %v1205_v43 = vpop.f32.mrf.mxu2  ;;  %v1236_v44 = vpop.f32.mrf.mxu3 }
 0x1ae   : > { %v1237_v20 = vadd.f32 %v1236_v44, %v1197_v36 }
 0x1b0   : > { %v1267_v4 = vadd.f32 %v1266_v41, %v1237_v20 }
 0x1b2   : > { %v1296_v45 = vpop.f32.mrf.mxu1 }
 0x1b3   : > { %v11709_v47 = vpop.f32.mrf.mxu0 }
 0x1b5   : > { %v1240_v2 = vpop.f32.mrf.mxu3  ;;  %v1329_v15 = vpop.f32.mrf.mxu2 }
 0x1ba   : > { %v11711_v25 = vpop.f32.mrf.mxu1 }
 0x1bb   : > { %v1389_v29 = vpop.f32.mrf.mxu0 }
 0x1bd   : > { %v11713_v30 = vpop.f32.mrf.mxu2  ;;  %v1356_v38 = vpop.f32.mrf.mxu3 }
 0x1c2   : > { %v1428_v48 = vpop.f32.mrf.mxu1 }
 0x1c3   : > { %v1397_v49 = vpop.f32.mrf.mxu0  ;;  %v1429_v24 = vadd.f32 %v1428_v48, %v1389_v29  ;;  %v1045_v48 = vadd.f32 %v1044_v7, %v1009_v1 }
 0x1c5   : > { %v11715_v53 = vpop.f32.mrf.mxu3  ;;  %v1458_v54 = vpop.f32.mrf.mxu2  ;;  %v1076_v20 = vadd.f32 %v1075_v16, %v1045_v48  ;;  %v5419_v48 = vstv %s11733_s27  ;;  %s12040_s27 = sld [smem:[#allocation2 + $0x283]] }
 0x1c6   : > { %v1459_v34 = vadd.f32 %v1458_v54, %v1429_v24 }
 0x1ca   : > { %v1432_v55 = vpop.f32.mrf.mxu1 }
 0x1cb   : > { %v1521_v56 = vpop.f32.mrf.mxu0  ;;  %v1433_v19 = vadd.f32 %v1432_v55, %v1397_v49 }
 0x1cd   : > { %v1463_v57 = vpop.f32.mrf.mxu2  ;;  %v1488_v59 = vpop.f32.mrf.mxu3 }
 0x1ce   : > { %v1489_v12 = vadd.f32 %v1488_v59, %v1459_v34  ;;  %v1464_v3 = vadd.f32 %v1463_v57, %v1433_v19  ;;  %v1297_v34 = vadd.f32 %v1296_v45, %v1267_v4  ;;  %v1241_v19 = vadd.f32 %v1240_v2, %v1205_v43 }
 0x1cf   : > { %v5307_v43 = vstv %s11717_s22  ;;  %v5523_v2 = vstv %s11725_s21  ;;  %v5311_v59 = vstv %s11729_s23  ;;  %s11963_s22 = sld [smem:[#allocation2 + $0x182]] }
 0x1d0   : > { %v1522_v14 = vadd.f32 %v1521_v56, %v1489_v12  ;;  %v1101_v12 = vadd.f32 %v1100_v9, %v1071_v31  ;;  %s11973_s21 = sld [smem:[#allocation2 + $0x382]] }
 0x1d1   : > { %s12036_s23 = sld [smem:[#allocation2 + $0x183]] }
 0x1d2   : > { %v1548_v23 = vpop.f32.mrf.mxu1 }
 0x1d3   : > { %v1525_v35 = vpop.f32.mrf.mxu0  ;;  %v1549_v29 = vadd.f32 %v1548_v23, %v1522_v14  ;;  %v1330_v14 = vadd.f32 %v1329_v15, %v1297_v34  ;;  %v5577_v15 = vstv %s11727_s16  ;;  %s12034_s16 = sld [smem:[#allocation2 + $0x103]] }
 0x1d5   : > { %v1494_v18 = vpop.f32.mrf.mxu3  ;;  %v1579_v17 = vpop.f32.mrf.mxu2 }
 0x1d6   : > { %v1495_v60 = vadd.f32 %v1494_v18, %v1464_v3  ;;  %v1580_v11 = vadd.f32 %v1579_v17, %v1549_v29  ;;  %v1134_v3 = vadd.f32 %v11699_v8, %v1101_v12  ;;  %v1357_v18 = vadd.f32 %v1356_v38, %v1330_v14 }
 0x1d7   : > { %v1272_v8 = vadd.f32 %v11709_v47, %v1241_v19  ;;  %v5415_v47 = vstv %s11721_s15  ;;  %v5365_v29 = vstv %s11731_s13  ;;  %v5581_v12 = vstv %s11743_s28  ;;  %s11969_s15 = sld [smem:[#allocation2 + $0x282]] }
 0x1d8   : > { %v1526_v23 = vadd.f32 %v1525_v35, %v1495_v60  ;;  %v1107_v35 = vadd.f32 %v11705_v39, %v1076_v20  ;;  %v1161_v7 = vadd.f32 %v11701_v22, %v1134_v3  ;;  %v5361_v39 = vstv %s11719_s26  ;;  %s11967_s26 = sld [smem:[#allocation2 + $0x202]] }
 0x1d9   : > { %v5527_v60 = vstv %s11738_s0  ;;  %s12038_s13 = sld [smem:[#allocation2 + $0x203]] }
 0x1da   : > { %v1552_v32 = vpop.f32.mrf.mxu1  ;;  %v11746_v16 = vsub.f32 %v1161_v7, %v1357_v18  ;;  %v1138_v44 = vadd.f32 %v11703_v28, %v1107_v35  ;;  %s12044_s0 = sld [smem:[#allocation2 + $0x383]] }
 0x1db   : > { %v1648_v13 = vpop.f32.mrf.mxu0  ;;  %v1553_v31 = vadd.f32 %v1552_v32, %v1526_v23  ;;  %v1303_v32 = vadd.f32 %v11711_v25, %v1272_v8  ;;  %s12260_s28 = sld [smem:[#allocation2 + $0x184]] }
 0x1dc   : > { %13682 = vst [vmem:[#allocation46_spill] sm:$0xff] %v11746_v16  ;;  %v1165_v38 = vadd.f32 %v11707_v40, %v1138_v44  ;;  %v5308_v28 = vmul.f32 %v5307_v43, %v11746_v16  ;;  %v5362_v40 = vmul.f32 %v5361_v39, %v11746_v16 }
 0x1dd   : > { %v1587_v24 = vpop.f32.mrf.mxu2  ;;  %v1618_v54 = vpop.f32.mrf.mxu3  ;;  %v1334_v49 = vadd.f32 %v11713_v30, %v1303_v32  ;;  %v5416_v30 = vmul.f32 %v5415_v47, %v11746_v16 }
 0x1de   : > { %v1619_v61 = vadd.f32 %v1618_v54, %v1580_v11  ;;  %v1588_v36 = vadd.f32 %v1587_v24, %v1553_v31  ;;  %v5473_v24 = vstv %s11736_s12  ;;  %s12042_s12 = sld [smem:[#allocation2 + $0x303]] }
 0x1df   : > { %v1361_v11 = vadd.f32 %v11715_v53, %v1334_v49 }
 0x1e0   : > { %v1649_v9 = vadd.f32 %v1648_v13, %v1619_v61  ;;  %v5469_v13 = vstv %s11723_s29  ;;  %v5524_v61 = vmul.f32 %v5523_v2, %v11746_v16  ;;  %s11971_s29 = sld [smem:[#allocation2 + $0x302]] }
 0x1e1   : > { %v5470_v20 = vmul.f32 %v5469_v13, %v11746_v16  ;;  %v11782_v35 = vsub.f32 %v1165_v38, %v1361_v11 }
 0x1e2   : > { %v1678_v1 = vpop.f32.mrf.mxu1 }
 0x1e3   : > { %v1653_v4 = vpop.f32.mrf.mxu0  ;;  %v1679_v41 = vadd.f32 %v1678_v1, %v1649_v9  ;;  %13684 = vst [vmem:[#allocation48_spill] sm:$0xff] %v11782_v35  ;;  %v5309_v49 = vmul.f32 %v5307_v43, %v11782_v35  ;;  %v5417_v38 = vmul.f32 %v5415_v47, %v11782_v35 }
 0x1e5   : > { %v1622_v17 = vpop.f32.mrf.mxu3  ;;  %v1711_v6 = vpop.f32.mrf.mxu2 }
 0x1e6   : > { %v1623_v22 = vadd.f32 %v1622_v17, %v1588_v36  ;;  %v1712_v55 = vadd.f32 %v1711_v6, %v1679_v41  ;;  %v5578_v6 = vmul.f32 %v5577_v15, %v11746_v16 }
 0x1e8   : > { %v1654_v54 = vadd.f32 %v1653_v4, %v1623_v22 }
 0x1ea   : > { %v1684_v45 = vpop.f32.mrf.mxu1 }
 0x1eb   : > { %v1778_v25 = vpop.f32.mrf.mxu0  ;;  %v1685_v19 = vadd.f32 %v1684_v45, %v1654_v54 }
 0x1ed   : > { %v1715_v56 = vpop.f32.mrf.mxu2  ;;  %v1738_v57 = vpop.f32.mrf.mxu3 }
 0x1ee   : > { %v11762_v34 = vadd.f32 %v1738_v57, %v1712_v55  ;;  %v1716_v36 = vadd.f32 %v1715_v56, %v1685_v19  ;;  %v5363_v55 = vmul.f32 %v5361_v39, %v11782_v35  ;;  %v5525_v57 = vmul.f32 %v5523_v2, %v11782_v35 }
 0x1ef   : > { %v5579_v39 = vmul.f32 %v5577_v15, %v11782_v35 }
 0x1f0   : > { %13683 = vst [vmem:[#allocation47_spill] sm:$0xff] %v11762_v34  ;;  %v5312_v14 = vmul.f32 %v5311_v59, %v11762_v34  ;;  %v5366_v23 = vmul.f32 %v5365_v29, %v11762_v34  ;;  %v5420_v1 = vmul.f32 %v5419_v48, %v11762_v34  ;;  %v5474_v4 = vmul.f32 %v5473_v24, %v11762_v34 }
 0x1f1   : > { %v5528_v3 = vmul.f32 %v5527_v60, %v11762_v34  ;;  %v5582_v53 = vmul.f32 %v5581_v12, %v11762_v34 }
 0x1f2   : > { %v1817_v18 = vpop.f32.mrf.mxu1  ;;  %v11777_v31 = vadd.f32 %v5312_v14, %v5308_v28  ;;  %v11779_v17 = vadd.f32 %v5366_v23, %v5362_v40  ;;  %v11784_v8 = vadd.f32 %v5420_v1, %v5416_v30  ;;  %v11786_v9 = vadd.f32 %v5474_v4, %v5470_v20 }
 0x1f3   : > { %v1786_v7 = vpop.f32.mrf.mxu0  ;;  %v11788_v32 = vadd.f32 %v5528_v3, %v5524_v61  ;;  %v11790_v41 = vadd.f32 %v5582_v53, %v5578_v6  ;;  %v5471_v28 = vmul.f32 %v5469_v13, %v11782_v35  ;;  %v1818_v54 = vadd.f32 %v1817_v18, %v1778_v25 }
 0x1f5   : > { %v1742_v44 = vpop.f32.mrf.mxu3  ;;  %v1847_v22 = vpop.f32.mrf.mxu2 }
 0x1f6   : > { %v11792_v45 = vadd.f32 %v1742_v44, %v1716_v36 }
 0x1f8   : > { %13685 = vst [vmem:[#allocation49_spill] sm:$0xff] %v11792_v45  ;;  %v5313_v11 = vmul.f32 %v5311_v59, %v11792_v45  ;;  %v5367_v56 = vmul.f32 %v5365_v29, %v11792_v45  ;;  %v5421_v40 = vmul.f32 %v5419_v48, %v11792_v45  ;;  %v5475_v30 = vmul.f32 %v5473_v24, %v11792_v45 }
 0x1f9   : > { %v5529_v20 = vmul.f32 %v5527_v60, %v11792_v45  ;;  %v5583_v43 = vmul.f32 %v5581_v12, %v11792_v45  ;;  %v1848_v29 = vadd.f32 %v1847_v22, %v1818_v54 }
 0x1fa   : > { %v1821_v47 = vpop.f32.mrf.mxu1  ;;  %v11806_v19 = vadd.f32 %v5313_v11, %v5309_v49  ;;  %v11808_v13 = vadd.f32 %v5367_v56, %v5363_v55  ;;  %v11810_v2 = vadd.f32 %v5421_v40, %v5417_v38  ;;  %v11812_v25 = vadd.f32 %v5475_v30, %v5471_v28 }
 0x1fb   : > { %v11814_v59 = vadd.f32 %v5529_v20, %v5525_v57  ;;  %v1910_v48 = vpop.f32.mrf.mxu0  ;;  %v11816_v24 = vadd.f32 %v5583_v43, %v5579_v39  ;;  %v1822_v23 = vadd.f32 %v1821_v47, %v1786_v7 }
 0x1fd   : > { %v1852_v60 = vpop.f32.mrf.mxu2  ;;  %v1877_v14 = vpop.f32.mrf.mxu3 }
 0x1fe   : > { %v1878_v12 = vadd.f32 %v1877_v14, %v1848_v29  ;;  %v1853_v4 = vadd.f32 %v1852_v60, %v1822_v23 }
 0x200   : > { %v1911_v15 = vadd.f32 %v1910_v48, %v1878_v12 }
 0x202   : > { %v1937_v61 = vpop.f32.mrf.mxu1 }
 0x203   : > { %v1938_v1 = vadd.f32 %v1937_v61, %v1911_v15  ;;  %v1914_v6 = vpop.f32.mrf.mxu0 }
 0x205   : > { %v1883_v3 = vpop.f32.mrf.mxu3  ;;  %v1968_v53 = vpop.f32.mrf.mxu2  ;;  %v11818_v36 = vand.u32 4294901760, %v1938_v1 }
 0x206   : > { %v1884_v18 = vadd.f32 %v1883_v3, %v1853_v4 }
 0x207   : > { %v11821_v22 = vsub.f32 %v1938_v1, %v11818_v36 }
 0x208   : > { %v1915_v44 = vadd.f32 %v1914_v6, %v1884_v18 }
 0x209   : > { %v11831_v54 = vand.u32 4294901760, %v11821_v22 }
 0x20a   : > { %v1941_v49 = vpop.f32.mrf.mxu1 }
 0x20b   : > { %v1942_v55 = vadd.f32 %v1941_v49, %v1915_v44  ;;  %v2037_v11 = vpop.f32.mrf.mxu0  ;;  %v2192_v43 = vsub.f32 %v11821_v22, %v11831_v54 }
 0x20d   : > { %v11823_v38 = vand.u32 4294901760, %v1942_v55  ;;  %v1976_v28 = vpop.f32.mrf.mxu2  ;;  %v2007_v7 = vpop.f32.mrf.mxu3  ;;  %v2193_v60 = vand.u32 4294901760, %v2192_v43 }
 0x20e   : > { %v2008_v40 = vadd.f32 %v2007_v7, %v1968_v53 }
 0x20f   : > { %v11826_v57 = vsub.f32 %v1942_v55, %v11823_v38  ;;  %2149 = vmatpush.msra.mxu0 %v11823_v38  ;;  %2250 = vmatpush.msra.mxu3 %v11823_v38 }
 0x210   : > { %v2038_v29 = vadd.f32 %v2037_v11, %v2008_v40 }
 0x211   : > { %2151 = vmatpush.msra.mxu0 %v11818_v36  ;;  %2220 = vmatpush.msra.mxu2 %v11826_v57  ;;  %v11836_v56 = vand.u32 4294901760, %v11826_v57 }
 0x212   : > { %2252 = vmatpush.msra.mxu3 %v11818_v36  ;;  %2157 = vmatmul.f32.vlgmr.msra.gmra.mxu0 %v11528_v26  ;;  %v2067_v30 = vpop.f32.mrf.mxu1 }
 0x213   : > { %2223 = vmatpush.msra.mxu2 %v11821_v22  ;;  %2283 = vmatpush.msrb.mxu0 %v11836_v56  ;;  %v2186_v20 = vsub.f32 %v11826_v57, %v11836_v56  ;;  %v2068_v14 = vadd.f32 %v2067_v30, %v2038_v29  ;;  %v2042_v23 = vpop.f32.mrf.mxu0 }
 0x214   : > { %2226 = vmatmul.f32.vlgmr.msra.gmra.mxu2 %v11508_v58  ;;  %2256 = vmatmul.f32.vlgmr.msra.gmra.mxu3 %v11512_v63 }
 0x215   : > { %v2011_v39 = vpop.f32.mrf.mxu3  ;;  %2287 = vmatpush.msrb.mxu0 %v11831_v54  ;;  %v2187_v47 = vand.u32 4294901760, %v2186_v20  ;;  %v2100_v48 = vpop.f32.mrf.mxu2 }
 0x216   : > { %v2012_v12 = vadd.f32 %v2011_v39, %v1976_v28  ;;  %v2101_v15 = vadd.f32 %v2100_v48, %v2068_v14  ;;  %v13690_v48 = vld [vmem:[#allocation43_spill] sm:$0xff] }
 0x217   : > { %2188 = vmatpush.msra.mxu1 %v2187_v47  ;;  %v10496_v14 = vld [vmem:[%s11388_s25 + $0x28] sm:$0xff] }
 0x218   : > { %v2043_v4 = vadd.f32 %v2042_v23, %v2012_v12  ;;  %v2903_v23 = vsel %vm584_vm0, %v10496_v14, 0 }
 0x219   : > { %2194 = vmatpush.msra.mxu1 %v2193_v60 }
 0x21a   : > { %2165 = vmatmul.f32.gmra.mxu0 %v11562_v51  ;;  %2196 = vmatmul.f32.vlgmr.msra.gmra.mxu1 %v11505_v50  ;;  %v2073_v61 = vpop.f32.mrf.mxu1 }
 0x21b   : > { %2312 = vmatpush.msrb.mxu1 %v11823_v38  ;;  %v2074_v53 = vadd.f32 %v2073_v61, %v2043_v4  ;;  %v13693_v61 = vld [vmem:[#allocation39_spill] sm:$0xff]  ;;  %v2931_v4 = vand.u32 4294901760, %v2903_v23 }
 0x21c   : > { %2231 = vmatmul.f32.gmra.mxu2 %v11521_v10  ;;  %2262 = vmatmul.f32.gmra.mxu3 %v11531_v27 }
 0x21d   : > { %v2127_v1 = vpop.f32.mrf.mxu3  ;;  %2314 = vmatpush.msrb.mxu1 %v11818_v36  ;;  %v2104_v18 = vpop.f32.mrf.mxu2 }
 0x21e   : > { %v2128_v3 = vadd.f32 %v2127_v1, %v2101_v15  ;;  %v2105_v44 = vadd.f32 %v2104_v18, %v2074_v53  ;;  %v13692_v15 = vld [vmem:[#allocation38_spill] sm:$0xff]  ;;  %v2932_v53 = vsub.f32 %v2903_v23, %v2931_v4  ;;  %v13694_v18 = vld [vmem:[#allocation32_spill] sm:$0xff] }
 0x220   : > { %v11857_v6 = vand.u32 4294901760, %v2128_v3 }
 0x222   : > { %2200 = vmatmul.f32.gmra.mxu1 %v11514_v0  ;;  %2289 = vmatmul.f32.vlgmr.msrb.gmra.mxu0 %v11505_v50  ;;  %v2380_v28 = vsub.f32 %v2128_v3, %v11857_v6 }
 0x224   : > { %v2381_v40 = vand.u32 4294901760, %v2380_v28 }
 0x225   : > { %v2131_v49 = vpop.f32.mrf.mxu3 }
 0x226   : > { %v2132_v55 = vadd.f32 %v2131_v49, %v2105_v44  ;;  %v2382_v43 = vsub.f32 %v2380_v28, %v2381_v40  ;;  %v2933_v44 = vand.u32 4294901760, %v2932_v53  ;;  %v13695_v49 = vld [vmem:[#allocation33_spill] sm:$0xff] }
 0x228   : > { %v11860_v7 = vand.u32 4294901760, %v2132_v55  ;;  %v2383_v29 = vand.u32 4294901760, %v2382_v43  ;;  %v13701_v43 = vld [vmem:[#allocation41_spill] sm:$0xff] }
 0x22a   : > { %v2374_v11 = vsub.f32 %v2132_v55, %v11860_v7  ;;  %2339 = vmatpush.msrb.mxu2 %v11860_v7  ;;  %2440 = vmatpush.msra.mxu1 %v11860_v7  ;;  %v2934_v55 = vsub.f32 %v2932_v53, %v2933_v44 }
 0x22b   : > { %2293 = vmatmul.f32.gmra.mxu0 %v11514_v0  ;;  %2316 = vmatmul.f32.vlgmr.msrb.gmra.mxu1 %v11505_v50 }
 0x22c   : > { %2341 = vmatpush.msrb.mxu2 %v11857_v6  ;;  %2410 = vmatpush.msra.mxu0 %v2374_v11  ;;  %v2375_v30 = vand.u32 4294901760, %v2374_v11 }
 0x22d   : > { %2442 = vmatpush.msra.mxu1 %v11857_v6  ;;  %2347 = vmatmul.f32.vlgmr.msrb.gmra.mxu2 %v11591_v33 }
 0x22e   : > { %2413 = vmatpush.msra.mxu0 %v2380_v28  ;;  %v2376_v20 = vsub.f32 %v2374_v11, %v2375_v30  ;;  %2473 = vmatpush.msra.mxu2 %v2375_v30 }
 0x22f   : > { %2570 = vmatpush.msrb.mxu1 %v2187_v47 }
 0x230   : > { %2531 = vmatpush.msrb.mxu0 %v11823_v38  ;;  %v2377_v39 = vand.u32 4294901760, %v2376_v20  ;;  %2477 = vmatpush.msra.mxu2 %v2381_v40  ;;  %v13700_v20 = vld [vmem:[#allocation40_spill] sm:$0xff] }
 0x231   : > { %2576 = vmatpush.msrb.mxu1 %v2193_v60  ;;  %v13691_v60 = vld [vmem:[#allocation35_spill] sm:$0xff] }
 0x232   : > { %2533 = vmatpush.msrb.mxu0 %v11818_v36  ;;  %2602 = vmatpush.msrb.mxu2 %v11826_v57  ;;  %v13688_v57 = vld [vmem:[#allocation42_spill] sm:$0xff] }
 0x233   : > { %2378 = vmatpush.msrb.mxu3 %v2377_v39  ;;  %2320 = vmatmul.f32.gmra.mxu1 %v11514_v0 }
 0x234   : > { %2416 = vmatmul.f32.vlgmr.msra.gmra.mxu0 %v11565_v52  ;;  %2605 = vmatpush.msrb.mxu2 %v11821_v22  ;;  %v13687_v22 = vld [vmem:[#allocation31_spill] sm:$0xff] }
 0x235   : > { %2665 = vmatpush.msra.mxu0 %v11836_v56  ;;  %2384 = vmatpush.msrb.mxu3 %v2383_v29  ;;  %v13689_v56 = vld [vmem:[#allocation34_spill] sm:$0xff] }
 0x236   : > { %2355 = vmatmul.f32.gmra.mxu2 %v11608_v46  ;;  %2386 = vmatmul.f32.vlgmr.msrb.gmra.mxu3 %v11551_v42 }
 0x237   : > { %2669 = vmatpush.msra.mxu0 %v11831_v54  ;;  %2502 = vmatpush.msra.mxu3 %v11860_v7 }
 0x239   : > { %2504 = vmatpush.msra.mxu3 %v11857_v6 }
 0x23b   : > { %2632 = vmatpush.msrb.mxu3 %v11823_v38  ;;  %2446 = vmatmul.f32.vlgmr.msra.gmra.mxu1 %v11571_v62 }
 0x23c   : > { %2421 = vmatmul.f32.gmra.mxu0 %v11584_v21  ;;  %2694 = vmatpush.msra.mxu1 %v11823_v38  ;;  %v10495_v38 = vld [vmem:[%s11388_s25 + $0x20] sm:$0xff] }
 0x23d   : > { %2634 = vmatpush.msrb.mxu3 %v11818_v36  ;;  %v2900_v54 = vsel %vm584_vm0, %v10495_v38, 0 }
 0x23e   : > { %2479 = vmatmul.f32.vlgmr.msra.gmra.mxu2 %v11551_v42  ;;  %2390 = vmatmul.f32.gmra.mxu3 %v11574_v5  ;;  %v11918_v47 = vand.u32 4294901760, %v2900_v54 }
 0x23f   : > { %2696 = vmatpush.msra.mxu1 %v11818_v36  ;;  %2721 = vmatpush.msra.mxu2 %v11860_v7  ;;  %v13686_v36 = vld [vmem:[#allocation30_spill] sm:$0xff] }
 0x240   : > { %v2924_v12 = vsub.f32 %v2900_v54, %v11918_v47 }
 0x241   : > { %2723 = vmatpush.msra.mxu2 %v11857_v6 }
 0x242   : > { %v2925_v1 = vand.u32 4294901760, %v2924_v12 }
 0x243   : > { %2452 = vmatmul.f32.gmra.mxu1 %v11597_v37 }
 0x244   : > { %2539 = vmatmul.f32.vlgmr.msrb.gmra.mxu0 %v11591_v33  ;;  %v2926_v3 = vsub.f32 %v2924_v12, %v2925_v1 }
 0x245   : > { %2792 = vmatpush.msrb.mxu0 %v2374_v11  ;;  %v2935_v11 = vand.u32 4294901760, %v2934_v55 }
 0x246   : > { %2483 = vmatmul.f32.gmra.mxu2 %v11574_v5  ;;  %2506 = vmatmul.f32.vlgmr.msra.gmra.mxu3 %v11551_v42 }
 0x247   : > { %2795 = vmatpush.msrb.mxu0 %v2380_v28  ;;  %2760 = vmatpush.msra.mxu3 %v2377_v39  ;;  %v13696_v28 = vld [vmem:[#allocation36_spill] sm:$0xff] }
 0x249   : > { %2766 = vmatpush.msra.mxu3 %v2383_v29 }
 0x24b   : > { %2578 = vmatmul.f32.vlgmr.msrb.gmra.mxu1 %v11551_v42 }
 0x24c   : > { %2547 = vmatmul.f32.gmra.mxu0 %v11608_v46  ;;  %2822 = vmatpush.msrb.mxu1 %v11860_v7 }
 0x24e   : > { %2608 = vmatmul.f32.vlgmr.msrb.gmra.mxu2 %v11565_v52  ;;  %2510 = vmatmul.f32.gmra.mxu3 %v11574_v5 }
 0x24f   : > { %2824 = vmatpush.msrb.mxu1 %v11857_v6  ;;  %2855 = vmatpush.msrb.mxu2 %v2375_v30  ;;  %v13699_v30 = vld [vmem:[#allocation45_spill] sm:$0xff] }
 0x251   : > { %2859 = vmatpush.msrb.mxu2 %v2381_v40  ;;  %v13698_v40 = vld [vmem:[#allocation44_spill] sm:$0xff] }
 0x253   : > { %2582 = vmatmul.f32.gmra.mxu1 %v11574_v5 }
 0x254   : > { %2671 = vmatmul.f32.vlgmr.msra.gmra.mxu0 %v11551_v42 }
 0x255   : > { %2920 = vmatpush.msra.mxu0 %v13686_v36 }
 0x256   : > { %2613 = vmatmul.f32.gmra.mxu2 %v11584_v21  ;;  %2638 = vmatmul.f32.vlgmr.msrb.gmra.mxu3 %v11571_v62 }
 0x257   : > { %2922 = vmatpush.msra.mxu0 %v13687_v22  ;;  %2884 = vmatpush.msrb.mxu3 %v11860_v7  ;;  %v13697_v7 = vld [vmem:[#allocation37_spill] sm:$0xff] }
 0x259   : > { %2886 = vmatpush.msrb.mxu3 %v11857_v6  ;;  %v2927_v6 = vand.u32 4294901760, %v2926_v3 }
 0x25b   : > { %2698 = vmatmul.f32.vlgmr.msra.gmra.mxu1 %v11551_v42 }
 0x25c   : > { %2675 = vmatmul.f32.gmra.mxu0 %v11574_v5  ;;  %2959 = vmatpush.msra.mxu1 %v13688_v57 }
 0x25e   : > { %2729 = vmatmul.f32.vlgmr.msra.gmra.mxu2 %v11528_v26  ;;  %2644 = vmatmul.f32.gmra.mxu3 %v11597_v37 }
 0x25f   : > { %2991 = vmatpush.msra.mxu2 %v13689_v56  ;;  %2965 = vmatpush.msra.mxu1 %v13690_v48  ;;  %v5425_v56 = vstv %s11967_s26  ;;  %s12266_s26 = sld [smem:[#allocation2 + $0x304]] }
 0x261   : > { %2994 = vmatpush.msra.mxu2 %v13691_v60  ;;  %v5371_v60 = vstv %s11963_s22  ;;  %s12264_s22 = sld [smem:[#allocation2 + $0x284]] }
 0x263   : > { %2702 = vmatmul.f32.gmra.mxu1 %v11574_v5 }
 0x264   : > { %2798 = vmatmul.f32.vlgmr.msrb.gmra.mxu0 %v11508_v58 }
 0x265   : > { %3054 = vmatpush.msrb.mxu0 %v13692_v15  ;;  %v5317_v15 = vstv %s11961_s6  ;;  %s12262_s6 = sld [smem:[#allocation2 + $0x204]] }
 0x266   : > { %2737 = vmatmul.f32.gmra.mxu2 %v11562_v51  ;;  %2768 = vmatmul.f32.vlgmr.msra.gmra.mxu3 %v11505_v50 }
 0x267   : > { %3058 = vmatpush.msrb.mxu0 %v13693_v61  ;;  %3021 = vmatpush.msra.mxu3 %v13686_v36 }
 0x269   : > { %3023 = vmatpush.msra.mxu3 %v13687_v22 }
 0x26b   : > { %2828 = vmatmul.f32.vlgmr.msrb.gmra.mxu1 %v11512_v63 }
 0x26c   : > { %2803 = vmatmul.f32.gmra.mxu0 %v11521_v10  ;;  %3083 = vmatpush.msrb.mxu1 %v13686_v36 }
 0x26e   : > { %2861 = vmatmul.f32.vlgmr.msrb.gmra.mxu2 %v11505_v50  ;;  %2772 = vmatmul.f32.gmra.mxu3 %v11514_v0 }
 0x26f   : > { %3110 = vmatpush.msrb.mxu2 %v13694_v18  ;;  %3085 = vmatpush.msrb.mxu1 %v13687_v22 }
 0x271   : > { %3112 = vmatpush.msrb.mxu2 %v13695_v49 }
 0x273   : > { %2834 = vmatmul.f32.gmra.mxu1 %v11531_v27 }
 0x274   : > { %2928 = vmatmul.f32.vlgmr.msra.gmra.mxu0 %v2927_v6 }
 0x275   : > { %3181 = vmatpush.msra.mxu0 %v13696_v28 }
 0x276   : > { %2865 = vmatmul.f32.gmra.mxu2 %v11514_v0  ;;  %2888 = vmatmul.f32.vlgmr.msrb.gmra.mxu3 %v11505_v50 }
 0x277   : > { %3184 = vmatpush.msra.mxu0 %v13697_v7  ;;  %3149 = vmatpush.msrb.mxu3 %v13698_v40 }
 0x279   : > { %3155 = vmatpush.msrb.mxu3 %v13699_v30 }
 0x27b   : > { %2967 = vmatmul.f32.vlgmr.msra.gmra.mxu1 %v11918_v47 }
 0x27c   : > { %2936 = vmatmul.f32.gmra.mxu0 %v2935_v11  ;;  %3211 = vmatpush.msra.mxu1 %v13694_v18 }
 0x27e   : > { %2997 = vmatmul.f32.vlgmr.msra.gmra.mxu2 %v2924_v12  ;;  %2892 = vmatmul.f32.gmra.mxu3 %v11514_v0 }
 0x27f   : > { %3244 = vmatpush.msra.mxu2 %v13700_v20  ;;  %3213 = vmatpush.msra.mxu1 %v13695_v49 }
 0x281   : > { %3248 = vmatpush.msra.mxu2 %v13701_v43 }
 0x283   : > { %2971 = vmatmul.f32.gmra.mxu1 %v2931_v4 }
 0x284   : > { %3060 = vmatmul.f32.vlgmr.msrb.gmra.mxu0 %v11918_v47 }
 0x286   : > { %3002 = vmatmul.f32.gmra.mxu2 %v2932_v53  ;;  %3027 = vmatmul.f32.vlgmr.msra.gmra.mxu3 %v2925_v1 }
 0x287   : > { %3273 = vmatpush.msra.mxu3 %v13694_v18 }
 0x289   : > { %3275 = vmatpush.msra.mxu3 %v13695_v49 }
 0x28b   : > { %3087 = vmatmul.f32.vlgmr.msrb.gmra.mxu1 %v11918_v47 }
 0x28c   : > { %3064 = vmatmul.f32.gmra.mxu0 %v2931_v4 }
 0x28e   : > { %3118 = vmatmul.f32.vlgmr.msrb.gmra.mxu2 %v2927_v6  ;;  %3033 = vmatmul.f32.gmra.mxu3 %v2933_v44 }
 0x28f   : > { %v2158_v39 = vpop.f32.mrf.mxu0 }
 0x293   : > { %3091 = vmatmul.f32.gmra.mxu1 %v2931_v4 }
 0x294   : > { %3187 = vmatmul.f32.vlgmr.msra.gmra.mxu0 %v2924_v12 }
 0x296   : > { %3126 = vmatmul.f32.gmra.mxu2 %v2935_v11  ;;  %3157 = vmatmul.f32.vlgmr.msrb.gmra.mxu3 %v11918_v47 }
 0x297   : > { %v2197_v29 = vpop.f32.mrf.mxu1  ;;  %v2166_v38 = vpop.f32.mrf.mxu0 }
 0x298   : > { %v2227_v54 = vpop.f32.mrf.mxu2  ;;  %v2257_v6 = vpop.f32.mrf.mxu3  ;;  %v2198_v20 = vadd.f32 %v2197_v29, %v2158_v39 }
 0x29a   : > { %v2228_v30 = vadd.f32 %v2227_v54, %v2198_v20 }
 0x29b   : > { %3217 = vmatmul.f32.vlgmr.msra.gmra.mxu1 %v2925_v1 }
 0x29c   : > { %3192 = vmatmul.f32.gmra.mxu0 %v2932_v53  ;;  %v2258_v49 = vadd.f32 %v2257_v6, %v2228_v30 }
 0x29e   : > { %3250 = vmatmul.f32.vlgmr.msra.gmra.mxu2 %v11918_v47  ;;  %3161 = vmatmul.f32.gmra.mxu3 %v2931_v4 }
 0x29f   : > { %v2201_v14 = vpop.f32.mrf.mxu1  ;;  %v2290_v23 = vpop.f32.mrf.mxu0 }
 0x2a0   : > { %v2232_v3 = vpop.f32.mrf.mxu2  ;;  %v2263_v16 = vpop.f32.mrf.mxu3  ;;  %v2291_v20 = vadd.f32 %v2290_v23, %v2258_v49  ;;  %v5479_v49 = vstv %s11969_s15  ;;  %v5533_v23 = vstv %s11971_s29  ;;  %s12268_s15 = sld [smem:[#allocation2 + $0x384]] }
 0x2a1   : > { %s12329_s29 = sld [smem:[#allocation2 + $0x105]] }
 0x2a3   : > { %3223 = vmatmul.f32.gmra.mxu1 %v2933_v44 }
 0x2a6   : > { %3254 = vmatmul.f32.gmra.mxu2 %v2931_v4  ;;  %3277 = vmatmul.f32.vlgmr.msra.gmra.mxu3 %v11918_v47 }
 0x2a8   : > { %v2317_v12 = vpop.f32.mrf.mxu1  ;;  %v2294_v55 = vpop.f32.mrf.mxu0 }
 0x2a9   : > { %v2318_v6 = vadd.f32 %v2317_v12, %v2291_v20 }
 0x2ae   : > { %3281 = vmatmul.f32.gmra.mxu3 %v2931_v4  ;;  %v2202_v4 = vadd.f32 %v2201_v14, %v2166_v38 }
 0x2b0   : > { %v2348_v11 = vpop.f32.mrf.mxu2  ;;  %v2321_v35 = vpop.f32.mrf.mxu1 }
 0x2b1   : > { %v2417_v1 = vpop.f32.mrf.mxu0 }
 0x2b8   : > { %v2447_v45 = vpop.f32.mrf.mxu1 }
 0x2b9   : > { %v2356_v53 = vpop.f32.mrf.mxu2  ;;  %v2387_v34 = vpop.f32.mrf.mxu3 }
 0x2ba   : > { %v2422_v43 = vpop.f32.mrf.mxu0  ;;  %v2388_v40 = vadd.f32 %v2387_v34, %v2348_v11  ;;  %v2233_v34 = vadd.f32 %v2232_v3, %v2202_v4 }
 0x2bc   : > { %v2418_v18 = vadd.f32 %v2417_v1, %v2388_v40  ;;  %v2264_v11 = vadd.f32 %v2263_v16, %v2233_v34 }
 0x2be   : > { %v2448_v39 = vadd.f32 %v2447_v45, %v2418_v18  ;;  %v5587_v45 = vstv %s11973_s21  ;;  %v2295_v18 = vadd.f32 %v2294_v55, %v2264_v11  ;;  %s12331_s21 = sld [smem:[#allocation2 + $0x185]] }
 0x2c0   : > { %v2453_v47 = vpop.f32.mrf.mxu1 }
 0x2c1   : > { %v2480_v44 = vpop.f32.mrf.mxu2  ;;  %v2391_v7 = vpop.f32.mrf.mxu3 }
 0x2c2   : > { %v11965_v28 = vpop.f32.mrf.mxu0  ;;  %v2392_v29 = vadd.f32 %v2391_v7, %v2356_v53  ;;  %v2481_v54 = vadd.f32 %v2480_v44, %v2448_v39 }
 0x2c4   : > { %v2423_v1 = vadd.f32 %v2422_v43, %v2392_v29 }
 0x2c6   : > { %v2454_v7 = vadd.f32 %v2453_v47, %v2423_v1 }
 0x2c8   : > { %v2579_v30 = vpop.f32.mrf.mxu1 }
 0x2c9   : > { %v2484_v38 = vpop.f32.mrf.mxu2  ;;  %v2507_v40 = vpop.f32.mrf.mxu3 }
 0x2ca   : > { %v2548_v14 = vpop.f32.mrf.mxu0  ;;  %v2508_v61 = vadd.f32 %v2507_v40, %v2481_v54  ;;  %v2485_v4 = vadd.f32 %v2484_v38, %v2454_v7  ;;  %v2322_v40 = vadd.f32 %v2321_v35, %v2295_v18 }
 0x2cc   : > { %v11978_v48 = vsub.f32 %v2318_v6, %v2508_v61 }
 0x2ce   : > { %v5318_v3 = vmul.f32 %v5317_v15, %v11978_v48  ;;  %v5372_v53 = vmul.f32 %v5371_v60, %v11978_v48  ;;  %v5426_v44 = vmul.f32 %v5425_v56, %v11978_v48  ;;  %v5480_v16 = vmul.f32 %v5479_v49, %v11978_v48 }
 0x2cf   : > { %v5534_v43 = vmul.f32 %v5533_v23, %v11978_v48  ;;  %v5588_v12 = vmul.f32 %v5587_v45, %v11978_v48 }
 0x2d0   : > { %v2583_v34 = vpop.f32.mrf.mxu1  ;;  %v11990_v20 = vadd.f32 %v5318_v3, %v11777_v31  ;;  %v11993_v55 = vadd.f32 %v5372_v53, %v11779_v17  ;;  %v11996_v29 = vadd.f32 %v5426_v44, %v11784_v8  ;;  %v11999_v54 = vadd.f32 %v5480_v16, %v11786_v9 }
 0x2d1   : > { %v2609_v61 = vpop.f32.mrf.mxu2  ;;  %v2511_v47 = vpop.f32.mrf.mxu3  ;;  %v12002_v38 = vadd.f32 %v5534_v43, %v11788_v32  ;;  %v12005_v11 = vadd.f32 %v5588_v12, %v11790_v41 }
 0x2d2   : > { %v2672_v39 = vpop.f32.mrf.mxu0  ;;  %v2512_v6 = vadd.f32 %v2511_v47, %v2485_v4  ;;  %v2584_v4 = vadd.f32 %v2583_v34, %v2548_v14 }
 0x2d4   : > { %v12007_v31 = vsub.f32 %v2322_v40, %v2512_v6 }
 0x2d6   : > { %v5319_v17 = vmul.f32 %v5317_v15, %v12007_v31  ;;  %v5373_v1 = vmul.f32 %v5371_v60, %v12007_v31  ;;  %v5427_v8 = vmul.f32 %v5425_v56, %v12007_v31  ;;  %v5481_v7 = vmul.f32 %v5479_v49, %v12007_v31 }
 0x2d7   : > { %v5535_v9 = vmul.f32 %v5533_v23, %v12007_v31  ;;  %v5589_v35 = vmul.f32 %v5587_v45, %v12007_v31 }
 0x2d8   : > { %v2699_v32 = vpop.f32.mrf.mxu1  ;;  %v12016_v3 = vadd.f32 %v5319_v17, %v11806_v19  ;;  %v12019_v41 = vadd.f32 %v5373_v1, %v11808_v13  ;;  %v12022_v60 = vadd.f32 %v5427_v8, %v11810_v2  ;;  %v12025_v56 = vadd.f32 %v5481_v7, %v11812_v25 }
 0x2d9   : > { %v2614_v18 = vpop.f32.mrf.mxu2  ;;  %v2639_v53 = vpop.f32.mrf.mxu3  ;;  %v12028_v49 = vadd.f32 %v5535_v9, %v11814_v59  ;;  %v12031_v23 = vadd.f32 %v5589_v35, %v11816_v24  ;;  %v2580_v19 = vadd.f32 %v2579_v30, %v11965_v28 }
 0x2da   : > { %v2676_v15 = vpop.f32.mrf.mxu0  ;;  %v2615_v47 = vadd.f32 %v2614_v18, %v2584_v4 }
 0x2db   : > { %v2610_v45 = vadd.f32 %v2609_v61, %v2580_v19 }
 0x2dd   : > { %v2640_v12 = vadd.f32 %v2639_v53, %v2610_v45  ;;  %v5323_v45 = vstv %s12034_s16  ;;  %s12333_s16 = sld [smem:[#allocation2 + $0x205]] }
 0x2df   : > { %v2673_v2 = vadd.f32 %v2672_v39, %v2640_v12  ;;  %v5485_v12 = vstv %s12040_s27  ;;  %s12339_s27 = sld [smem:[#allocation2 + $0x385]] }
 0x2e0   : > { %v2703_v13 = vpop.f32.mrf.mxu1 }
 0x2e1   : > { %v2730_v44 = vpop.f32.mrf.mxu2  ;;  %v2645_v16 = vpop.f32.mrf.mxu3  ;;  %v2700_v59 = vadd.f32 %v2699_v32, %v2673_v2 }
 0x2e2   : > { %v2799_v43 = vpop.f32.mrf.mxu0  ;;  %v2646_v1 = vadd.f32 %v2645_v16, %v2615_v47  ;;  %v5431_v16 = vstv %s12038_s13  ;;  %s12337_s13 = sld [smem:[#allocation2 + $0x305]] }
 0x2e3   : > { %v2731_v8 = vadd.f32 %v2730_v44, %v2700_v59  ;;  %v5377_v44 = vstv %s12036_s23  ;;  %s12335_s23 = sld [smem:[#allocation2 + $0x285]] }
 0x2e4   : > { %v2677_v24 = vadd.f32 %v2676_v15, %v2646_v1 }
 0x2e6   : > { %v2704_v34 = vadd.f32 %v2703_v13, %v2677_v24  ;;  %v5539_v13 = vstv %s12042_s12  ;;  %s12505_s12 = sld [smem:[#allocation2 + $0x106]] }
 0x2e8   : > { %v2829_v25 = vpop.f32.mrf.mxu1 }
 0x2e9   : > { %v2738_v40 = vpop.f32.mrf.mxu2  ;;  %v2769_v6 = vpop.f32.mrf.mxu3 }
 0x2ea   : > { %v2804_v17 = vpop.f32.mrf.mxu0  ;;  %v2770_v28 = vadd.f32 %v2769_v6, %v2731_v8  ;;  %v2739_v9 = vadd.f32 %v2738_v40, %v2704_v34 }
 0x2ec   : > { %v2800_v39 = vadd.f32 %v2799_v43, %v2770_v28  ;;  %v5593_v43 = vstv %s12044_s0  ;;  %s12507_s0 = sld [smem:[#allocation2 + $0x186]] }
 0x2ee   : > { %v2830_v35 = vadd.f32 %v2829_v25, %v2800_v39 }
 0x2f0   : > { %v2835_v14 = vpop.f32.mrf.mxu1 }
 0x2f1   : > { %v2862_v30 = vpop.f32.mrf.mxu2  ;;  %v2773_v61 = vpop.f32.mrf.mxu3 }
 0x2f2   : > { %v2929_v7 = vpop.f32.mrf.mxu0  ;;  %v2774_v18 = vadd.f32 %v2773_v61, %v2739_v9  ;;  %v2863_v32 = vadd.f32 %v2862_v30, %v2830_v35 }
 0x2f4   : > { %v2805_v4 = vadd.f32 %v2804_v17, %v2774_v18 }
 0x2f6   : > { %v2836_v24 = vadd.f32 %v2835_v14, %v2805_v4 }
 0x2f8   : > { %v2968_v15 = vpop.f32.mrf.mxu1 }
 0x2f9   : > { %v2866_v53 = vpop.f32.mrf.mxu2  ;;  %v2889_v19 = vpop.f32.mrf.mxu3 }
 0x2fa   : > { %v12050_v2 = vadd.f32 %v2889_v19, %v2863_v32  ;;  %v2937_v40 = vpop.f32.mrf.mxu0  ;;  %v2867_v9 = vadd.f32 %v2866_v53, %v2836_v24 }
 0x2fc   : > { %v5324_v47 = vmul.f32 %v5323_v45, %v12050_v2  ;;  %v5378_v6 = vmul.f32 %v5377_v44, %v12050_v2  ;;  %v5432_v25 = vmul.f32 %v5431_v16, %v12050_v2  ;;  %v5486_v59 = vmul.f32 %v5485_v12, %v12050_v2 }
 0x2fd   : > { %v5540_v1 = vmul.f32 %v5539_v13, %v12050_v2  ;;  %v5594_v8 = vmul.f32 %v5593_v43, %v12050_v2 }
 0x2fe   : > { %v12061_v17 = vadd.f32 %v5324_v47, %v11990_v20  ;;  %v12064_v28 = vadd.f32 %v5378_v6, %v11993_v55  ;;  %v12067_v30 = vadd.f32 %v5432_v25, %v11996_v29  ;;  %v12070_v61 = vadd.f32 %v5486_v59, %v11999_v54 }
 0x2ff   : > { %v12073_v34 = vadd.f32 %v5540_v1, %v12002_v38  ;;  %v12076_v39 = vadd.f32 %v5594_v8, %v12005_v11  ;;  %v2969_v55 = vadd.f32 %v2968_v15, %v2929_v7 }
 0x300   : > { %v2972_v35 = vpop.f32.mrf.mxu1 }
 0x301   : > { %v2998_v14 = vpop.f32.mrf.mxu2  ;;  %v2893_v20 = vpop.f32.mrf.mxu3 }
 0x302   : > { %v12078_v18 = vadd.f32 %v2893_v20, %v2867_v9  ;;  %v3061_v47 = vpop.f32.mrf.mxu0 }
 0x304   : > { %v5325_v32 = vmul.f32 %v5323_v45, %v12078_v18  ;;  %v5379_v29 = vmul.f32 %v5377_v44, %v12078_v18  ;;  %v5433_v54 = vmul.f32 %v5431_v16, %v12078_v18  ;;  %v5487_v19 = vmul.f32 %v5485_v12, %v12078_v18 }
 0x305   : > { %v5541_v38 = vmul.f32 %v5539_v13, %v12078_v18  ;;  %v5595_v11 = vmul.f32 %v5593_v43, %v12078_v18  ;;  %v2999_v16 = vadd.f32 %v2998_v14, %v2969_v55 }
 0x306   : > { %v12087_v53 = vadd.f32 %v5325_v32, %v12016_v3  ;;  %v12090_v4 = vadd.f32 %v5379_v29, %v12019_v41  ;;  %v12093_v7 = vadd.f32 %v5433_v54, %v12022_v60  ;;  %v12096_v15 = vadd.f32 %v5487_v19, %v12025_v56 }
 0x307   : > { %v12099_v45 = vadd.f32 %v5541_v38, %v12028_v49  ;;  %v12102_v44 = vadd.f32 %v5595_v11, %v12031_v23  ;;  %v2973_v41 = vadd.f32 %v2972_v35, %v2937_v40 }
 0x308   : > { %v3088_v13 = vpop.f32.mrf.mxu1 }
 0x309   : > { %v3003_v12 = vpop.f32.mrf.mxu2  ;;  %v3028_v3 = vpop.f32.mrf.mxu3 }
 0x30a   : > { %v3029_v43 = vadd.f32 %v3028_v3, %v2999_v16  ;;  %v3004_v59 = vadd.f32 %v3003_v12, %v2973_v41  ;;  %v3065_v8 = vpop.f32.mrf.mxu0 }
 0x30c   : > { %v3062_v6 = vadd.f32 %v3061_v47, %v3029_v43 }
 0x30e   : > { %v3089_v25 = vadd.f32 %v3088_v13, %v3062_v6 }
 0x310   : > { %v12104_v56 = vand.u32 4294901760, %v3089_v25  ;;  %v3092_v49 = vpop.f32.mrf.mxu1 }
 0x311   : > { %v3119_v60 = vpop.f32.mrf.mxu2  ;;  %v3034_v1 = vpop.f32.mrf.mxu3 }
 0x312   : > { %v3035_v24 = vadd.f32 %v3034_v1, %v3004_v59  ;;  %v12107_v23 = vsub.f32 %v3089_v25, %v12104_v56  ;;  %v3188_v54 = vpop.f32.mrf.mxu0 }
 0x314   : > { %v3066_v9 = vadd.f32 %v3065_v8, %v3035_v24  ;;  %v12117_v35 = vand.u32 4294901760, %v12107_v23 }
 0x316   : > { %v3093_v14 = vadd.f32 %v3092_v49, %v3066_v9  ;;  %v3343_v38 = vsub.f32 %v12107_v23, %v12117_v35 }
 0x318   : > { %v12109_v20 = vand.u32 4294901760, %v3093_v14  ;;  %v3218_v16 = vpop.f32.mrf.mxu1  ;;  %v3344_v3 = vand.u32 4294901760, %v3343_v38 }
 0x319   : > { %v3127_v55 = vpop.f32.mrf.mxu2  ;;  %v3158_v32 = vpop.f32.mrf.mxu3 }
 0x31a   : > { %v12112_v40 = vsub.f32 %v3093_v14, %v12109_v20  ;;  %3300 = vmatpush.msrb.mxu0 %v12109_v20  ;;  %3401 = vmatpush.msrb.mxu3 %v12109_v20  ;;  %v3159_v11 = vadd.f32 %v3158_v32, %v3119_v60  ;;  %v3193_v25 = vpop.f32.mrf.mxu0 }
 0x31c   : > { %3302 = vmatpush.msrb.mxu0 %v12104_v56  ;;  %3371 = vmatpush.msrb.mxu2 %v12112_v40  ;;  %v12122_v29 = vand.u32 4294901760, %v12112_v40  ;;  %v3189_v13 = vadd.f32 %v3188_v54, %v3159_v11 }
 0x31d   : > { %3403 = vmatpush.msrb.mxu3 %v12104_v56  ;;  %3308 = vmatmul.f32.vlgmr.msrb.gmra.mxu0 %v11528_v26 }
 0x31e   : > { %3374 = vmatpush.msrb.mxu2 %v12107_v23  ;;  %3434 = vmatpush.msra.mxu0 %v12122_v29  ;;  %v3337_v19 = vsub.f32 %v12112_v40, %v12122_v29  ;;  %v3219_v6 = vadd.f32 %v3218_v16, %v3189_v13 }
 0x31f   : > { %3377 = vmatmul.f32.vlgmr.msrb.gmra.mxu2 %v11508_v58  ;;  %3407 = vmatmul.f32.vlgmr.msrb.gmra.mxu3 %v11512_v63 }
 0x320   : > { %3438 = vmatpush.msra.mxu0 %v12117_v35  ;;  %v3338_v47 = vand.u32 4294901760, %v3337_v19  ;;  %v3224_v8 = vpop.f32.mrf.mxu1 }
 0x321   : > { %v3162_v12 = vpop.f32.mrf.mxu3  ;;  %v3251_v43 = vpop.f32.mrf.mxu2 }
 0x322   : > { %3339 = vmatpush.msrb.mxu1 %v3338_v47  ;;  %v3163_v41 = vadd.f32 %v3162_v12, %v3127_v55  ;;  %v3252_v59 = vadd.f32 %v3251_v43, %v3219_v6 }
 0x324   : > { %3345 = vmatpush.msrb.mxu1 %v3344_v3  ;;  %v3194_v1 = vadd.f32 %v3193_v25, %v3163_v41  ;;  %v13705_v25 = vld [vmem:[#allocation38_spill] sm:$0xff] }
 0x325   : > { %3316 = vmatmul.f32.gmra.mxu0 %v11562_v51  ;;  %3347 = vmatmul.f32.vlgmr.msrb.gmra.mxu1 %v11505_v50 }
 0x326   : > { %3463 = vmatpush.msra.mxu1 %v12109_v20  ;;  %v3225_v9 = vadd.f32 %v3224_v8, %v3194_v1 }
 0x327   : > { %3382 = vmatmul.f32.gmra.mxu2 %v11521_v10  ;;  %3413 = vmatmul.f32.gmra.mxu3 %v11531_v27 }
 0x328   : > { %3465 = vmatpush.msra.mxu1 %v12104_v56 }
 0x329   : > { %v3278_v60 = vpop.f32.mrf.mxu3  ;;  %v3255_v49 = vpop.f32.mrf.mxu2 }
 0x32a   : > { %v3279_v24 = vadd.f32 %v3278_v60, %v3252_v59  ;;  %v3256_v55 = vadd.f32 %v3255_v49, %v3225_v9  ;;  %v13706_v59 = vld [vmem:[#allocation39_spill] sm:$0xff] }
 0x32c   : > { %v12143_v14 = vand.u32 4294901760, %v3279_v24 }
 0x32d   : > { %3351 = vmatmul.f32.gmra.mxu1 %v11514_v0  ;;  %3440 = vmatmul.f32.vlgmr.msra.gmra.mxu0 %v11505_v50 }
 0x32e   : > { %v3531_v19 = vsub.f32 %v3279_v24, %v12143_v14 }
 0x330   : > { %v3532_v16 = vand.u32 4294901760, %v3531_v19 }
 0x331   : > { %v3282_v32 = vpop.f32.mrf.mxu3 }
 0x332   : > { %v3283_v54 = vadd.f32 %v3282_v32, %v3256_v55  ;;  %v3533_v43 = vsub.f32 %v3531_v19, %v3532_v16  ;;  %v13708_v55 = vld [vmem:[#allocation33_spill] sm:$0xff] }
 0x334   : > { %v12146_v38 = vand.u32 4294901760, %v3283_v54  ;;  %v3534_v6 = vand.u32 4294901760, %v3533_v43 }
 0x335   : > { %3444 = vmatmul.f32.gmra.mxu0 %v11514_v0  ;;  %3467 = vmatmul.f32.vlgmr.msra.gmra.mxu1 %v11505_v50 }
 0x336   : > { %v3525_v11 = vsub.f32 %v3283_v54, %v12146_v38  ;;  %3490 = vmatpush.msra.mxu2 %v12146_v38  ;;  %3591 = vmatpush.msrb.mxu1 %v12146_v38  ;;  %v13709_v54 = vld [vmem:[#allocation36_spill] sm:$0xff] }
 0x338   : > { %3492 = vmatpush.msra.mxu2 %v12143_v14  ;;  %3561 = vmatpush.msrb.mxu0 %v3525_v11  ;;  %v3526_v12 = vand.u32 4294901760, %v3525_v11 }
 0x339   : > { %3593 = vmatpush.msrb.mxu1 %v12143_v14  ;;  %3498 = vmatmul.f32.vlgmr.msra.gmra.mxu2 %v11591_v33 }
 0x33a   : > { %3564 = vmatpush.msrb.mxu0 %v3531_v19  ;;  %v3527_v13 = vsub.f32 %v3525_v11, %v3526_v12  ;;  %3624 = vmatpush.msrb.mxu2 %v3526_v12 }
 0x33b   : > { %3721 = vmatpush.msra.mxu1 %v3338_v47  ;;  %v10498_v47 = vld [vmem:[%s11388_s25 + $0x38] sm:$0xff] }
 0x33c   : > { %3682 = vmatpush.msra.mxu0 %v12109_v20  ;;  %v3528_v41 = vand.u32 4294901760, %v3527_v13  ;;  %3628 = vmatpush.msrb.mxu2 %v3532_v16 }
 0x33d   : > { %3727 = vmatpush.msra.mxu1 %v3344_v3  ;;  %3567 = vmatmul.f32.vlgmr.msrb.gmra.mxu0 %v11565_v52  ;;  %v4054_v3 = vsel %vm584_vm0, %v10498_v47, 0 }
 0x33e   : > { %3471 = vmatmul.f32.gmra.mxu1 %v11514_v0  ;;  %3753 = vmatpush.msra.mxu2 %v12112_v40  ;;  %v13703_v40 = vld [vmem:[#allocation34_spill] sm:$0xff]  ;;  %v12217_v1 = vand.u32 4294901760, %v4054_v3 }
 0x33f   : > { %3684 = vmatpush.msra.mxu0 %v12104_v56  ;;  %3529 = vmatpush.msra.mxu3 %v3528_v41 }
 0x340   : > { %3756 = vmatpush.msra.mxu2 %v12107_v23  ;;  %v4083_v24 = vsub.f32 %v4054_v3, %v12217_v1 }
 0x341   : > { %3816 = vmatpush.msrb.mxu0 %v12122_v29  ;;  %3535 = vmatpush.msra.mxu3 %v3534_v6  ;;  %v13704_v29 = vld [vmem:[#allocation35_spill] sm:$0xff] }
 0x342   : > { %3506 = vmatmul.f32.gmra.mxu2 %v11608_v46  ;;  %3537 = vmatmul.f32.vlgmr.msra.gmra.mxu3 %v11551_v42  ;;  %v4084_v9 = vand.u32 4294901760, %v4083_v24 }
 0x343   : > { %3820 = vmatpush.msrb.mxu0 %v12117_v35  ;;  %3653 = vmatpush.msrb.mxu3 %v12146_v38 }
 0x344   : > { %v4085_v32 = vsub.f32 %v4083_v24, %v4084_v9 }
 0x345   : > { %3655 = vmatpush.msrb.mxu3 %v12143_v14  ;;  %3572 = vmatmul.f32.gmra.mxu0 %v11584_v21 }
 0x346   : > { %3597 = vmatmul.f32.vlgmr.msrb.gmra.mxu1 %v11571_v62 }
 0x347   : > { %3783 = vmatpush.msra.mxu3 %v12109_v20  ;;  %3845 = vmatpush.msrb.mxu1 %v12109_v20  ;;  %v13702_v20 = vld [vmem:[#allocation43_spill] sm:$0xff] }
 0x349   : > { %3785 = vmatpush.msra.mxu3 %v12104_v56  ;;  %3847 = vmatpush.msrb.mxu1 %v12104_v56  ;;  %v10497_v56 = vld [vmem:[%s11388_s25 + $0x30] sm:$0xff]  ;;  %s12258_s25 = sld [smem:[#allocation2 + $0x104]] }
 0x34a   : > { %3630 = vmatmul.f32.vlgmr.msrb.gmra.mxu2 %v11551_v42  ;;  %3541 = vmatmul.f32.gmra.mxu3 %v11574_v5  ;;  %v4051_v23 = vsel %vm584_vm0, %v10497_v56, 0 }
 0x34b   : > { %3872 = vmatpush.msrb.mxu2 %v12146_v38  ;;  %v12205_v35 = vand.u32 4294901760, %v4051_v23 }
 0x34d   : > { %3874 = vmatpush.msrb.mxu2 %v12143_v14  ;;  %3690 = vmatmul.f32.vlgmr.msra.gmra.mxu0 %v11591_v33 }
 0x34e   : > { %3603 = vmatmul.f32.gmra.mxu1 %v11597_v37  ;;  %3943 = vmatpush.msra.mxu0 %v3525_v11  ;;  %v13713_v11 = vld [vmem:[#allocation40_spill] sm:$0xff] }
 0x350   : > { %3946 = vmatpush.msra.mxu0 %v3531_v19  ;;  %v13711_v19 = vld [vmem:[#allocation44_spill] sm:$0xff] }
 0x352   : > { %3634 = vmatmul.f32.gmra.mxu2 %v11574_v5  ;;  %3657 = vmatmul.f32.vlgmr.msrb.gmra.mxu3 %v11551_v42 }
 0x353   : > { %3911 = vmatpush.msrb.mxu3 %v3528_v41 }
 0x355   : > { %3917 = vmatpush.msrb.mxu3 %v3534_v6  ;;  %3698 = vmatmul.f32.gmra.mxu0 %v11608_v46 }
 0x356   : > { %3729 = vmatmul.f32.vlgmr.msra.gmra.mxu1 %v11551_v42 }
 0x357   : > { %3973 = vmatpush.msra.mxu1 %v12146_v38 }
 0x359   : > { %3975 = vmatpush.msra.mxu1 %v12143_v14 }
 0x35a   : > { %3759 = vmatmul.f32.vlgmr.msra.gmra.mxu2 %v11565_v52  ;;  %3661 = vmatmul.f32.gmra.mxu3 %v11574_v5 }
 0x35b   : > { %4006 = vmatpush.msra.mxu2 %v3526_v12 }
 0x35d   : > { %4010 = vmatpush.msra.mxu2 %v3532_v16  ;;  %3822 = vmatmul.f32.vlgmr.msrb.gmra.mxu0 %v11551_v42  ;;  %v13714_v16 = vld [vmem:[#allocation41_spill] sm:$0xff] }
 0x35e   : > { %3733 = vmatmul.f32.gmra.mxu1 %v11574_v5  ;;  %4071 = vmatpush.msrb.mxu0 %v13686_v36 }
 0x360   : > { %4073 = vmatpush.msrb.mxu0 %v13687_v22 }
 0x362   : > { %3764 = vmatmul.f32.gmra.mxu2 %v11584_v21  ;;  %3789 = vmatmul.f32.vlgmr.msra.gmra.mxu3 %v11571_v62 }
 0x363   : > { %4035 = vmatpush.msra.mxu3 %v12146_v38  ;;  %v13712_v38 = vld [vmem:[#allocation45_spill] sm:$0xff] }
 0x365   : > { %4037 = vmatpush.msra.mxu3 %v12143_v14  ;;  %3826 = vmatmul.f32.gmra.mxu0 %v11574_v5  ;;  %v13707_v14 = vld [vmem:[#allocation32_spill] sm:$0xff] }
 0x366   : > { %3849 = vmatmul.f32.vlgmr.msrb.gmra.mxu1 %v11551_v42 }
 0x367   : > { %4110 = vmatpush.msrb.mxu1 %v13688_v57  ;;  %v4075_v57 = vsub.f32 %v4051_v23, %v12205_v35 }
 0x369   : > { %4116 = vmatpush.msrb.mxu1 %v13702_v20  ;;  %v4076_v60 = vand.u32 4294901760, %v4075_v57 }
 0x36a   : > { %3880 = vmatmul.f32.vlgmr.msrb.gmra.mxu2 %v11528_v26  ;;  %3795 = vmatmul.f32.gmra.mxu3 %v11597_v37 }
 0x36b   : > { %4142 = vmatpush.msrb.mxu2 %v13703_v40  ;;  %v4077_v8 = vsub.f32 %v4075_v57, %v4076_v60 }
 0x36d   : > { %4145 = vmatpush.msrb.mxu2 %v13704_v29  ;;  %3949 = vmatmul.f32.vlgmr.msra.gmra.mxu0 %v11508_v58  ;;  %v4078_v49 = vand.u32 4294901760, %v4077_v8 }
 0x36e   : > { %3853 = vmatmul.f32.gmra.mxu1 %v11574_v5  ;;  %4205 = vmatpush.msra.mxu0 %v13705_v25 }
 0x370   : > { %4209 = vmatpush.msra.mxu0 %v13706_v59 }
 0x372   : > { %3888 = vmatmul.f32.gmra.mxu2 %v11562_v51  ;;  %3919 = vmatmul.f32.vlgmr.msrb.gmra.mxu3 %v11505_v50 }
 0x373   : > { %4172 = vmatpush.msrb.mxu3 %v13686_v36 }
 0x375   : > { %4174 = vmatpush.msrb.mxu3 %v13687_v22  ;;  %3954 = vmatmul.f32.gmra.mxu0 %v11521_v10 }
 0x376   : > { %3979 = vmatmul.f32.vlgmr.msra.gmra.mxu1 %v11512_v63 }
 0x377   : > { %4234 = vmatpush.msra.mxu1 %v13686_v36  ;;  %v13710_v36 = vld [vmem:[#allocation37_spill] sm:$0xff] }
 0x379   : > { %4236 = vmatpush.msra.mxu1 %v13687_v22  ;;  %v4086_v22 = vand.u32 4294901760, %v4085_v32 }
 0x37a   : > { %4012 = vmatmul.f32.vlgmr.msra.gmra.mxu2 %v11505_v50  ;;  %3923 = vmatmul.f32.gmra.mxu3 %v11514_v0 }
 0x37b   : > { %4261 = vmatpush.msra.mxu2 %v13707_v14 }
 0x37d   : > { %4263 = vmatpush.msra.mxu2 %v13708_v55  ;;  %4079 = vmatmul.f32.vlgmr.msrb.gmra.mxu0 %v4078_v49 }
 0x37e   : > { %3985 = vmatmul.f32.gmra.mxu1 %v11531_v27  ;;  %4332 = vmatpush.msrb.mxu0 %v13709_v54 }
 0x380   : > { %4335 = vmatpush.msrb.mxu0 %v13710_v36 }
 0x382   : > { %4016 = vmatmul.f32.gmra.mxu2 %v11514_v0  ;;  %4039 = vmatmul.f32.vlgmr.msra.gmra.mxu3 %v11505_v50 }
 0x383   : > { %4300 = vmatpush.msra.mxu3 %v13711_v19 }
 0x385   : > { %4306 = vmatpush.msra.mxu3 %v13712_v38  ;;  %4087 = vmatmul.f32.gmra.mxu0 %v4086_v22 }
 0x386   : > { %4118 = vmatmul.f32.vlgmr.msrb.gmra.mxu1 %v12205_v35 }
 0x387   : > { %4362 = vmatpush.msrb.mxu1 %v13707_v14 }
 0x389   : > { %4364 = vmatpush.msrb.mxu1 %v13708_v55 }
 0x38a   : > { %4148 = vmatmul.f32.vlgmr.msrb.gmra.mxu2 %v4075_v57  ;;  %4043 = vmatmul.f32.gmra.mxu3 %v11514_v0 }
 0x38b   : > { %4395 = vmatpush.msrb.mxu2 %v13713_v11 }
 0x38d   : > { %4399 = vmatpush.msrb.mxu2 %v13714_v16  ;;  %4211 = vmatmul.f32.vlgmr.msra.gmra.mxu0 %v12205_v35 }
 0x38e   : > { %4122 = vmatmul.f32.gmra.mxu1 %v12217_v1 }
 0x392   : > { %4153 = vmatmul.f32.gmra.mxu2 %v4083_v24  ;;  %4178 = vmatmul.f32.vlgmr.msrb.gmra.mxu3 %v4076_v60 }
 0x393   : > { %4424 = vmatpush.msrb.mxu3 %v13707_v14 }
 0x395   : > { %4426 = vmatpush.msrb.mxu3 %v13708_v55  ;;  %4215 = vmatmul.f32.gmra.mxu0 %v12217_v1 }
 0x396   : > { %4238 = vmatmul.f32.vlgmr.msra.gmra.mxu1 %v12205_v35 }
 0x39a   : > { %4269 = vmatmul.f32.vlgmr.msra.gmra.mxu2 %v4078_v49  ;;  %4184 = vmatmul.f32.gmra.mxu3 %v4084_v9  ;;  %v3309_v12 = vpop.f32.mrf.mxu0 }
 0x39d   : > { %4338 = vmatmul.f32.vlgmr.msrb.gmra.mxu0 %v4075_v57 }
 0x39e   : > { %4242 = vmatmul.f32.gmra.mxu1 %v12217_v1 }
 0x3a2   : > { %4277 = vmatmul.f32.gmra.mxu2 %v4086_v22  ;;  %4308 = vmatmul.f32.vlgmr.msra.gmra.mxu3 %v12205_v35  ;;  %v3348_v13 = vpop.f32.mrf.mxu1  ;;  %v3317_v43 = vpop.f32.mrf.mxu0 }
 0x3a3   : > { %v3378_v41 = vpop.f32.mrf.mxu2  ;;  %v3408_v40 = vpop.f32.mrf.mxu3  ;;  %v3349_v49 = vadd.f32 %v3348_v13, %v3309_v12 }
 0x3a5   : > { %4343 = vmatmul.f32.gmra.mxu0 %v4083_v24 }
 0x3a6   : > { %4368 = vmatmul.f32.vlgmr.msrb.gmra.mxu1 %v4076_v60 }
 0x3aa   : > { %4401 = vmatmul.f32.vlgmr.msrb.gmra.mxu2 %v12205_v35  ;;  %4312 = vmatmul.f32.gmra.mxu3 %v12217_v1  ;;  %v3352_v6 = vpop.f32.mrf.mxu1  ;;  %v3441_v56 = vpop.f32.mrf.mxu0 }
 0x3ab   : > { %v3383_v23 = vpop.f32.mrf.mxu2  ;;  %v3414_v25 = vpop.f32.mrf.mxu3 }
 0x3ae   : > { %4374 = vmatmul.f32.gmra.mxu1 %v4084_v9  ;;  %v3379_v9 = vadd.f32 %v3378_v41, %v3349_v49  ;;  %v5329_v49 = vstv %s12258_s25  ;;  %s12509_s25 = sld [smem:[#allocation2 + $0x206]] }
 0x3b0   : > { %v3409_v36 = vadd.f32 %v3408_v40, %v3379_v9  ;;  %v5491_v9 = vstv %s12264_s22  ;;  %s12515_s22 = sld [smem:[#allocation2 + $0x386]] }
 0x3b2   : > { %4405 = vmatmul.f32.gmra.mxu2 %v12217_v1  ;;  %4428 = vmatmul.f32.vlgmr.msrb.gmra.mxu3 %v12205_v35  ;;  %v3468_v20 = vpop.f32.mrf.mxu1  ;;  %v3445_v29 = vpop.f32.mrf.mxu0  ;;  %v3442_v38 = vadd.f32 %v3441_v56, %v3409_v36 }
 0x3b4   : > { %v3469_v40 = vadd.f32 %v3468_v20, %v3442_v38 }
 0x3ba   : > { %4432 = vmatmul.f32.gmra.mxu3 %v12217_v1  ;;  %v3568_v57 = vpop.f32.mrf.mxu0  ;;  %v3353_v1 = vadd.f32 %v3352_v6, %v3317_v43 }
 0x3bb   : > { %v3472_v47 = vpop.f32.mrf.mxu1 }
 0x3bc   : > { %v3499_v3 = vpop.f32.mrf.mxu2  ;;  %v3384_v19 = vadd.f32 %v3383_v23, %v3353_v1  ;;  %v5383_v23 = vstv %s12260_s28  ;;  %s12511_s28 = sld [smem:[#allocation2 + $0x286]] }
 0x3c2   : > { %v3573_v60 = vpop.f32.mrf.mxu0 }
 0x3c3   : > { %v3598_v59 = vpop.f32.mrf.mxu1 }
 0x3c5   : > { %v3507_v8 = vpop.f32.mrf.mxu2  ;;  %v3538_v24 = vpop.f32.mrf.mxu3 }
 0x3c6   : > { %v3539_v14 = vadd.f32 %v3538_v24, %v3499_v3 }
 0x3c8   : > { %v3569_v22 = vadd.f32 %v3568_v57, %v3539_v14  ;;  %v3415_v57 = vadd.f32 %v3414_v25, %v3384_v19  ;;  %v5599_v19 = vstv %s12268_s15  ;;  %s10499_s15 = sld [smem:[#allocation2 + $0x1]] }
 0x3ca   : > { %v12256_v32 = vpop.f32.mrf.mxu0  ;;  %v3599_v11 = vadd.f32 %v3598_v59, %v3569_v22  ;;  %v5437_v59 = vstv %s12262_s6  ;;  %v3446_v14 = vadd.f32 %v3445_v29, %v3415_v57  ;;  %s12513_s6 = sld [smem:[#allocation2 + $0x306]] }
 0x3cb   : > { %v3604_v55 = vpop.f32.mrf.mxu1 }
 0x3cc   : > { %v3473_v57 = vadd.f32 %v3472_v47, %v3446_v14 }
 0x3cd   : > { %v3631_v35 = vpop.f32.mrf.mxu2  ;;  %v3542_v54 = vpop.f32.mrf.mxu3 }
 0x3ce   : > { %v3543_v16 = vadd.f32 %v3542_v54, %v3507_v8  ;;  %v3632_v43 = vadd.f32 %v3631_v35, %v3599_v11  ;;  %v5545_v8 = vstv %s12266_s26  ;;  %s12572_s26 = sld [smem:[#allocation2]] }
 0x3d0   : > { %v3574_v3 = vadd.f32 %v3573_v60, %v3543_v16 }
 0x3d2   : > { %v3699_v13 = vpop.f32.mrf.mxu0  ;;  %v3605_v54 = vadd.f32 %v3604_v55, %v3574_v3 }
 0x3d3   : > { %v3730_v12 = vpop.f32.mrf.mxu1 }
 0x3d5   : > { %v3635_v41 = vpop.f32.mrf.mxu2  ;;  %v3658_v6 = vpop.f32.mrf.mxu3 }
 0x3d6   : > { %v3659_v24 = vadd.f32 %v3658_v6, %v3632_v43  ;;  %v3636_v38 = vadd.f32 %v3635_v41, %v3605_v54 }
 0x3d8   : > { %v12272_v56 = vsub.f32 %v3469_v40, %v3659_v24 }
 0x3da   : > { %v5330_v36 = vmul.f32 %v5329_v49, %v12272_v56  ;;  %v5384_v35 = vmul.f32 %v5383_v23, %v12272_v56  ;;  %v3823_v22 = vpop.f32.mrf.mxu0  ;;  %v5438_v20 = vmul.f32 %v5437_v59, %v12272_v56  ;;  %v5492_v25 = vmul.f32 %v5491_v9, %v12272_v56 }
 0x3db   : > { %v3734_v1 = vpop.f32.mrf.mxu1  ;;  %v5546_v60 = vmul.f32 %v5545_v8, %v12272_v56  ;;  %v5600_v41 = vmul.f32 %v5599_v19, %v12272_v56 }
 0x3dc   : > { %v12284_v16 = vadd.f32 %v5330_v36, %v12061_v17  ;;  %v12287_v29 = vadd.f32 %v5384_v35, %v12064_v28  ;;  %v12290_v43 = vadd.f32 %v5438_v20, %v12067_v30  ;;  %v12293_v6 = vadd.f32 %v5492_v25, %v12070_v61 }
 0x3dd   : > { %v3760_v11 = vpop.f32.mrf.mxu2  ;;  %v3662_v55 = vpop.f32.mrf.mxu3  ;;  %v12296_v40 = vadd.f32 %v5546_v60, %v12073_v34  ;;  %v12302_v17 = vadd.f32 %v5600_v41, %v12076_v39 }
 0x3de   : > { %v3663_v3 = vadd.f32 %v3662_v55, %v3636_v38 }
 0x3e0   : > { %v12299_v24 = vsub.f32 %v3473_v57, %v3663_v3  ;;  %v3735_v57 = vadd.f32 %v3734_v1, %v3699_v13 }
 0x3e2   : > { %v5331_v54 = vmul.f32 %v5329_v49, %v12299_v24  ;;  %v5385_v30 = vmul.f32 %v5383_v23, %v12299_v24  ;;  %v3827_v36 = vpop.f32.mrf.mxu0  ;;  %v5439_v61 = vmul.f32 %v5437_v59, %v12299_v24  ;;  %v5493_v34 = vmul.f32 %v5491_v9, %v12299_v24 }
 0x3e3   : > { %v3850_v28 = vpop.f32.mrf.mxu1  ;;  %v5547_v47 = vmul.f32 %v5545_v8, %v12299_v24  ;;  %v5601_v14 = vmul.f32 %v5599_v19, %v12299_v24  ;;  %v3731_v8 = vadd.f32 %v3730_v12, %v12256_v32 }
 0x3e4   : > { %v12311_v20 = vadd.f32 %v5331_v54, %v12087_v53  ;;  %v12314_v39 = vadd.f32 %v5385_v30, %v12090_v4  ;;  %v12317_v49 = vadd.f32 %v5439_v61, %v12093_v7  ;;  %v12320_v23 = vadd.f32 %v5493_v34, %v12096_v15 }
 0x3e5   : > { %v3765_v35 = vpop.f32.mrf.mxu2  ;;  %v3790_v25 = vpop.f32.mrf.mxu3  ;;  %v12323_v59 = vadd.f32 %v5547_v47, %v12099_v45  ;;  %v12326_v9 = vadd.f32 %v5601_v14, %v12102_v44  ;;  %v3761_v19 = vadd.f32 %v3760_v11, %v3731_v8 }
 0x3e6   : > { %v3766_v41 = vadd.f32 %v3765_v35, %v3735_v57  ;;  %v5497_v57 = vstv %s12335_s23  ;;  %s12583_s23 = sld [smem:[#allocation2 + $0x82]] }
 0x3e7   : > { %v3791_v55 = vadd.f32 %v3790_v25, %v3761_v19 }
 0x3e9   : > { %v3824_v7 = vadd.f32 %v3823_v22, %v3791_v55  ;;  %v5443_v55 = vstv %s12333_s16  ;;  %s12581_s16 = sld [smem:[#allocation2 + $0x2]] }
 0x3ea   : > { %v3950_v60 = vpop.f32.mrf.mxu0 }
 0x3eb   : > { %v3854_v53 = vpop.f32.mrf.mxu1  ;;  %v3851_v45 = vadd.f32 %v3850_v28, %v3824_v7 }
 0x3ed   : > { %v3881_v4 = vpop.f32.mrf.mxu2  ;;  %v3796_v38 = vpop.f32.mrf.mxu3 }
 0x3ee   : > { %v3797_v61 = vadd.f32 %v3796_v38, %v3766_v41  ;;  %v3882_v34 = vadd.f32 %v3881_v4, %v3851_v45  ;;  %v5335_v4 = vstv %s12329_s29  ;;  %v5389_v38 = vstv %s12331_s21  ;;  %s12577_s29 = sld [smem:[#allocation2 + $0x81]] }
 0x3ef   : > { %s12579_s21 = sld [smem:[#allocation2 + $0x80]] }
 0x3f0   : > { %v3828_v44 = vadd.f32 %v3827_v36, %v3797_v61 }
 0x3f2   : > { %v3955_v30 = vpop.f32.mrf.mxu0  ;;  %v3855_v22 = vadd.f32 %v3854_v53, %v3828_v44  ;;  %v5551_v53 = vstv %s12337_s13  ;;  %s12585_s13 = sld [smem:[#allocation2 + $0x3]] }
 0x3f3   : > { %v3980_v3 = vpop.f32.mrf.mxu1 }
 0x3f5   : > { %v3889_v15 = vpop.f32.mrf.mxu2  ;;  %v3920_v54 = vpop.f32.mrf.mxu3 }
 0x3f6   : > { %v3921_v32 = vadd.f32 %v3920_v54, %v3882_v34  ;;  %v3890_v36 = vadd.f32 %v3889_v15, %v3855_v22 }
 0x3f8   : > { %v3951_v11 = vadd.f32 %v3950_v60, %v3921_v32  ;;  %v5605_v60 = vstv %s12339_s27  ;;  %s12588_s27 = sld [smem:[#allocation2 + $0x83]] }
 0x3fa   : > { %v4080_v28 = vpop.f32.mrf.mxu0  ;;  %v3981_v47 = vadd.f32 %v3980_v3, %v3951_v11 }
 0x3fb   : > { %v3986_v12 = vpop.f32.mrf.mxu1 }
 0x3fd   : > { %v4013_v13 = vpop.f32.mrf.mxu2  ;;  %v3924_v1 = vpop.f32.mrf.mxu3 }
 0x3fe   : > { %v3925_v14 = vadd.f32 %v3924_v1, %v3890_v36  ;;  %v4014_v25 = vadd.f32 %v4013_v13, %v3981_v47 }
 0x400   : > { %v3956_v7 = vadd.f32 %v3955_v30, %v3925_v14 }
 0x402   : > { %v4088_v15 = vpop.f32.mrf.mxu0  ;;  %v3987_v32 = vadd.f32 %v3986_v12, %v3956_v7 }
 0x403   : > { %v4119_v35 = vpop.f32.mrf.mxu1 }
 0x405   : > { %v4017_v8 = vpop.f32.mrf.mxu2  ;;  %v4040_v19 = vpop.f32.mrf.mxu3 }
 0x406   : > { %v12345_v41 = vadd.f32 %v4040_v19, %v4014_v25  ;;  %v4018_v47 = vadd.f32 %v4017_v8, %v3987_v32 }
 0x408   : > { %v5336_v54 = vmul.f32 %v5335_v4, %v12345_v41  ;;  %v5390_v45 = vmul.f32 %v5389_v38, %v12345_v41  ;;  %v5444_v3 = vmul.f32 %v5443_v55, %v12345_v41  ;;  %v5498_v61 = vmul.f32 %v5497_v57, %v12345_v41 }
 0x409   : > { %v5552_v34 = vmul.f32 %v5551_v53, %v12345_v41  ;;  %v5606_v44 = vmul.f32 %v5605_v60, %v12345_v41 }
 0x40a   : > { %v12356_v30 = vadd.f32 %v5336_v54, %v12284_v16  ;;  %v12359_v13 = vadd.f32 %v5390_v45, %v12287_v29  ;;  %v12362_v22 = vadd.f32 %v5444_v3, %v12290_v43  ;;  %v12365_v11 = vadd.f32 %v5498_v61, %v12293_v6  ;;  %v4212_v45 = vpop.f32.mrf.mxu0 }
 0x40b   : > { %v4123_v1 = vpop.f32.mrf.mxu1  ;;  %v12368_v36 = vadd.f32 %v5552_v34, %v12296_v40  ;;  %v12371_v12 = vadd.f32 %v5606_v44, %v12302_v17  ;;  %v4120_v29 = vadd.f32 %v4119_v35, %v4080_v28 }
 0x40d   : > { %v4149_v14 = vpop.f32.mrf.mxu2  ;;  %v4044_v16 = vpop.f32.mrf.mxu3 }
 0x40e   : > { %v12373_v25 = vadd.f32 %v4044_v16, %v4018_v47 }
 0x410   : > { %v5337_v19 = vmul.f32 %v5335_v4, %v12373_v25  ;;  %v5391_v43 = vmul.f32 %v5389_v38, %v12373_v25  ;;  %v5445_v7 = vmul.f32 %v5443_v55, %v12373_v25  ;;  %v5499_v6 = vmul.f32 %v5497_v57, %v12373_v25 }
 0x411   : > { %v5553_v40 = vmul.f32 %v5551_v53, %v12373_v25  ;;  %v5607_v8 = vmul.f32 %v5605_v60, %v12373_v25  ;;  %v4150_v55 = vadd.f32 %v4149_v14, %v4120_v29 }
 0x412   : > { %v12382_v54 = vadd.f32 %v5337_v19, %v12311_v20  ;;  %v12385_v17 = vadd.f32 %v5391_v43, %v12314_v39  ;;  %v12388_v28 = vadd.f32 %v5445_v7, %v12317_v49  ;;  %v12391_v35 = vadd.f32 %v5499_v6, %v12320_v23  ;;  %v4216_v32 = vpop.f32.mrf.mxu0 }
 0x413   : > { %v12394_v4 = vadd.f32 %v5553_v40, %v12323_v59  ;;  %v12397_v38 = vadd.f32 %v5607_v8, %v12326_v9  ;;  %v4239_v53 = vpop.f32.mrf.mxu1  ;;  %v4124_v39 = vadd.f32 %v4123_v1, %v4088_v15 }
 0x415   : > { %v4154_v57 = vpop.f32.mrf.mxu2  ;;  %v4179_v20 = vpop.f32.mrf.mxu3 }
 0x416   : > { %v4180_v60 = vadd.f32 %v4179_v20, %v4150_v55  ;;  %v4155_v34 = vadd.f32 %v4154_v57, %v4124_v39 }
 0x418   : > { %v4213_v3 = vadd.f32 %v4212_v45, %v4180_v60 }
 0x41a   : > { %v4240_v61 = vadd.f32 %v4239_v53, %v4213_v3  ;;  %v4339_v6 = vpop.f32.mrf.mxu0 }
 0x41b   : > { %v4243_v59 = vpop.f32.mrf.mxu1 }
 0x41c   : > { %v12399_v23 = vand.u32 4294901760, %v4240_v61 }
 0x41d   : > { %v4270_v49 = vpop.f32.mrf.mxu2  ;;  %v4185_v44 = vpop.f32.mrf.mxu3 }
 0x41e   : > { %v4186_v47 = vadd.f32 %v4185_v44, %v4155_v34  ;;  %v12402_v9 = vsub.f32 %v4240_v61, %v12399_v23 }
 0x420   : > { %v4217_v16 = vadd.f32 %v4216_v32, %v4186_v47  ;;  %v12412_v1 = vand.u32 4294901760, %v12402_v9 }
 0x422   : > { %v4244_v14 = vadd.f32 %v4243_v59, %v4217_v16  ;;  %v4494_v8 = vsub.f32 %v12402_v9, %v12412_v1  ;;  %v4344_v34 = vpop.f32.mrf.mxu0 }
 0x423   : > { %v4369_v57 = vpop.f32.mrf.mxu1 }
 0x424   : > { %v12404_v29 = vand.u32 4294901760, %v4244_v14  ;;  %v4495_v53 = vand.u32 4294901760, %v4494_v8 }
 0x425   : > { %v4278_v19 = vpop.f32.mrf.mxu2  ;;  %v4309_v43 = vpop.f32.mrf.mxu3 }
 0x426   : > { %v12407_v15 = vsub.f32 %v4244_v14, %v12404_v29  ;;  %4451 = vmatpush.msra.mxu0 %v12404_v29  ;;  %4552 = vmatpush.msra.mxu3 %v12404_v29  ;;  %v4310_v45 = vadd.f32 %v4309_v43, %v4270_v49 }
 0x428   : > { %4453 = vmatpush.msra.mxu0 %v12399_v23  ;;  %4522 = vmatpush.msra.mxu2 %v12407_v15  ;;  %v12417_v7 = vand.u32 4294901760, %v12407_v15  ;;  %v4340_v60 = vadd.f32 %v4339_v6, %v4310_v45 }
 0x429   : > { %4554 = vmatpush.msra.mxu3 %v12399_v23  ;;  %4459 = vmatmul.f32.vlgmr.msra.gmra.mxu0 %v11528_v26 }
 0x42a   : > { %4525 = vmatpush.msra.mxu2 %v12402_v9  ;;  %4585 = vmatpush.msrb.mxu0 %v12417_v7  ;;  %v4488_v40 = vsub.f32 %v12407_v15, %v12417_v7  ;;  %v4370_v61 = vadd.f32 %v4369_v57, %v4340_v60 }
 0x42b   : > { %4528 = vmatmul.f32.vlgmr.msra.gmra.mxu2 %v11508_v58  ;;  %4558 = vmatmul.f32.vlgmr.msra.gmra.mxu3 %v11512_v63  ;;  %v4375_v47 = vpop.f32.mrf.mxu1 }
 0x42c   : > { %4589 = vmatpush.msrb.mxu0 %v12412_v1  ;;  %v4489_v55 = vand.u32 4294901760, %v4488_v40 }
 0x42d   : > { %v4313_v20 = vpop.f32.mrf.mxu3  ;;  %v4402_v39 = vpop.f32.mrf.mxu2 }
 0x42e   : > { %4490 = vmatpush.msra.mxu1 %v4489_v55  ;;  %v4314_v3 = vadd.f32 %v4313_v20, %v4278_v19  ;;  %v4403_v49 = vadd.f32 %v4402_v39, %v4370_v61 }
 0x430   : > { %4496 = vmatpush.msra.mxu1 %v4495_v53  ;;  %v4345_v32 = vadd.f32 %v4344_v34, %v4314_v3 }
 0x431   : > { %4467 = vmatmul.f32.gmra.mxu0 %v11562_v51  ;;  %4498 = vmatmul.f32.vlgmr.msra.gmra.mxu1 %v11505_v50 }
 0x432   : > { %4614 = vmatpush.msrb.mxu1 %v12404_v29  ;;  %v4376_v14 = vadd.f32 %v4375_v47, %v4345_v32 }
 0x433   : > { %4533 = vmatmul.f32.gmra.mxu2 %v11521_v10  ;;  %4564 = vmatmul.f32.gmra.mxu3 %v11531_v27 }
 0x434   : > { %4616 = vmatpush.msrb.mxu1 %v12399_v23 }
 0x435   : > { %v4429_v44 = vpop.f32.mrf.mxu3  ;;  %v4406_v16 = vpop.f32.mrf.mxu2 }
 0x436   : > { %v4430_v59 = vadd.f32 %v4429_v44, %v4403_v49  ;;  %v4407_v43 = vadd.f32 %v4406_v16, %v4376_v14 }
 0x438   : > { %v12438_v19 = vand.u32 4294901760, %v4430_v59 }
 0x439   : > { %4502 = vmatmul.f32.gmra.mxu1 %v11514_v0  ;;  %4591 = vmatmul.f32.vlgmr.msrb.gmra.mxu0 %v11505_v50 }
 0x43a   : > { %v4682_v8 = vsub.f32 %v4430_v59, %v12438_v19 }
 0x43c   : > { %v4683_v20 = vand.u32 4294901760, %v4682_v8 }
 0x43d   : > { %v4433_v6 = vpop.f32.mrf.mxu3 }
 0x43e   : > { %v4434_v40 = vadd.f32 %v4433_v6, %v4407_v43  ;;  %v4684_v3 = vsub.f32 %v4682_v8, %v4683_v20 }
 0x440   : > { %v12441_v45 = vand.u32 4294901760, %v4434_v40  ;;  %v4685_v34 = vand.u32 4294901760, %v4684_v3  ;;  %v5395_v3 = vstv %s12507_s0  ;;  %s12595_s0 = sld [smem:[#allocation2 + $0x84]] }
 0x441   : > { %4595 = vmatmul.f32.gmra.mxu0 %v11514_v0  ;;  %4618 = vmatmul.f32.vlgmr.msrb.gmra.mxu1 %v11505_v50 }
 0x442   : > { %v4676_v57 = vsub.f32 %v4434_v40, %v12441_v45  ;;  %4641 = vmatpush.msrb.mxu2 %v12441_v45  ;;  %4742 = vmatpush.msra.mxu1 %v12441_v45 }
 0x444   : > { %4643 = vmatpush.msrb.mxu2 %v12438_v19  ;;  %4712 = vmatpush.msra.mxu0 %v4676_v57  ;;  %v4677_v60 = vand.u32 4294901760, %v4676_v57 }
 0x445   : > { %4744 = vmatpush.msra.mxu1 %v12438_v19  ;;  %4649 = vmatmul.f32.vlgmr.msrb.gmra.mxu2 %v11591_v33 }
 0x446   : > { %4715 = vmatpush.msra.mxu0 %v4682_v8  ;;  %v4678_v39 = vsub.f32 %v4676_v57, %v4677_v60  ;;  %4775 = vmatpush.msra.mxu2 %v4677_v60 }
 0x447   : > { %4872 = vmatpush.msrb.mxu1 %v4489_v55 }
 0x448   : > { %4833 = vmatpush.msrb.mxu0 %v12404_v29  ;;  %v4679_v61 = vand.u32 4294901760, %v4678_v39  ;;  %4779 = vmatpush.msra.mxu2 %v4683_v20  ;;  %v5341_v39 = vstv %s12505_s12  ;;  %s12591_s12 = sld [smem:[#allocation2 + $0x4]] }
 0x449   : > { %4878 = vmatpush.msrb.mxu1 %v4495_v53  ;;  %4718 = vmatmul.f32.vlgmr.msra.gmra.mxu0 %v11565_v52 }
 0x44a   : > { %4622 = vmatmul.f32.gmra.mxu1 %v11514_v0  ;;  %4904 = vmatpush.msrb.mxu2 %v12407_v15 }
 0x44b   : > { %4835 = vmatpush.msrb.mxu0 %v12399_v23  ;;  %4680 = vmatpush.msrb.mxu3 %v4679_v61 }
 0x44c   : > { %4907 = vmatpush.msrb.mxu2 %v12402_v9 }
 0x44d   : > { %4967 = vmatpush.msra.mxu0 %v12417_v7  ;;  %4686 = vmatpush.msrb.mxu3 %v4685_v34 }
 0x44e   : > { %4657 = vmatmul.f32.gmra.mxu2 %v11608_v46  ;;  %4688 = vmatmul.f32.vlgmr.msrb.gmra.mxu3 %v11551_v42 }
 0x44f   : > { %4971 = vmatpush.msra.mxu0 %v12412_v1  ;;  %4804 = vmatpush.msra.mxu3 %v12441_v45 }
 0x451   : > { %4806 = vmatpush.msra.mxu3 %v12438_v19  ;;  %4723 = vmatmul.f32.gmra.mxu0 %v11584_v21 }
 0x452   : > { %4748 = vmatmul.f32.vlgmr.msra.gmra.mxu1 %v11571_v62 }
 0x453   : > { %4934 = vmatpush.msrb.mxu3 %v12404_v29  ;;  %4996 = vmatpush.msra.mxu1 %v12404_v29 }
 0x455   : > { %4936 = vmatpush.msrb.mxu3 %v12399_v23  ;;  %4998 = vmatpush.msra.mxu1 %v12399_v23 }
 0x456   : > { %4781 = vmatmul.f32.vlgmr.msra.gmra.mxu2 %v11551_v42  ;;  %4692 = vmatmul.f32.gmra.mxu3 %v11574_v5 }
 0x457   : > { %5023 = vmatpush.msra.mxu2 %v12441_v45 }
 0x459   : > { %5025 = vmatpush.msra.mxu2 %v12438_v19  ;;  %4841 = vmatmul.f32.vlgmr.msrb.gmra.mxu0 %v11591_v33 }
 0x45a   : > { %4754 = vmatmul.f32.gmra.mxu1 %v11597_v37  ;;  %5094 = vmatpush.msrb.mxu0 %v4676_v57 }
 0x45c   : > { %5097 = vmatpush.msrb.mxu0 %v4682_v8 }
 0x45e   : > { %4785 = vmatmul.f32.gmra.mxu2 %v11574_v5  ;;  %4808 = vmatmul.f32.vlgmr.msra.gmra.mxu3 %v11551_v42 }
 0x45f   : > { %5062 = vmatpush.msra.mxu3 %v4679_v61 }
 0x461   : > { %5068 = vmatpush.msra.mxu3 %v4685_v34  ;;  %4849 = vmatmul.f32.gmra.mxu0 %v11608_v46  ;;  %v5449_v34 = vstv %s12509_s25  ;;  %s12601_s25 = sld [smem:[#allocation2 + $0x5]] }
 0x462   : > { %4880 = vmatmul.f32.vlgmr.msrb.gmra.mxu1 %v11551_v42 }
 0x463   : > { %5124 = vmatpush.msrb.mxu1 %v12441_v45 }
 0x465   : > { %5126 = vmatpush.msrb.mxu1 %v12438_v19 }
 0x466   : > { %4910 = vmatmul.f32.vlgmr.msrb.gmra.mxu2 %v11565_v52  ;;  %4812 = vmatmul.f32.gmra.mxu3 %v11574_v5 }
 0x467   : > { %5157 = vmatpush.msrb.mxu2 %v4677_v60 }
 0x469   : > { %5161 = vmatpush.msrb.mxu2 %v4683_v20  ;;  %4973 = vmatmul.f32.vlgmr.msra.gmra.mxu0 %v11551_v42 }
 0x46a   : > { %4884 = vmatmul.f32.gmra.mxu1 %v11574_v5 }
 0x46e   : > { %4915 = vmatmul.f32.gmra.mxu2 %v11584_v21  ;;  %4940 = vmatmul.f32.vlgmr.msrb.gmra.mxu3 %v11571_v62 }
 0x46f   : > { %5186 = vmatpush.msrb.mxu3 %v12441_v45 }
 0x471   : > { %5188 = vmatpush.msrb.mxu3 %v12438_v19  ;;  %4977 = vmatmul.f32.gmra.mxu0 %v11574_v5 }
 0x472   : > { %5000 = vmatmul.f32.vlgmr.msra.gmra.mxu1 %v11551_v42 }
 0x476   : > { %5031 = vmatmul.f32.vlgmr.msra.gmra.mxu2 %v11528_v26  ;;  %4946 = vmatmul.f32.gmra.mxu3 %v11597_v37 }
 0x479   : > { %5100 = vmatmul.f32.vlgmr.msrb.gmra.mxu0 %v11508_v58 }
 0x47a   : > { %5004 = vmatmul.f32.gmra.mxu1 %v11574_v5 }
 0x47e   : > { %5039 = vmatmul.f32.gmra.mxu2 %v11562_v51  ;;  %5070 = vmatmul.f32.vlgmr.msra.gmra.mxu3 %v11505_v50 }
 0x481   : > { %5105 = vmatmul.f32.gmra.mxu0 %v11521_v10 }
 0x482   : > { %5130 = vmatmul.f32.vlgmr.msrb.gmra.mxu1 %v11512_v63 }
 0x486   : > { %5163 = vmatmul.f32.vlgmr.msrb.gmra.mxu2 %v11505_v50  ;;  %5074 = vmatmul.f32.gmra.mxu3 %v11514_v0 }
 0x48a   : > { %5136 = vmatmul.f32.gmra.mxu1 %v11531_v27 }
 0x48e   : > { %5167 = vmatmul.f32.gmra.mxu2 %v11514_v0  ;;  %5190 = vmatmul.f32.vlgmr.msrb.gmra.mxu3 %v11505_v50 }
 0x496   : > { %5194 = vmatmul.f32.gmra.mxu3 %v11514_v0 }
 0x4a6   : > { %v4460_v58 = vpop.f32.mrf.mxu0 }
 0x4ae   : > { %v4499_v26 = vpop.f32.mrf.mxu1  ;;  %v4468_v42 = vpop.f32.mrf.mxu0 }
 0x4af   : > { %v4529_v51 = vpop.f32.mrf.mxu2  ;;  %v4559_v5 = vpop.f32.mrf.mxu3  ;;  %v4500_v50 = vadd.f32 %v4499_v26, %v4460_v58  ;;  %v5503_v58 = vstv %s12511_s28  ;;  %v5557_v26 = vstv %s12513_s6  ;;  %s12604_s28 = sld [smem:[#allocation2 + $0x85]] }
 0x4b0   : > { %s12610_s6 = sld [smem:[#allocation2 + $0x6]] }
 0x4b1   : > { %v4530_v0 = vadd.f32 %v4529_v51, %v4500_v50 }
 0x4b3   : > { %v4560_v44 = vadd.f32 %v4559_v5, %v4530_v0 }
 0x4b6   : > { %v4503_v52 = vpop.f32.mrf.mxu1  ;;  %v4592_v63 = vpop.f32.mrf.mxu0 }
 0x4b7   : > { %v4534_v62 = vpop.f32.mrf.mxu2  ;;  %v4565_v46 = vpop.f32.mrf.mxu3  ;;  %v4504_v49 = vadd.f32 %v4503_v52, %v4468_v42  ;;  %v4593_v16 = vadd.f32 %v4592_v63, %v4560_v44 }
 0x4b9   : > { %v4535_v59 = vadd.f32 %v4534_v62, %v4504_v49 }
 0x4bb   : > { %v4566_v57 = vadd.f32 %v4565_v46, %v4535_v59  ;;  %v5611_v46 = vstv %s12515_s22  ;;  %s12614_s22 = sld [smem:[#allocation2 + $0x86]] }
 0x4be   : > { %v4619_v10 = vpop.f32.mrf.mxu1  ;;  %v4596_v21 = vpop.f32.mrf.mxu0 }
 0x4bf   : > { %v4620_v45 = vadd.f32 %v4619_v10, %v4593_v16  ;;  %v4597_v42 = vadd.f32 %v4596_v21, %v4566_v57  ;;  %v5203_v57 = vstv %s10499_s15  ;;  %s12622_s15 = sld [smem:[#allocation2 + $0x87]] }
 0x4c6   : > { %v4719_v27 = vpop.f32.mrf.mxu0 }
 0x4c7   : > { %v4623_v33 = vpop.f32.mrf.mxu1 }
 0x4c8   : > { %v4650_v37 = vpop.f32.mrf.mxu2 }
 0x4ce   : > { %v4724_v15 = vpop.f32.mrf.mxu0 }
 0x4cf   : > { %v4749_v23 = vpop.f32.mrf.mxu1 }
 0x4d1   : > { %v4658_v9 = vpop.f32.mrf.mxu2  ;;  %v4689_v29 = vpop.f32.mrf.mxu3 }
 0x4d2   : > { %v4690_v1 = vadd.f32 %v4689_v29, %v4650_v37 }
 0x4d4   : > { %v4720_v32 = vadd.f32 %v4719_v27, %v4690_v1  ;;  %v4624_v1 = vadd.f32 %v4623_v33, %v4597_v42  ;;  %v13716_v42 = vld [vmem:[#allocation49_spill] sm:$0xff] }
 0x4d6   : > { %v4842_v47 = vpop.f32.mrf.mxu0  ;;  %v4750_v14 = vadd.f32 %v4749_v23, %v4720_v32 }
 0x4d7   : > { %v4755_v7 = vpop.f32.mrf.mxu1 }
 0x4d9   : > { %v4782_v55 = vpop.f32.mrf.mxu2  ;;  %v4693_v53 = vpop.f32.mrf.mxu3 }
 0x4da   : > { %v4694_v19 = vadd.f32 %v4693_v53, %v4658_v9  ;;  %v4783_v43 = vadd.f32 %v4782_v55, %v4750_v14 }
 0x4dc   : > { %v4725_v20 = vadd.f32 %v4724_v15, %v4694_v19 }
 0x4de   : > { %v4756_v51 = vadd.f32 %v4755_v7, %v4725_v20  ;;  %v4850_v62 = vpop.f32.mrf.mxu0  ;;  %v5257_v20 = vstv %s12577_s29  ;;  %s12626_s29 = sld [smem:[#allocation2 + $0x107]] }
 0x4df   : > { %v4881_v8 = vpop.f32.mrf.mxu1 }
 0x4e1   : > { %v4786_v6 = vpop.f32.mrf.mxu2  ;;  %v4809_v40 = vpop.f32.mrf.mxu3 }
 0x4e2   : > { %v4810_v60 = vadd.f32 %v4809_v40, %v4783_v43  ;;  %v4787_v27 = vadd.f32 %v4786_v6, %v4756_v51  ;;  %v5205_v51 = vmul.f32 %v5203_v57, %v13716_v42 }
 0x4e4   : > { %v12519_v61 = vsub.f32 %v4620_v45, %v4810_v60  ;;  %v5253_v60 = vstv %s12579_s21  ;;  %s12629_s21 = sld [smem:[#allocation6]] }
 0x4e6   : > { %v5342_v52 = vmul.f32 %v5341_v39, %v12519_v61  ;;  %v5396_v63 = vmul.f32 %v5395_v3, %v12519_v61  ;;  %v5450_v10 = vmul.f32 %v5449_v34, %v12519_v61  ;;  %v5504_v5 = vmul.f32 %v5503_v58, %v12519_v61  ;;  %v4974_v14 = vpop.f32.mrf.mxu0 }
 0x4e7   : > { %v5558_v37 = vmul.f32 %v5557_v26, %v12519_v61  ;;  %v5612_v55 = vmul.f32 %v5611_v46, %v12519_v61  ;;  %v4885_v53 = vpop.f32.mrf.mxu1 }
 0x4e8   : > { %v12531_v9 = vadd.f32 %v5342_v52, %v12356_v30  ;;  %v12534_v21 = vadd.f32 %v5396_v63, %v12359_v13  ;;  %v12537_v50 = vadd.f32 %v5450_v10, %v12362_v22  ;;  %v12540_v15 = vadd.f32 %v5504_v5, %v12365_v11 }
 0x4e9   : > { %v4911_v23 = vpop.f32.mrf.mxu2  ;;  %v4813_v29 = vpop.f32.mrf.mxu3  ;;  %v12543_v0 = vadd.f32 %v5558_v37, %v12368_v36  ;;  %v12549_v13 = vadd.f32 %v5612_v55, %v12371_v12  ;;  %v5263_v52 = vstv %s12583_s23  ;;  %s12639_s23 = sld [smem:[#allocation2 + $0x207]] }
 0x4ea   : > { %v4814_v7 = vadd.f32 %v4813_v29, %v4787_v27  ;;  %v5264_v55 = vmul.f32 %v5263_v52, %v11978_v48 }
 0x4ec   : > { %v12546_v30 = vsub.f32 %v4624_v1, %v4814_v7 }
 0x4ee   : > { %v5343_v49 = vmul.f32 %v5341_v39, %v12546_v30  ;;  %v5397_v22 = vmul.f32 %v5395_v3, %v12546_v30  ;;  %v5451_v11 = vmul.f32 %v5449_v34, %v12546_v30  ;;  %v5505_v44 = vmul.f32 %v5503_v58, %v12546_v30  ;;  %v4978_v45 = vpop.f32.mrf.mxu0  ;;  %v13715_v34 = vld [vmem:[#allocation47_spill] sm:$0xff] }
 0x4ef   : > { %v5559_v36 = vmul.f32 %v5557_v26, %v12546_v30  ;;  %v5613_v33 = vmul.f32 %v5611_v46, %v12546_v30  ;;  %v5209_v39 = vstv %s12581_s16  ;;  %v5204_v58 = vmul.f32 %v5203_v57, %v13715_v34  ;;  %v13718_v46 = vld [vmem:[#allocation48_spill] sm:$0xff]  ;;  %s12635_s16 = sld [smem:[#allocation2 + $0x187]] }
 0x4f0   : > { %v12558_v59 = vadd.f32 %v5343_v49, %v12382_v54  ;;  %v12561_v16 = vadd.f32 %v5397_v22, %v12385_v17  ;;  %v12564_v19 = vadd.f32 %v5451_v11, %v12388_v28  ;;  %v12567_v43 = vadd.f32 %v5505_v44, %v12391_v35  ;;  %v5001_v17 = vpop.f32.mrf.mxu1 }
 0x4f1   : > { %v4916_v32 = vpop.f32.mrf.mxu2  ;;  %v4941_v12 = vpop.f32.mrf.mxu3  ;;  %v12570_v6 = vadd.f32 %v5559_v36, %v12394_v4  ;;  %v12575_v40 = vadd.f32 %v5613_v33, %v12397_v38  ;;  %v4882_v54 = vadd.f32 %v4881_v8, %v4842_v47  ;;  %v4886_v47 = vadd.f32 %v4885_v53, %v4850_v62  ;;  %v13717_v62 = vld [vmem:[#allocation46_spill] sm:$0xff] }
 0x4f2   : > { %v5199_v8 = vstv %s12572_s26  ;;  %v5258_v26 = vmul.f32 %v5257_v20, %v13715_v34  ;;  %v5254_v37 = vmul.f32 %v5253_v60, %v13717_v62  ;;  %v5210_v29 = vmul.f32 %v5209_v39, %v11978_v48  ;;  %s12617_s26 = sld [smem:[#allocation2 + $0x7]] }
 0x4f3   : > { %v4912_v28 = vadd.f32 %v4911_v23, %v4882_v54  ;;  %v5200_v10 = vmul.f32 %v5199_v8, %v13717_v62  ;;  %v4917_v5 = vadd.f32 %v4916_v32, %v4886_v47  ;;  %v5201_v27 = vmul.f32 %v5199_v8, %v13718_v46 }
 0x4f4   : > { %v5259_v23 = vmul.f32 %v5257_v20, %v13716_v42  ;;  %v5215_v53 = vstv %s12585_s13  ;;  %v5255_v11 = vmul.f32 %v5253_v60, %v13718_v46  ;;  %v5260_v36 = vadd.f32 %v5258_v26, %v5254_v37  ;;  %s12644_s13 = sld [smem:[#allocation2 + $0x287]] }
 0x4f5   : > { %v4942_v38 = vadd.f32 %v4941_v12, %v4912_v28  ;;  %v5206_v44 = vadd.f32 %v5204_v58, %v5200_v10  ;;  %v5207_v33 = vadd.f32 %v5205_v51, %v5201_v27  ;;  %v5211_v32 = vmul.f32 %v5209_v39, %v12007_v31 }
 0x4f6   : > { %v5265_v12 = vmul.f32 %v5263_v52, %v12007_v31  ;;  %v5261_v54 = vadd.f32 %v5259_v23, %v5255_v11  ;;  %v5216_v28 = vmul.f32 %v5215_v53, %v12050_v2  ;;  %v5266_v57 = vadd.f32 %v5264_v55, %v5260_v36  ;;  %v574_v36 = vld [vmem:[#allocation15] sm:$0xff] }
 0x4f7   : > { %v4975_v3 = vadd.f32 %v4974_v14, %v4942_v38  ;;  %v5269_v14 = vstv %s12588_s27  ;;  %v5101_v38 = vpop.f32.mrf.mxu0  ;;  %v5275_v20 = vstv %s12595_s0  ;;  %v5227_v39 = vstv %s12601_s25  ;;  %s12648_s27 = sld [smem:[#allocation2 + $0x307]] }
 0x4f8   : > { %v5005_v63 = vpop.f32.mrf.mxu1  ;;  %v5270_v31 = vmul.f32 %v5269_v14, %v12050_v2  ;;  %v5271_v60 = vmul.f32 %v5269_v14, %v12078_v18  ;;  %v5267_v34 = vadd.f32 %v5265_v12, %v5261_v54  ;;  %v5281_v26 = vstv %s12604_s28  ;;  %s12738_s0 = sld [smem:[#allocation2 + $0x387]] }
 0x4f9   : > { %v5032_v35 = vpop.f32.mrf.mxu2  ;;  %v4947_v4 = vpop.f32.mrf.mxu3  ;;  %v5002_v49 = vadd.f32 %v5001_v17, %v4975_v3  ;;  %v5212_v17 = vadd.f32 %v5210_v29, %v5206_v44  ;;  %v5213_v3 = vadd.f32 %v5211_v32, %v5207_v33  ;;  %v5276_v42 = vmul.f32 %v5275_v20, %v12272_v56  ;;  %s10523_s25 = sld [smem:[#allocation6 + $0x2]] }
 0x4fa   : > { %v4948_v22 = vadd.f32 %v4947_v4, %v4917_v5  ;;  %v5221_v4 = vstv %s12591_s12  ;;  %v5233_v62 = vstv %s12610_s6  ;;  %v5228_v10 = vmul.f32 %v5227_v39, %v12345_v41  ;;  %s12651_s12 = sld [smem:[#allocation6 + $0x1]]  ;;  %s13160_s6 = scalar_lea.vmem [#allocation21], %s10483_s1 }
 0x4fb   : > { %v5033_v48 = vadd.f32 %v5032_v35, %v5002_v49  ;;  %v5217_v35 = vmul.f32 %v5215_v53, %v12078_v18  ;;  %v5222_v58 = vmul.f32 %v5221_v4, %v12272_v56  ;;  %v5223_v51 = vmul.f32 %v5221_v4, %v12299_v24  ;;  %s10532_s28 = sld [smem:[#allocation6 + $0x3]] }
 0x4fc   : > { %v4979_v47 = vadd.f32 %v4978_v45, %v4948_v22  ;;  %v5218_v45 = vadd.f32 %v5216_v28, %v5212_v17  ;;  %v5277_v18 = vmul.f32 %v5275_v20, %v12299_v24  ;;  %v5272_v46 = vadd.f32 %v5270_v31, %v5266_v57  ;;  %s10541_s1 = sld [smem:[#allocation6 + $0x4]] }
 0x4fd   : > { %v5219_v27 = vadd.f32 %v5217_v35, %v5213_v3  ;;  %v5273_v23 = vadd.f32 %v5271_v60, %v5267_v34  ;;  %v5282_v56 = vmul.f32 %v5281_v26, %v12345_v41  ;;  %v5234_v53 = vmul.f32 %v5233_v62, %v12519_v61 }
 0x4fe   : > { %v5006_v5 = vadd.f32 %v5005_v63, %v4979_v47  ;;  %v5224_v55 = vadd.f32 %v5222_v58, %v5218_v45  ;;  %v5287_v24 = vstv %s12614_s22  ;;  %v5278_v63 = vadd.f32 %v5276_v42, %v5272_v46  ;;  %s10550_s22 = sld [smem:[#allocation6 + $0x5]] }
 0x4ff   : > { %v5225_v49 = vadd.f32 %v5223_v51, %v5219_v27  ;;  %v5279_v41 = vadd.f32 %v5277_v18, %v5273_v23  ;;  %v5229_v33 = vmul.f32 %v5227_v39, %v12373_v25  ;;  %v5106_v32 = vpop.f32.mrf.mxu0  ;;  %v5288_v14 = vmul.f32 %v5287_v24, %v12519_v61 }
 0x500   : > { %v5131_v2 = vpop.f32.mrf.mxu1  ;;  %v5230_v44 = vadd.f32 %v5228_v10, %v5224_v55  ;;  %v5284_v12 = vadd.f32 %v5282_v56, %v5278_v63  ;;  %v5239_v54 = vstv %s12617_s26  ;;  %v5293_v28 = vstv %s12622_s15  ;;  %s10559_s26 = sld [smem:[#allocation6 + $0x6]] }
 0x501   : > { %v5040_v1 = vpop.f32.mrf.mxu2  ;;  %v5071_v7 = vpop.f32.mrf.mxu3  ;;  %v5347_v57 = vstv %s12626_s29  ;;  %v5401_v20 = vstv %s12635_s16  ;;  %v5455_v47 = vstv %s12639_s23  ;;  %v5509_v31 = vstv %s12644_s13  ;;  %s10568_s15 = sld [smem:[#allocation6 + $0x7]]  ;;  %s10581_s29 = sshll.u32 %s11223_s24, 6 }
 0x502   : > { %v5072_v8 = vadd.f32 %v5071_v7, %v5033_v48  ;;  %v5041_v7 = vadd.f32 %v5040_v1, %v5006_v5  ;;  %v5283_v1 = vmul.f32 %v5281_v26, %v12373_v25  ;;  %v5236_v17 = vadd.f32 %v5234_v53, %v5230_v44  ;;  %s10289_s23 = scalar_lea.hbm %s13583_s11, %s10581_s29  ;;  %s10290_s13 = sshll.u32 %s13160_s6, 4  ;;  %s10291_s13 = int_to_ptr.vmem [resolvable:$true] %s10290_s13 }
 0x503   : > { %v5563_v61 = vstv %s12648_s27  ;;  %v5235_v60 = vmul.f32 %v5233_v62, %v12546_v30  ;;  %v5245_v39 = vstv %s12629_s21  ;;  %v5299_v3 = vstv %s12651_s12  ;;  %s10292_s27 = sshll.u32 %s10289_s23, 4  ;;  %s10278_s24 = scalar_lea.sflag [#allocation4], %s11382_s4  ;;  %s10293_s27 = int_to_ptr.hbm [resolvable:$true] %s10292_s27 }
 0x504   : > { %v5102_v37 = vadd.f32 %v5101_v38, %v5072_v8  ;;  %v5631_v38 = vsel %vm584_vm0, %v574_v36, 0  ;;  %v5290_v34 = vadd.f32 %v5288_v14, %v5284_v12  ;;  %v5289_v53 = vmul.f32 %v5287_v24, %v12546_v30  ;;  %s11047_s12 = sshra.s32 %s10293_s27, 4  ;;  %s11048_s12 = int_to_ptr.hbm [resolvable:$true] %s11047_s12 }
 0x505   : > { %v5285_v36 = vadd.f32 %v5283_v1, %v5279_v41  ;;  %p11054_p12 = scmp.lt.s32.totalorder %s11048_s12, %s13583_s11 }
 0x506   : > { %v5132_v22 = vadd.f32 %v5131_v2, %v5102_v37  ;;  %v12675_v2 = vand.u32 4294901760, %v5631_v38 }
 0x507   : > { %v5291_v12 = vadd.f32 %v5289_v53, %v5285_v36  ;;  %v577_v36 = vld [vmem:[#allocation17 + $0x8] sm:$0xff] }
 0x508   : > { %v5137_v35 = vpop.f32.mrf.mxu1 }
 0x509   : > { %v5075_v52 = vpop.f32.mrf.mxu3  ;;  %v5164_v29 = vpop.f32.mrf.mxu2 }
 0x50a   : > { %v5076_v11 = vadd.f32 %v5075_v52, %v5041_v7  ;;  %v5165_v48 = vadd.f32 %v5164_v29, %v5132_v22 }
 0x50c   : > { %v5107_v8 = vadd.f32 %v5106_v32, %v5076_v11  ;;  %v575_v11 = vld [vmem:[#allocation15 + $0x8] sm:$0xff] }
 0x50d   : > { %v5634_v30 = vsel %vm584_vm0, %v575_v11, 0 }
 0x50e   : > { %v5138_v10 = vadd.f32 %v5137_v35, %v5107_v8  ;;  %v12718_v8 = vand.u32 4294901760, %v5634_v30 }
 0x511   : > { %v5191_v4 = vpop.f32.mrf.mxu3  ;;  %v5168_v51 = vpop.f32.mrf.mxu2 }
 0x512   : > { %v12664_v25 = vadd.f32 %v5191_v4, %v5165_v48  ;;  %v5169_v7 = vadd.f32 %v5168_v51, %v5138_v10 }
 0x514   : > { %v5240_v58 = vmul.f32 %v5239_v54, %v12664_v25  ;;  %v5294_v26 = vmul.f32 %v5293_v28, %v12664_v25  ;;  %v5348_v45 = vmul.f32 %v5347_v57, %v12664_v25  ;;  %v5402_v42 = vmul.f32 %v5401_v20, %v12664_v25 }
 0x515   : > { %v5456_v52 = vmul.f32 %v5455_v47, %v12664_v25  ;;  %v5510_v62 = vmul.f32 %v5509_v31, %v12664_v25  ;;  %v5564_v18 = vmul.f32 %v5563_v61, %v12664_v25 }
 0x516   : > { %v5242_v5 = vadd.f32 %v5240_v58, %v5236_v17  ;;  %v5296_v37 = vadd.f32 %v5294_v26, %v5290_v34  ;;  %v12687_v46 = vadd.f32 %v5348_v45, %v12531_v9  ;;  %v12690_v27 = vadd.f32 %v5402_v42, %v12534_v21  ;;  %v576_v45 = vld [vmem:[#allocation17] sm:$0xff] }
 0x517   : > { %v12693_v23 = vadd.f32 %v5456_v52, %v12537_v50  ;;  %v12696_v56 = vadd.f32 %v5510_v62, %v12540_v15  ;;  %v12699_v29 = vadd.f32 %v5564_v18, %v12543_v0  ;;  %v5231_v9 = vadd.f32 %v5229_v33, %v5225_v49 }
 0x518   : > { %v5246_v55 = vadd.f32 %v5245_v39, %v5242_v5  ;;  %v5300_v63 = vadd.f32 %v5299_v3, %v5296_v37  ;;  %v12705_v15 = vsub.f32 %v5631_v38, %v12675_v2  ;;  %v5827_v10 = vsel %vm584_vm0, %v576_v45, 0  ;;  %v578_v45 = vld [vmem:[#allocation18] sm:$0xff] }
 0x519   : > { %13719 = vst [vmem:[#allocation30_spill] sm:$0xff] %v12693_v23  ;;  %v5195_v22 = vpop.f32.mrf.mxu3  ;;  %v5237_v32 = vadd.f32 %v5235_v60, %v5231_v9 }
 0x51a   : > { %13720 = vst [vmem:[#allocation31_spill] sm:$0xff] %v12696_v56  ;;  %v12702_v44 = vadd.f32 %v5195_v22, %v5169_v7  ;;  %v5248_v21 = vmul.f32 0.2, %v5246_v55  ;;  %v5302_v50 = vmul.f32 0.2, %v5300_v63  ;;  %v12713_v1 = vand.u32 4294901760, %v12705_v15 }
 0x51b   : > { %13721 = vst [vmem:[#allocation42_spill] sm:$0xff] %v12699_v29 }
 0x51c   : > { %v5241_v0 = vmul.f32 %v5239_v54, %v12702_v44  ;;  %v5295_v14 = vmul.f32 %v5293_v28, %v12702_v44  ;;  %v5250_v24 = vmax.f32 %v5246_v55, %v5248_v21  ;;  %v5304_v48 = vmax.f32 %v5300_v63, %v5302_v50 }
 0x51d   : > { %v5349_v49 = vmul.f32 %v5347_v57, %v12702_v44  ;;  %v5403_v33 = vmul.f32 %v5401_v20, %v12702_v44  ;;  %v5657_v34 = vsub.f32 %v12705_v15, %v12713_v1  ;;  %v5457_v7 = vmul.f32 %v5455_v47, %v12702_v44 }
 0x51e   : > { %v5243_v17 = vadd.f32 %v5241_v0, %v5237_v32  ;;  %v5297_v41 = vadd.f32 %v5295_v14, %v5291_v12  ;;  %v12720_v28 = vand.u32 4294901760, %v5250_v24  ;;  %v12722_v35 = vand.u32 4294901760, %v5304_v48 }
 0x51f   : > { %v12716_v4 = vadd.f32 %v5349_v49, %v12558_v59  ;;  %v12725_v57 = vadd.f32 %v5403_v33, %v12561_v16  ;;  %v12730_v59 = vsub.f32 %v5634_v30, %v12718_v8  ;;  %v12744_v51 = vand.u32 4294901760, %v5657_v34 }
 0x520   : > { %v5247_v54 = vadd.f32 %v5245_v39, %v5243_v17  ;;  %v5301_v38 = vadd.f32 %v5299_v3, %v5297_v41  ;;  %v12733_v39 = vsub.f32 %v5250_v24, %v12720_v28  ;;  %v12736_v3 = vsub.f32 %v5304_v48, %v12722_v35 }
 0x521   : > { %v12755_v18 = vand.u32 4294901760, %v12730_v59  ;;  %v12777_v63 = vand.u32 4294901760, %v5827_v10  ;;  %v12780_v22 = vadd.f32 %v5457_v7, %v12564_v19  ;;  %v5511_v47 = vmul.f32 %v5509_v31, %v12702_v44 }
 0x522   : > { %v5249_v20 = vmul.f32 0.2, %v5247_v54  ;;  %v5303_v60 = vmul.f32 0.2, %v5301_v38  ;;  %v12759_v5 = vand.u32 4294901760, %v12733_v39  ;;  %v12762_v37 = vand.u32 4294901760, %v12736_v3 }
 0x523   : > { %13722 = vst [vmem:[#allocation43_spill] sm:$0xff] %v12780_v22  ;;  %v5665_v21 = vsub.f32 %v12730_v59, %v12755_v18  ;;  %v12800_v50 = vadd.f32 %v5511_v47, %v12567_v43  ;;  %v5617_v32 = vstv %s12738_s0  ;;  %v12806_v14 = vsub.f32 %v5827_v10, %v12777_v63  ;;  %s11049_s0 = scalar_lea.hbm %s11048_s12, 64 }
 0x524   : > { %v5251_v58 = vmax.f32 %v5247_v54, %v5249_v20  ;;  %v5305_v26 = vmax.f32 %v5301_v38, %v5303_v60  ;;  %v5694_v19 = vsub.f32 %v12733_v39, %v12759_v5  ;;  %v5890_v31 = vsub.f32 %v12736_v3, %v12762_v37  ;;  %p11050_p1 = scmp.ne.s32.totalorder %s11048_s12, %s11049_s0 }
 0x525   : > { %13723 = vst [vmem:[#allocation34_spill] sm:$0xff] %v12800_v50  ;;  %v12810_v30 = vand.u32 4294901760, %v5665_v21  ;;  %v5830_v24 = vsel %vm584_vm0, %v577_v36, 0  ;;  %v5565_v43 = vmul.f32 %v5563_v61, %v12702_v44  ;;  %v5618_v48 = vmul.f32 %v5617_v32, %v12664_v25 }
 0x526   : > { %v12740_v16 = vand.u32 4294901760, %v5251_v58  ;;  %v12742_v42 = vand.u32 4294901760, %v5305_v26  ;;  %v5695_v49 = vand.u32 4294901760, %v5694_v19  ;;  %v5891_v33 = vand.u32 4294901760, %v5890_v31  ;;  %p11051_p3 = pnand %p11050_p1, %p11340_p4 }
 0x527   : > { %v12820_v17 = vadd.f32 %v5565_v43, %v12570_v6  ;;  %v12823_v41 = vand.u32 4294901760, %v12806_v14  ;;  %v12825_v54 = vand.u32 4294901760, %v5830_v24  ;;  %v5619_v25 = vmul.f32 %v5617_v32, %v12702_v44  ;;  %v581_v43 = vld [vmem:[#allocation20 + $0x8] sm:$0xff] }
 0x528   : > { %5651 = vmatpush.msra.mxu0 %v12740_v16  ;;  %5752 = vmatpush.msra.mxu3 %v12740_v16  ;;  %v12749_v52 = vsub.f32 %v5251_v58, %v12740_v16  ;;  %v12752_v62 = vsub.f32 %v5305_v26, %v12742_v42  ;;  %v12831_v61 = vadd.f32 %v5618_v48, %v12549_v13  ;;  %p11052_p5 = pneg %p11051_p3 }
 0x529   : > { %13724 = vst [vmem:[#allocation35_spill] sm:$0xff] %v12820_v17  ;;  %v12836_v6 = vadd.f32 %v5619_v25, %v12575_v40  ;;  %v5853_v44 = vsub.f32 %v12806_v14, %v12823_v41  ;;  %v12844_v38 = vsub.f32 %v5830_v24, %v12825_v54 }
 0x52a   : > { %5653 = vmatpush.msra.mxu0 %v12720_v28  ;;  %5722 = vmatpush.msra.mxu2 %v12749_v52  ;;  %v12770_v55 = vand.u32 4294901760, %v12749_v52  ;;  %v12773_v53 = vand.u32 4294901760, %v12752_v62  ;;  %13725 = vst [vmem:[#allocation38_spill] sm:$0xff] %v12831_v61 }
 0x52b   : > { %5754 = vmatpush.msra.mxu3 %v12720_v28  ;;  %5659 = vmatmul.f32.vlgmr.msra.gmra.mxu0 %v12744_v51  ;;  %13726 = vst [vmem:[#allocation39_spill] sm:$0xff] %v12836_v6  ;;  %v12850_v13 = vand.u32 4294901760, %v5853_v44  ;;  %v12853_v40 = vand.u32 4294901760, %v12844_v38 }
 0x52c   : > { %5758 = vmatmul.f32.vlgmr.msra.gmra.mxu3 %v12713_v1  ;;  %5725 = vmatpush.msra.mxu2 %v12733_v39  ;;  %v5688_v9 = vsub.f32 %v12749_v52, %v12770_v55  ;;  %v5884_v11 = vsub.f32 %v12752_v62, %v12773_v53 }
 0x52d   : > { %5785 = vmatpush.msrb.mxu0 %v12770_v55  ;;  %5728 = vmatmul.f32.vlgmr.msra.gmra.mxu2 %v12705_v15  ;;  %v5861_v20 = vsub.f32 %v12844_v38, %v12853_v40 }
 0x52e   : > { %5847 = vmatpush.msrb.mxu2 %v12742_v42  ;;  %v5689_v0 = vand.u32 4294901760, %v5688_v9  ;;  %v5885_v12 = vand.u32 4294901760, %v5884_v11 }
 0x52f   : > { %5789 = vmatpush.msrb.mxu0 %v12759_v5  ;;  %v12867_v60 = vand.u32 4294901760, %v5861_v20 }
 0x530   : > { %5849 = vmatpush.msrb.mxu2 %v12722_v35  ;;  %5690 = vmatpush.msra.mxu1 %v5689_v0 }
 0x531   : > { %5918 = vmatpush.msra.mxu0 %v12752_v62  ;;  %5886 = vmatpush.msrb.mxu3 %v5885_v12 }
 0x532   : > { %5981 = vmatpush.msra.mxu2 %v12773_v53  ;;  %5696 = vmatpush.msra.mxu1 %v5695_v49 }
 0x533   : > { %5921 = vmatpush.msra.mxu0 %v12736_v3  ;;  %5892 = vmatpush.msrb.mxu3 %v5891_v33 }
 0x534   : > { %5985 = vmatpush.msra.mxu2 %v12762_v37  ;;  %5667 = vmatmul.f32.gmra.mxu0 %v12810_v30 }
 0x535   : > { %5698 = vmatmul.f32.vlgmr.msra.gmra.mxu1 %v12675_v2  ;;  %5764 = vmatmul.f32.gmra.mxu3 %v12755_v18 }
 0x536   : > { %5814 = vmatpush.msrb.mxu1 %v12740_v16  ;;  %6010 = vmatpush.msra.mxu3 %v12742_v42 }
 0x537   : > { %5733 = vmatmul.f32.gmra.mxu2 %v12730_v59 }
 0x538   : > { %5816 = vmatpush.msrb.mxu1 %v12720_v28  ;;  %6012 = vmatpush.msra.mxu3 %v12722_v35 }
 0x53a   : > { %5948 = vmatpush.msra.mxu1 %v12742_v42 }
 0x53c   : > { %5950 = vmatpush.msra.mxu1 %v12722_v35  ;;  %5791 = vmatmul.f32.vlgmr.msrb.gmra.mxu0 %v12675_v2 }
 0x53d   : > { %5702 = vmatmul.f32.gmra.mxu1 %v12718_v8  ;;  %5894 = vmatmul.f32.vlgmr.msrb.gmra.mxu3 %v12777_v63 }
 0x53e   : > { %6039 = vmatpush.msrb.mxu0 %v12740_v16  ;;  %6140 = vmatpush.msrb.mxu3 %v12740_v16 }
 0x53f   : > { %5855 = vmatmul.f32.vlgmr.msrb.gmra.mxu2 %v12850_v13 }
 0x540   : > { %6041 = vmatpush.msrb.mxu0 %v12720_v28  ;;  %6110 = vmatpush.msrb.mxu2 %v12749_v52 }
 0x541   : > { %6142 = vmatpush.msrb.mxu3 %v12720_v28 }
 0x542   : > { %6113 = vmatpush.msrb.mxu2 %v12733_v39  ;;  %v579_v39 = vld [vmem:[#allocation18 + $0x8] sm:$0xff] }
 0x544   : > { %5795 = vmatmul.f32.gmra.mxu0 %v12718_v8 }
 0x545   : > { %5818 = vmatmul.f32.vlgmr.msrb.gmra.mxu1 %v12675_v2  ;;  %5898 = vmatmul.f32.gmra.mxu3 %v12825_v54 }
 0x546   : > { %6078 = vmatpush.msrb.mxu1 %v5689_v0 }
 0x547   : > { %5863 = vmatmul.f32.gmra.mxu2 %v12867_v60 }
 0x548   : > { %6084 = vmatpush.msrb.mxu1 %v5695_v49  ;;  %v12956_v49 = vand.u32 4294901760, %v581_v43 }
 0x54c   : > { %5924 = vmatmul.f32.vlgmr.msra.gmra.mxu0 %v12806_v14 }
 0x54d   : > { %5822 = vmatmul.f32.gmra.mxu1 %v12718_v8  ;;  %6014 = vmatmul.f32.vlgmr.msra.gmra.mxu3 %v12777_v63 }
 0x54e   : > { %6173 = vmatpush.msra.mxu0 %v12770_v55  ;;  %6268 = vmatpush.msra.mxu3 %v5885_v12 }
 0x54f   : > { %5987 = vmatmul.f32.vlgmr.msra.gmra.mxu2 %v12777_v63 }
 0x550   : > { %6177 = vmatpush.msra.mxu0 %v12759_v5  ;;  %6229 = vmatpush.msra.mxu2 %v12742_v42 }
 0x551   : > { %6274 = vmatpush.msra.mxu3 %v5891_v33  ;;  %v580_v33 = vld [vmem:[#allocation20] sm:$0xff] }
 0x552   : > { %6231 = vmatpush.msra.mxu2 %v12722_v35  ;;  %v12958_v25 = vand.u32 4294901760, %v580_v33 }
 0x554   : > { %5929 = vmatmul.f32.gmra.mxu0 %v12844_v38 }
 0x555   : > { %5954 = vmatmul.f32.vlgmr.msra.gmra.mxu1 %v12823_v41  ;;  %6018 = vmatmul.f32.gmra.mxu3 %v12825_v54 }
 0x556   : > { %6202 = vmatpush.msra.mxu1 %v12740_v16 }
 0x557   : > { %5991 = vmatmul.f32.gmra.mxu2 %v12825_v54 }
 0x558   : > { %6204 = vmatpush.msra.mxu1 %v12720_v28 }
 0x55c   : > { %6047 = vmatmul.f32.vlgmr.msrb.gmra.mxu0 %v12850_v13 }
 0x55d   : > { %5960 = vmatmul.f32.gmra.mxu1 %v12853_v40  ;;  %6146 = vmatmul.f32.vlgmr.msrb.gmra.mxu3 %v12823_v41 }
 0x55e   : > { %6300 = vmatpush.msrb.mxu0 %v12752_v62  ;;  %6392 = vmatpush.msrb.mxu3 %v12742_v42 }
 0x55f   : > { %6116 = vmatmul.f32.vlgmr.msrb.gmra.mxu2 %v12806_v14 }
 0x560   : > { %6303 = vmatpush.msrb.mxu0 %v12736_v3  ;;  %6363 = vmatpush.msrb.mxu2 %v12773_v53  ;;  %v12920_v3 = vand.u32 4294901760, %v579_v39 }
 0x561   : > { %6394 = vmatpush.msrb.mxu3 %v12722_v35 }
 0x562   : > { %6367 = vmatpush.msrb.mxu2 %v12762_v37  ;;  %v12923_v16 = vsub.f32 %v579_v39, %v12920_v3  ;;  %v5353_v39 = vstv %s10523_s25 }
 0x563   : > { %v5355_v61 = vadd.f32 %v5353_v39, %v12716_v4 }
 0x564   : > { %6055 = vmatmul.f32.gmra.mxu0 %v12867_v60  ;;  %13727 = vst [vmem:[#allocation32_spill] sm:$0xff] %v12923_v16  ;;  %v12930_v52 = vand.u32 4294901760, %v12923_v16 }
 0x565   : > { %6086 = vmatmul.f32.vlgmr.msrb.gmra.mxu1 %v12777_v63  ;;  %6152 = vmatmul.f32.gmra.mxu3 %v12853_v40  ;;  %v5357_v22 = vmul.f32 0.2, %v5355_v61 }
 0x566   : > { %6330 = vmatpush.msrb.mxu1 %v12742_v42  ;;  %v12925_v42 = vand.u32 4294901760, %v578_v45  ;;  %13729 = vst [vmem:[#allocation36_spill] sm:$0xff] %v12930_v52  ;;  %v6462_v37 = vsub.f32 %v12923_v16, %v12930_v52 }
 0x567   : > { %6121 = vmatmul.f32.gmra.mxu2 %v12844_v38  ;;  %v5359_v4 = vmax.f32 %v5355_v61, %v5357_v22 }
 0x568   : > { %6332 = vmatpush.msrb.mxu1 %v12722_v35  ;;  %13728 = vst [vmem:[#allocation33_spill] sm:$0xff] %v12925_v42  ;;  %v12933_v62 = vsub.f32 %v578_v45, %v12925_v42  ;;  %v12945_v47 = vand.u32 4294901760, %v6462_v37 }
 0x56a   : > { %13730 = vst [vmem:[#allocation37_spill] sm:$0xff] %v12933_v62  ;;  %v12941_v7 = vand.u32 4294901760, %v12933_v62 }
 0x56c   : > { %6179 = vmatmul.f32.vlgmr.msra.gmra.mxu0 %v12777_v63  ;;  %13731 = vst [vmem:[#allocation44_spill] sm:$0xff] %v12941_v7  ;;  %v6468_v9 = vsub.f32 %v12933_v62, %v12941_v7 }
 0x56d   : > { %6090 = vmatmul.f32.gmra.mxu1 %v12825_v54  ;;  %6276 = vmatmul.f32.vlgmr.msra.gmra.mxu3 %v12675_v2 }
 0x56e   : > { %6526 = vmatpush.msra.mxu3 %v12920_v3  ;;  %6425 = vmatpush.msra.mxu0 %v12920_v3  ;;  %v12951_v11 = vand.u32 4294901760, %v6468_v9 }
 0x56f   : > { %6237 = vmatmul.f32.vlgmr.msra.gmra.mxu2 %v12744_v51 }
 0x570   : > { %6496 = vmatpush.msra.mxu2 %v12923_v16  ;;  %6528 = vmatpush.msra.mxu3 %v12925_v42  ;;  %13732 = vst [vmem:[#allocation45_spill] sm:$0xff] %v12951_v11 }
 0x571   : > { %6427 = vmatpush.msra.mxu0 %v12925_v42 }
 0x572   : > { %6499 = vmatpush.msra.mxu2 %v12933_v62 }
 0x574   : > { %6183 = vmatmul.f32.gmra.mxu0 %v12825_v54 }
 0x575   : > { %6206 = vmatmul.f32.vlgmr.msra.gmra.mxu1 %v12777_v63  ;;  %6280 = vmatmul.f32.gmra.mxu3 %v12718_v8 }
 0x576   : > { %6464 = vmatpush.msra.mxu1 %v12945_v47 }
 0x577   : > { %6245 = vmatmul.f32.gmra.mxu2 %v12810_v30 }
 0x578   : > { %6470 = vmatpush.msra.mxu1 %v12951_v11 }
 0x57c   : > { %6306 = vmatmul.f32.vlgmr.msrb.gmra.mxu0 %v12705_v15 }
 0x57d   : > { %6210 = vmatmul.f32.gmra.mxu1 %v12825_v54  ;;  %6396 = vmatmul.f32.vlgmr.msrb.gmra.mxu3 %v12675_v2 }
 0x57e   : > { %6559 = vmatpush.msrb.mxu0 %v12930_v52 }
 0x57f   : > { %6369 = vmatmul.f32.vlgmr.msrb.gmra.mxu2 %v12675_v2 }
 0x580   : > { %6563 = vmatpush.msrb.mxu0 %v12941_v7  ;;  %6621 = vmatpush.msrb.mxu2 %v12956_v49 }
 0x582   : > { %6623 = vmatpush.msrb.mxu2 %v12958_v25 }
 0x584   : > { %6311 = vmatmul.f32.gmra.mxu0 %v12730_v59 }
 0x585   : > { %6336 = vmatmul.f32.vlgmr.msrb.gmra.mxu1 %v12713_v1  ;;  %6400 = vmatmul.f32.gmra.mxu3 %v12718_v8 }
 0x586   : > { %6588 = vmatpush.msrb.mxu1 %v12920_v3 }
 0x587   : > { %6373 = vmatmul.f32.gmra.mxu2 %v12718_v8 }
 0x588   : > { %6590 = vmatpush.msrb.mxu1 %v12925_v42 }
 0x58d   : > { %6342 = vmatmul.f32.gmra.mxu1 %v12755_v18 }
 0x5a8   : > { %v5660_v28 = vpop.f32.mrf.mxu0 }
 0x5af   : > { %v5759_v35 = vpop.f32.mrf.mxu3 }
 0x5b0   : > { %v5729_v34 = vpop.f32.mrf.mxu2 }
 0x5b1   : > { %v5668_v58 = vpop.f32.mrf.mxu0 }
 0x5b2   : > { %v5699_v26 = vpop.f32.mrf.mxu1 }
 0x5b3   : > { %v5700_v48 = vadd.f32 %v5699_v26, %v5660_v28  ;;  %v5354_v28 = vadd.f32 %v5353_v39, %v12687_v46 }
 0x5b5   : > { %v5730_v44 = vadd.f32 %v5729_v34, %v5700_v48  ;;  %v5356_v34 = vmul.f32 0.2, %v5354_v28 }
 0x5b7   : > { %v5760_v26 = vadd.f32 %v5759_v35, %v5730_v44 }
 0x5b8   : > { %v5765_v10 = vpop.f32.mrf.mxu3 }
 0x5b9   : > { %v5792_v5 = vpop.f32.mrf.mxu0 }
 0x5ba   : > { %v5703_v55 = vpop.f32.mrf.mxu1  ;;  %v5734_v53 = vpop.f32.mrf.mxu2  ;;  %v5793_v50 = vadd.f32 %v5792_v5, %v5760_v26 }
 0x5bb   : > { %v5704_v17 = vadd.f32 %v5703_v55, %v5668_v58 }
 0x5c0   : > { %v5895_v21 = vpop.f32.mrf.mxu3 }
 0x5c1   : > { %v5796_v19 = vpop.f32.mrf.mxu0 }
 0x5c2   : > { %v5819_v31 = vpop.f32.mrf.mxu1  ;;  %v5856_v36 = vpop.f32.mrf.mxu2 }
 0x5c3   : > { %v5896_v20 = vadd.f32 %v5895_v21, %v5856_v36  ;;  %v5735_v21 = vadd.f32 %v5734_v53, %v5704_v17  ;;  %v5820_v36 = vadd.f32 %v5819_v31, %v5793_v50  ;;  %v12967_v17 = vand.u32 4294901760, %v5359_v4 }
 0x5c5   : > { %v5766_v42 = vadd.f32 %v5765_v10, %v5735_v21  ;;  %v12975_v10 = vsub.f32 %v581_v43, %v12956_v49  ;;  %v12979_v55 = vsub.f32 %v5359_v4, %v12967_v17 }
 0x5c7   : > { %v12985_v31 = vand.u32 4294901760, %v12975_v10 }
 0x5c8   : > { %v5899_v32 = vpop.f32.mrf.mxu3 }
 0x5c9   : > { %v5925_v0 = vpop.f32.mrf.mxu0  ;;  %v6658_v44 = vsub.f32 %v12975_v10, %v12985_v31 }
 0x5ca   : > { %v5823_v12 = vpop.f32.mrf.mxu1  ;;  %v5864_v24 = vpop.f32.mrf.mxu2  ;;  %v5926_v37 = vadd.f32 %v5925_v0, %v5896_v20 }
 0x5cb   : > { %v5900_v48 = vadd.f32 %v5899_v32, %v5864_v24 }
 0x5d0   : > { %v6015_v45 = vpop.f32.mrf.mxu3 }
 0x5d1   : > { %v5930_v9 = vpop.f32.mrf.mxu0 }
 0x5d2   : > { %v5955_v6 = vpop.f32.mrf.mxu1  ;;  %v5988_v29 = vpop.f32.mrf.mxu2  ;;  %v5931_v0 = vadd.f32 %v5930_v9, %v5900_v48 }
 0x5d3   : > { %v5956_v56 = vadd.f32 %v5955_v6, %v5926_v37  ;;  %v5358_v6 = vmax.f32 %v5354_v28, %v5356_v34  ;;  %v13000_v37 = vand.u32 4294901760, %v6658_v44 }
 0x5d5   : > { %v5989_v23 = vadd.f32 %v5988_v29, %v5956_v56  ;;  %v5797_v56 = vadd.f32 %v5796_v19, %v5766_v42  ;;  %v12972_v22 = vand.u32 4294901760, %v5358_v6  ;;  %v12982_v19 = vsub.f32 %v580_v33, %v12958_v25  ;;  %13733 = vst [vmem:[#allocation40_spill] sm:$0xff] %v13000_v37  ;;  %6660 = vmatpush.msrb.mxu3 %v13000_v37 }
 0x5d6   : > { %v12998_v33 = vand.u32 4294901760, %v12979_v55 }
 0x5d7   : > { %v6016_v62 = vadd.f32 %v6015_v45, %v5989_v23  ;;  %v5824_v50 = vadd.f32 %v5823_v12, %v5797_v56  ;;  %v12989_v12 = vsub.f32 %v5358_v6, %v12972_v22  ;;  %v12994_v39 = vand.u32 4294901760, %v12982_v19 }
 0x5d8   : > { %v6019_v16 = vpop.f32.mrf.mxu3  ;;  %v6852_v48 = vsub.f32 %v12979_v55, %v12998_v33 }
 0x5d9   : > { %v6022_v20 = vsub.f32 %v5820_v36, %v6016_v62  ;;  %v6048_v7 = vpop.f32.mrf.mxu0  ;;  %v6664_v9 = vsub.f32 %v12982_v19, %v12994_v39  ;;  %v13005_v28 = vand.u32 4294901760, %v12989_v12 }
 0x5da   : > { %v5961_v52 = vpop.f32.mrf.mxu1  ;;  %v5992_v11 = vpop.f32.mrf.mxu2  ;;  %v13019_v56 = vand.u32 4294901760, %v6852_v48 }
 0x5db   : > { %v6405_v46 = vsel %vm584_vm0, %v6022_v20, 0  ;;  %v5962_v35 = vadd.f32 %v5961_v52, %v5931_v0  ;;  %v13010_v21 = vand.u32 4294901760, %v6664_v9 }
 0x5dc   : > { %v12965_v58 = vand.u32 4294901760, %v6405_v46 }
 0x5dd   : > { %v5993_v29 = vadd.f32 %v5992_v11, %v5962_v35  ;;  %13734 = vst [vmem:[#allocation41_spill] sm:$0xff] %v13010_v21  ;;  %v6858_v35 = vsub.f32 %v12989_v12, %v13005_v28  ;;  %6666 = vmatpush.msrb.mxu3 %v13010_v21 }
 0x5de   : > { %v6429_v23 = vsub.f32 %v6405_v46, %v12965_v58  ;;  %6472 = vmatmul.f32.vlgmr.msra.gmra.mxu1 %v12965_v58 }
 0x5df   : > { %v6020_v62 = vadd.f32 %v6019_v16, %v5993_v29  ;;  %6722 = vmatpush.msra.mxu1 %v12956_v49 }
 0x5e0   : > { %v6430_v61 = vand.u32 4294901760, %v6429_v23  ;;  %6502 = vmatmul.f32.vlgmr.msra.gmra.mxu2 %v6429_v23  ;;  %v6147_v52 = vpop.f32.mrf.mxu3 }
 0x5e1   : > { %v6023_v42 = vsub.f32 %v5824_v50, %v6020_v62  ;;  %v6056_v5 = vpop.f32.mrf.mxu0  ;;  %6724 = vmatpush.msra.mxu1 %v12958_v25  ;;  %6755 = vmatpush.msra.mxu2 %v12985_v31 }
 0x5e2   : > { %v6431_v53 = vsub.f32 %v6429_v23, %v6430_v61  ;;  %v6087_v11 = vpop.f32.mrf.mxu1  ;;  %6532 = vmatmul.f32.vlgmr.msra.gmra.mxu3 %v6430_v61  ;;  %v6117_v16 = vpop.f32.mrf.mxu2  ;;  %v13023_v23 = vand.u32 4294901760, %v6858_v35 }
 0x5e3   : > { %v6408_v32 = vsel %vm584_vm0, %v6023_v42, 0  ;;  %6759 = vmatpush.msra.mxu2 %v12994_v39  ;;  %v6088_v46 = vadd.f32 %v6087_v11, %v6048_v7  ;;  %6784 = vmatpush.msra.mxu3 %v12956_v49 }
 0x5e4   : > { %v6432_v24 = vand.u32 4294901760, %v6431_v53  ;;  %v6436_v43 = vand.u32 4294901760, %v6408_v32 }
 0x5e5   : > { %v6118_v29 = vadd.f32 %v6117_v16, %v6088_v46  ;;  %6786 = vmatpush.msra.mxu3 %v12958_v25 }
 0x5e6   : > { %6433 = vmatmul.f32.vlgmr.msra.gmra.mxu0 %v6432_v24  ;;  %6476 = vmatmul.f32.gmra.mxu1 %v6436_v43  ;;  %v6437_v45 = vsub.f32 %v6408_v32, %v6436_v43 }
 0x5e7   : > { %6692 = vmatpush.msra.mxu0 %v12975_v10  ;;  %v6148_v42 = vadd.f32 %v6147_v52, %v6118_v29  ;;  %v5407_v52 = vstv %s10532_s28 }
 0x5e8   : > { %6507 = vmatmul.f32.gmra.mxu2 %v6437_v45  ;;  %v6438_v26 = vand.u32 4294901760, %v6437_v45  ;;  %v6153_v34 = vpop.f32.mrf.mxu3  ;;  %v5408_v46 = vadd.f32 %v5407_v52, %v12690_v27 }
 0x5e9   : > { %v6180_v36 = vpop.f32.mrf.mxu0  ;;  %6695 = vmatpush.msra.mxu0 %v12982_v19 }
 0x5ea   : > { %v6091_v0 = vpop.f32.mrf.mxu1  ;;  %6538 = vmatmul.f32.gmra.mxu3 %v6438_v26  ;;  %v6122_v20 = vpop.f32.mrf.mxu2  ;;  %v6439_v4 = vsub.f32 %v6437_v45, %v6438_v26  ;;  %v6181_v11 = vadd.f32 %v6180_v36, %v6148_v42 }
 0x5eb   : > { %v6092_v53 = vadd.f32 %v6091_v0, %v6056_v5 }
 0x5ec   : > { %v6440_v6 = vand.u32 4294901760, %v6439_v4 }
 0x5ed   : > { %v6123_v16 = vadd.f32 %v6122_v20, %v6092_v53 }
 0x5ee   : > { %6441 = vmatmul.f32.gmra.mxu0 %v6440_v6  ;;  %6592 = vmatmul.f32.vlgmr.msrb.gmra.mxu1 %v12965_v58 }
 0x5ef   : > { %6854 = vmatpush.msrb.mxu1 %v13019_v56  ;;  %v6154_v9 = vadd.f32 %v6153_v34, %v6123_v16  ;;  %v5410_v34 = vmul.f32 0.2, %v5408_v46 }
 0x5f0   : > { %v6277_v7 = vpop.f32.mrf.mxu3 }
 0x5f1   : > { %6860 = vmatpush.msrb.mxu1 %v13023_v23  ;;  %v6184_v50 = vpop.f32.mrf.mxu0 }
 0x5f2   : > { %v6207_v62 = vpop.f32.mrf.mxu1  ;;  %v6238_v61 = vpop.f32.mrf.mxu2  ;;  %v6185_v4 = vadd.f32 %v6184_v50, %v6154_v9 }
 0x5f3   : > { %v6208_v32 = vadd.f32 %v6207_v62, %v6181_v11 }
 0x5f5   : > { %v6239_v26 = vadd.f32 %v6238_v61, %v6208_v32  ;;  %v5412_v32 = vmax.f32 %v5408_v46, %v5410_v34 }
 0x5f6   : > { %6565 = vmatmul.f32.vlgmr.msrb.gmra.mxu0 %v12965_v58  ;;  %6596 = vmatmul.f32.gmra.mxu1 %v6436_v43  ;;  %v5409_v58 = vadd.f32 %v5407_v52, %v12725_v57 }
 0x5f7   : > { %6815 = vmatpush.msrb.mxu0 %v12967_v17  ;;  %v6278_v5 = vadd.f32 %v6277_v7, %v6239_v26  ;;  %v13036_v52 = vand.u32 4294901760, %v5412_v32 }
 0x5f8   : > { %v6281_v24 = vpop.f32.mrf.mxu3  ;;  %v5411_v42 = vmul.f32 0.2, %v5409_v58 }
 0x5f9   : > { %6817 = vmatpush.msrb.mxu0 %v12972_v22  ;;  %v6307_v48 = vpop.f32.mrf.mxu0 }
 0x5fa   : > { %v6211_v44 = vpop.f32.mrf.mxu1  ;;  %v6246_v45 = vpop.f32.mrf.mxu2  ;;  %v6308_v0 = vadd.f32 %v6307_v48, %v6278_v5 }
 0x5fb   : > { %v6212_v36 = vadd.f32 %v6211_v44, %v6185_v4 }
 0x5fd   : > { %v6247_v29 = vadd.f32 %v6246_v45, %v6212_v36 }
 0x5fe   : > { %6569 = vmatmul.f32.gmra.mxu0 %v6436_v43  ;;  %v5413_v43 = vmax.f32 %v5409_v58, %v5411_v42 }
 0x5ff   : > { %v6282_v11 = vadd.f32 %v6281_v24, %v6247_v29 }
 0x600   : > { %v6397_v20 = vpop.f32.mrf.mxu3  ;;  %v13033_v27 = vand.u32 4294901760, %v5413_v43 }
 0x601   : > { %v6312_v61 = vpop.f32.mrf.mxu0 }
 0x602   : > { %v6337_v35 = vpop.f32.mrf.mxu1  ;;  %v6370_v6 = vpop.f32.mrf.mxu2  ;;  %v6313_v16 = vadd.f32 %v6312_v61, %v6282_v11  ;;  %v13041_v36 = vsub.f32 %v5413_v43, %v13033_v27 }
 0x603   : > { %v6338_v62 = vadd.f32 %v6337_v35, %v6308_v0 }
 0x605   : > { %v6371_v53 = vadd.f32 %v6370_v6, %v6338_v62  ;;  %v13051_v6 = vand.u32 4294901760, %v13041_v36 }
 0x607   : > { %v6398_v50 = vadd.f32 %v6397_v20, %v6371_v53  ;;  %v13047_v20 = vsub.f32 %v5412_v32, %v13036_v52  ;;  %v7042_v53 = vsub.f32 %v13041_v36, %v13051_v6 }
 0x608   : > { %v6401_v45 = vpop.f32.mrf.mxu3 }
 0x609   : > { %v6601_v7 = vsel %vm584_vm0, %v6398_v50, 0  ;;  %v13055_v62 = vand.u32 4294901760, %v13047_v20  ;;  %v7043_v50 = vand.u32 4294901760, %v7042_v53 }
 0x60a   : > { %v6624_v57 = vand.u32 4294901760, %v6601_v7  ;;  %v6343_v44 = vpop.f32.mrf.mxu1  ;;  %v6374_v9 = vpop.f32.mrf.mxu2 }
 0x60b   : > { %v6344_v26 = vadd.f32 %v6343_v44, %v6313_v16  ;;  %v7048_v61 = vsub.f32 %v13047_v20, %v13055_v62  ;;  %v13739_v16 = vld [vmem:[#allocation32_spill] sm:$0xff] }
 0x60c   : > { %v6625_v48 = vsub.f32 %v6601_v7, %v6624_v57  ;;  %6668 = vmatmul.f32.vlgmr.msrb.gmra.mxu3 %v6624_v57  ;;  %v13740_v7 = vld [vmem:[#allocation37_spill] sm:$0xff] }
 0x60d   : > { %v6375_v4 = vadd.f32 %v6374_v9, %v6344_v26  ;;  %6916 = vmatpush.msrb.mxu3 %v12967_v17  ;;  %v7049_v43 = vand.u32 4294901760, %v7048_v61 }
 0x60e   : > { %v6626_v24 = vand.u32 4294901760, %v6625_v48  ;;  %6698 = vmatmul.f32.vlgmr.msra.gmra.mxu0 %v6625_v48 }
 0x60f   : > { %v6402_v5 = vadd.f32 %v6401_v45, %v6375_v4  ;;  %6918 = vmatpush.msrb.mxu3 %v12972_v22  ;;  %6949 = vmatpush.msra.mxu0 %v12998_v33 }
 0x610   : > { %v6627_v58 = vsub.f32 %v6625_v48, %v6626_v24  ;;  %6728 = vmatmul.f32.vlgmr.msra.gmra.mxu1 %v6626_v24 }
 0x611   : > { %v6604_v0 = vsel %vm584_vm0, %v6402_v5, 0  ;;  %6953 = vmatpush.msra.mxu0 %v13005_v28  ;;  %6978 = vmatpush.msra.mxu1 %v12967_v17 }
 0x612   : > { %v6628_v46 = vand.u32 4294901760, %v6627_v58  ;;  %v6632_v35 = vand.u32 4294901760, %v6604_v0 }
 0x613   : > { %6980 = vmatpush.msra.mxu1 %v12972_v22 }
 0x614   : > { %6629 = vmatmul.f32.vlgmr.msrb.gmra.mxu2 %v6628_v46  ;;  %6672 = vmatmul.f32.gmra.mxu3 %v6632_v35  ;;  %v6633_v29 = vsub.f32 %v6604_v0, %v6632_v35 }
 0x615   : > { %6886 = vmatpush.msrb.mxu2 %v12979_v55 }
 0x616   : > { %6703 = vmatmul.f32.gmra.mxu0 %v6633_v29  ;;  %v6634_v42 = vand.u32 4294901760, %v6633_v29 }
 0x617   : > { %6889 = vmatpush.msrb.mxu2 %v12989_v12 }
 0x618   : > { %6734 = vmatmul.f32.gmra.mxu1 %v6634_v42  ;;  %v6635_v34 = vsub.f32 %v6633_v29, %v6634_v42 }
 0x61a   : > { %v6636_v11 = vand.u32 4294901760, %v6635_v34 }
 0x61c   : > { %6637 = vmatmul.f32.gmra.mxu2 %v6636_v11  ;;  %6788 = vmatmul.f32.vlgmr.msra.gmra.mxu3 %v6624_v57 }
 0x61d   : > { %7044 = vmatpush.msra.mxu3 %v7043_v50 }
 0x61e   : > { %6823 = vmatmul.f32.vlgmr.msrb.gmra.mxu0 %v12744_v51 }
 0x61f   : > { %7050 = vmatpush.msra.mxu3 %v7049_v43  ;;  %7076 = vmatpush.msrb.mxu0 %v13041_v36 }
 0x620   : > { %6862 = vmatmul.f32.vlgmr.msrb.gmra.mxu1 %v12675_v2 }
 0x621   : > { %7079 = vmatpush.msrb.mxu0 %v13047_v20  ;;  %7106 = vmatpush.msrb.mxu1 %v13033_v27 }
 0x623   : > { %7108 = vmatpush.msrb.mxu1 %v13036_v52 }
 0x624   : > { %6761 = vmatmul.f32.vlgmr.msra.gmra.mxu2 %v6624_v57  ;;  %6792 = vmatmul.f32.gmra.mxu3 %v6632_v35 }
 0x625   : > { %7005 = vmatpush.msra.mxu2 %v13033_v27 }
 0x626   : > { %6831 = vmatmul.f32.gmra.mxu0 %v12810_v30 }
 0x627   : > { %7007 = vmatpush.msra.mxu2 %v13036_v52 }
 0x628   : > { %6866 = vmatmul.f32.gmra.mxu1 %v12718_v8 }
 0x62c   : > { %6765 = vmatmul.f32.gmra.mxu2 %v6632_v35  ;;  %6922 = vmatmul.f32.vlgmr.msrb.gmra.mxu3 %v12713_v1 }
 0x62d   : > { %7168 = vmatpush.msrb.mxu3 %v13033_v27 }
 0x62e   : > { %6955 = vmatmul.f32.vlgmr.msra.gmra.mxu0 %v12675_v2 }
 0x62f   : > { %7170 = vmatpush.msrb.mxu3 %v13036_v52  ;;  %7197 = vmatpush.msra.mxu0 %v12967_v17 }
 0x630   : > { %6982 = vmatmul.f32.vlgmr.msra.gmra.mxu1 %v12675_v2 }
 0x631   : > { %7199 = vmatpush.msra.mxu0 %v12972_v22  ;;  %7236 = vmatpush.msra.mxu1 %v13019_v56 }
 0x633   : > { %7242 = vmatpush.msra.mxu1 %v13023_v23  ;;  %v13738_v23 = vld [vmem:[#allocation44_spill] sm:$0xff] }
 0x634   : > { %6892 = vmatmul.f32.vlgmr.msrb.gmra.mxu2 %v12705_v15  ;;  %6928 = vmatmul.f32.gmra.mxu3 %v12755_v18 }
 0x635   : > { %7139 = vmatpush.msrb.mxu2 %v13051_v6 }
 0x636   : > { %6959 = vmatmul.f32.gmra.mxu0 %v12718_v8 }
 0x637   : > { %7143 = vmatpush.msrb.mxu2 %v13055_v62 }
 0x638   : > { %6986 = vmatmul.f32.gmra.mxu1 %v12718_v8 }
 0x63c   : > { %6897 = vmatmul.f32.gmra.mxu2 %v12730_v59  ;;  %7052 = vmatmul.f32.vlgmr.msra.gmra.mxu3 %v12777_v63 }
 0x63d   : > { %7298 = vmatpush.msra.mxu3 %v12967_v17 }
 0x63e   : > { %7082 = vmatmul.f32.vlgmr.msrb.gmra.mxu0 %v12806_v14 }
 0x63f   : > { %7300 = vmatpush.msra.mxu3 %v12972_v22  ;;  %7331 = vmatpush.msrb.mxu0 %v12998_v33 }
 0x640   : > { %7112 = vmatmul.f32.vlgmr.msrb.gmra.mxu1 %v12823_v41 }
 0x641   : > { %7335 = vmatpush.msrb.mxu0 %v13005_v28  ;;  %7360 = vmatpush.msrb.mxu1 %v12967_v17  ;;  %v13735_v17 = vld [vmem:[#allocation33_spill] sm:$0xff]  ;;  %v13737_v28 = vld [vmem:[#allocation36_spill] sm:$0xff] }
 0x643   : > { %7362 = vmatpush.msrb.mxu1 %v12972_v22  ;;  %v13736_v22 = vld [vmem:[#allocation45_spill] sm:$0xff] }
 0x644   : > { %7013 = vmatmul.f32.vlgmr.msra.gmra.mxu2 %v12850_v13  ;;  %7056 = vmatmul.f32.gmra.mxu3 %v12825_v54 }
 0x645   : > { %7268 = vmatpush.msra.mxu2 %v12979_v55 }
 0x646   : > { %7087 = vmatmul.f32.gmra.mxu0 %v12844_v38 }
 0x647   : > { %7271 = vmatpush.msra.mxu2 %v12989_v12 }
 0x648   : > { %7118 = vmatmul.f32.gmra.mxu1 %v12853_v40 }
 0x64c   : > { %7021 = vmatmul.f32.gmra.mxu2 %v12867_v60  ;;  %7172 = vmatmul.f32.vlgmr.msrb.gmra.mxu3 %v12777_v63 }
 0x64d   : > { %7426 = vmatpush.msrb.mxu3 %v7043_v50 }
 0x64e   : > { %7205 = vmatmul.f32.vlgmr.msra.gmra.mxu0 %v12850_v13 }
 0x64f   : > { %7432 = vmatpush.msrb.mxu3 %v7049_v43  ;;  %7458 = vmatpush.msra.mxu0 %v13041_v36 }
 0x650   : > { %7244 = vmatmul.f32.vlgmr.msra.gmra.mxu1 %v12777_v63 }
 0x651   : > { %7461 = vmatpush.msra.mxu0 %v13047_v20  ;;  %7488 = vmatpush.msra.mxu1 %v13033_v27 }
 0x653   : > { %7490 = vmatpush.msra.mxu1 %v13036_v52 }
 0x654   : > { %7145 = vmatmul.f32.vlgmr.msrb.gmra.mxu2 %v12777_v63  ;;  %7176 = vmatmul.f32.gmra.mxu3 %v12825_v54 }
 0x655   : > { %7387 = vmatpush.msrb.mxu2 %v13033_v27 }
 0x656   : > { %7213 = vmatmul.f32.gmra.mxu0 %v12867_v60 }
 0x657   : > { %7389 = vmatpush.msrb.mxu2 %v13036_v52 }
 0x658   : > { %7248 = vmatmul.f32.gmra.mxu1 %v12825_v54 }
 0x65b   : > { %v6473_v12 = vpop.f32.mrf.mxu1 }
 0x65c   : > { %7149 = vmatmul.f32.gmra.mxu2 %v12825_v54  ;;  %7304 = vmatmul.f32.vlgmr.msra.gmra.mxu3 %v12823_v41 }
 0x65d   : > { %7550 = vmatpush.msra.mxu3 %v13033_v27 }
 0x65e   : > { %7337 = vmatmul.f32.vlgmr.msrb.gmra.mxu0 %v12777_v63 }
 0x65f   : > { %7552 = vmatpush.msra.mxu3 %v13036_v52  ;;  %7583 = vmatpush.msrb.mxu0 %v12920_v3 }
 0x660   : > { %7364 = vmatmul.f32.vlgmr.msrb.gmra.mxu1 %v12777_v63 }
 0x661   : > { %7622 = vmatpush.msrb.mxu1 %v12945_v47  ;;  %7585 = vmatpush.msrb.mxu0 %v13735_v17 }
 0x663   : > { %7628 = vmatpush.msrb.mxu1 %v13736_v22  ;;  %v6434_v55 = vpop.f32.mrf.mxu0  ;;  %v6477_v56 = vpop.f32.mrf.mxu1 }
 0x664   : > { %7274 = vmatmul.f32.vlgmr.msra.gmra.mxu2 %v12806_v14  ;;  %7310 = vmatmul.f32.gmra.mxu3 %v12853_v40  ;;  %v6503_v26 = vpop.f32.mrf.mxu2  ;;  %v6474_v46 = vadd.f32 %v6473_v12, %v6434_v55 }
 0x665   : > { %7521 = vmatpush.msra.mxu2 %v13051_v6  ;;  %v6533_v44 = vpop.f32.mrf.mxu3 }
 0x666   : > { %7341 = vmatmul.f32.gmra.mxu0 %v12825_v54  ;;  %v6504_v42 = vadd.f32 %v6503_v26, %v6474_v46 }
 0x667   : > { %7525 = vmatpush.msra.mxu2 %v13055_v62 }
 0x668   : > { %7368 = vmatmul.f32.gmra.mxu1 %v12825_v54  ;;  %v6534_v34 = vadd.f32 %v6533_v44, %v6504_v42 }
 0x66b   : > { %v6442_v33 = vpop.f32.mrf.mxu0  ;;  %v6593_v57 = vpop.f32.mrf.mxu1 }
 0x66c   : > { %7279 = vmatmul.f32.gmra.mxu2 %v12844_v38  ;;  %7434 = vmatmul.f32.vlgmr.msrb.gmra.mxu3 %v12675_v2  ;;  %v6508_v52 = vpop.f32.mrf.mxu2  ;;  %v6478_v61 = vadd.f32 %v6477_v56, %v6442_v33 }
 0x66d   : > { %7684 = vmatpush.msrb.mxu3 %v12920_v3  ;;  %v6539_v48 = vpop.f32.mrf.mxu3 }
 0x66e   : > { %7464 = vmatmul.f32.vlgmr.msra.gmra.mxu0 %v12705_v15 }
 0x66f   : > { %7686 = vmatpush.msrb.mxu3 %v13735_v17  ;;  %7717 = vmatpush.msra.mxu0 %v13737_v28 }
 0x670   : > { %7494 = vmatmul.f32.vlgmr.msra.gmra.mxu1 %v12713_v1 }
 0x671   : > { %7746 = vmatpush.msra.mxu1 %v12920_v3  ;;  %7721 = vmatpush.msra.mxu0 %v13738_v23 }
 0x673   : > { %7748 = vmatpush.msra.mxu1 %v13735_v17  ;;  %v6566_v32 = vpop.f32.mrf.mxu0  ;;  %v6597_v27 = vpop.f32.mrf.mxu1 }
 0x674   : > { %7395 = vmatmul.f32.vlgmr.msrb.gmra.mxu2 %v12744_v51  ;;  %7438 = vmatmul.f32.gmra.mxu3 %v12718_v8  ;;  %v6567_v50 = vadd.f32 %v6566_v32, %v6534_v34  ;;  %v5461_v34 = vstv %s10541_s1  ;;  %s11053_s1 = scalar_lea.hbm %s13583_s11, 128 }
 0x675   : > { %7654 = vmatpush.msrb.mxu2 %v13739_v16  ;;  %v6509_v16 = vadd.f32 %v6508_v52, %v6478_v61  ;;  %p11055_p7 = scmp.lt.s32.totalorder %s11053_s1, %s11049_s0 }
 0x676   : > { %7469 = vmatmul.f32.gmra.mxu0 %v12730_v59  ;;  %v6594_v22 = vadd.f32 %v6593_v57, %v6567_v50 }
 0x677   : > { %7657 = vmatpush.msrb.mxu2 %v13740_v7  ;;  %p11056_p8 = por %p11055_p7, %p11054_p12 }
 0x678   : > { %7500 = vmatmul.f32.gmra.mxu1 %v12755_v18 }
 0x679   : > { %p11057_p9 = pnand %p11056_p8, %p11052_p5 }
 0x67b   : > { %v6570_v9 = vpop.f32.mrf.mxu0 }
 0x67c   : > { %7403 = vmatmul.f32.gmra.mxu2 %v12810_v30  ;;  %7554 = vmatmul.f32.vlgmr.msra.gmra.mxu3 %v12675_v2 }
 0x67d   : > { %7818 = vmatpush.msra.mxu3 %v13000_v37 }
 0x67f   : > { %7824 = vmatpush.msra.mxu3 %v13010_v21 }
 0x684   : > { %7527 = vmatmul.f32.vlgmr.msra.gmra.mxu2 %v12675_v2  ;;  %7558 = vmatmul.f32.gmra.mxu3 %v12718_v8 }
 0x685   : > { %7779 = vmatpush.msra.mxu2 %v12956_v49 }
 0x687   : > { %7781 = vmatpush.msra.mxu2 %v12958_v25 }
 0x68b   : > { %v6699_v45 = vpop.f32.mrf.mxu0 }
 0x68c   : > { %7531 = vmatmul.f32.gmra.mxu2 %v12718_v8 }
 0x68d   : > { %v6729_v4 = vpop.f32.mrf.mxu1 }
 0x68f   : > { %v6669_v24 = vpop.f32.mrf.mxu3 }
 0x693   : > { %v6704_v5 = vpop.f32.mrf.mxu0 }
 0x695   : > { %v6735_v36 = vpop.f32.mrf.mxu1 }
 0x697   : > { %v6630_v58 = vpop.f32.mrf.mxu2  ;;  %v6673_v0 = vpop.f32.mrf.mxu3 }
 0x698   : > { %v6670_v35 = vadd.f32 %v6669_v24, %v6630_v58  ;;  %v6540_v24 = vadd.f32 %v6539_v48, %v6509_v16 }
 0x69a   : > { %v6700_v53 = vadd.f32 %v6699_v45, %v6670_v35  ;;  %v6571_v17 = vadd.f32 %v6570_v9, %v6540_v24 }
 0x69b   : > { %v6824_v20 = vpop.f32.mrf.mxu0 }
 0x69c   : > { %v6730_v21 = vadd.f32 %v6729_v4, %v6700_v53 }
 0x69d   : > { %v6863_v6 = vpop.f32.mrf.mxu1 }
 0x69e   : > { %v6864_v46 = vadd.f32 %v6863_v6, %v6824_v20 }
 0x69f   : > { %v6638_v29 = vpop.f32.mrf.mxu2  ;;  %v6789_v62 = vpop.f32.mrf.mxu3 }
 0x6a0   : > { %v6674_v43 = vadd.f32 %v6673_v0, %v6638_v29 }
 0x6a2   : > { %v6705_v55 = vadd.f32 %v6704_v5, %v6674_v43  ;;  %v13741_v43 = vld [vmem:[#allocation43_spill] sm:$0xff] }
 0x6a3   : > { %v6832_v11 = vpop.f32.mrf.mxu0 }
 0x6a4   : > { %v6736_v33 = vadd.f32 %v6735_v36, %v6705_v55  ;;  %v5463_v55 = vadd.f32 %v5461_v34, %v13741_v43 }
 0x6a5   : > { %v6867_v28 = vpop.f32.mrf.mxu1 }
 0x6a6   : > { %v6868_v61 = vadd.f32 %v6867_v28, %v6832_v11 }
 0x6a7   : > { %v6762_v37 = vpop.f32.mrf.mxu2  ;;  %v6793_v7 = vpop.f32.mrf.mxu3 }
 0x6a8   : > { %v6763_v23 = vadd.f32 %v6762_v37, %v6730_v21  ;;  %v6598_v37 = vadd.f32 %v6597_v27, %v6571_v17 }
 0x6aa   : > { %v6790_v12 = vadd.f32 %v6789_v62, %v6763_v23 }
 0x6ab   : > { %v6956_v56 = vpop.f32.mrf.mxu0 }
 0x6ac   : > { %v6796_v58 = vsub.f32 %v6594_v22, %v6790_v12  ;;  %v13742_v12 = vld [vmem:[#allocation30_spill] sm:$0xff] }
 0x6ad   : > { %v6983_v57 = vpop.f32.mrf.mxu1  ;;  %v5462_v24 = vadd.f32 %v5461_v34, %v13742_v12 }
 0x6ae   : > { %6798 = vst.msk [vmem:[%s13160_s6] sm:$0xff] %vm584_vm0, %v6796_v58 }
 0x6af   : > { %v6766_v32 = vpop.f32.mrf.mxu2  ;;  %v6923_v44 = vpop.f32.mrf.mxu3 }
 0x6b0   : > { %v6767_v26 = vadd.f32 %v6766_v32, %v6736_v33 }
 0x6b2   : > { %v6794_v21 = vadd.f32 %v6793_v7, %v6767_v26 }
 0x6b3   : > { %v6960_v16 = vpop.f32.mrf.mxu0 }
 0x6b4   : > { %v6797_v45 = vsub.f32 %v6598_v37, %v6794_v21  ;;  %v5465_v21 = vmul.f32 0.2, %v5463_v55 }
 0x6b5   : > { %v6987_v9 = vpop.f32.mrf.mxu1 }
 0x6b6   : > { %6799 = vst.msk [vmem:[%s13160_s6 + $0x8] sm:$0xff] %vm584_vm0, %v6797_v45  ;;  %v5467_v11 = vmax.f32 %v5463_v55, %v5465_v21 }
 0x6b7   : > { %v6893_v22 = vpop.f32.mrf.mxu2  ;;  %v6929_v23 = vpop.f32.mrf.mxu3 }
 0x6b8   : > { %v6894_v29 = vadd.f32 %v6893_v22, %v6864_v46  ;;  %v5464_v22 = vmul.f32 0.2, %v5462_v24 }
 0x6ba   : > { %v6924_v42 = vadd.f32 %v6923_v44, %v6894_v29 }
 0x6bb   : > { %v7083_v52 = vpop.f32.mrf.mxu0 }
 0x6bc   : > { %v6957_v58 = vadd.f32 %v6956_v56, %v6924_v42 }
 0x6bd   : > { %v7113_v5 = vpop.f32.mrf.mxu1 }
 0x6bf   : > { %v6898_v48 = vpop.f32.mrf.mxu2  ;;  %v7053_v4 = vpop.f32.mrf.mxu3 }
 0x6c0   : > { %v6899_v33 = vadd.f32 %v6898_v48, %v6868_v61  ;;  %v5466_v48 = vmax.f32 %v5462_v24, %v5464_v22 }
 0x6c2   : > { %v6930_v44 = vadd.f32 %v6929_v23, %v6899_v33 }
 0x6c3   : > { %v7088_v35 = vpop.f32.mrf.mxu0 }
 0x6c4   : > { %v6961_v46 = vadd.f32 %v6960_v16, %v6930_v44  ;;  %v13176_v16 = vand.u32 4294901760, %v5466_v48 }
 0x6c5   : > { %v7119_v62 = vpop.f32.mrf.mxu1 }
 0x6c6   : > { %v6988_v23 = vadd.f32 %v6987_v9, %v6961_v46  ;;  %v13185_v55 = vsub.f32 %v5466_v48, %v13176_v16 }
 0x6c7   : > { %v7014_v0 = vpop.f32.mrf.mxu2  ;;  %v7057_v36 = vpop.f32.mrf.mxu3 }
 0x6c8   : > { %v7054_v17 = vadd.f32 %v7053_v4, %v7014_v0  ;;  %v6984_v4 = vadd.f32 %v6983_v57, %v6957_v58 }
 0x6ca   : > { %v7084_v53 = vadd.f32 %v7083_v52, %v7054_v17 }
 0x6cb   : > { %v7206_v50 = vpop.f32.mrf.mxu0 }
 0x6cc   : > { %v7114_v32 = vadd.f32 %v7113_v5, %v7084_v53  ;;  %v13171_v53 = vand.u32 4294901760, %v5467_v11 }
 0x6cd   : > { %v7245_v45 = vpop.f32.mrf.mxu1 }
 0x6ce   : > { %v13180_v61 = vsub.f32 %v5467_v11, %v13171_v53 }
 0x6cf   : > { %v7022_v7 = vpop.f32.mrf.mxu2  ;;  %v7173_v27 = vpop.f32.mrf.mxu3 }
 0x6d0   : > { %v7058_v26 = vadd.f32 %v7057_v36, %v7022_v7 }
 0x6d2   : > { %v7089_v52 = vadd.f32 %v7088_v35, %v7058_v26 }
 0x6d3   : > { %v7214_v56 = vpop.f32.mrf.mxu0 }
 0x6d4   : > { %v7120_v29 = vadd.f32 %v7119_v62, %v7089_v52 }
 0x6d5   : > { %v7249_v62 = vpop.f32.mrf.mxu1 }
 0x6d7   : > { %v7146_v20 = vpop.f32.mrf.mxu2  ;;  %v7177_v6 = vpop.f32.mrf.mxu3 }
 0x6d8   : > { %v7147_v37 = vadd.f32 %v7146_v20, %v7114_v32  ;;  %v13190_v32 = vand.u32 4294901760, %v13180_v61 }
 0x6da   : > { %v7174_v0 = vadd.f32 %v7173_v27, %v7147_v37  ;;  %v13194_v37 = vand.u32 4294901760, %v13185_v55 }
 0x6db   : > { %v7338_v20 = vpop.f32.mrf.mxu0 }
 0x6dc   : > { %v7180_v28 = vsub.f32 %v6984_v4, %v7174_v0  ;;  %v8011_v4 = vsub.f32 %v13180_v61, %v13190_v32  ;;  %v8017_v0 = vsub.f32 %v13185_v55, %v13194_v37 }
 0x6dd   : > { %v7365_v44 = vpop.f32.mrf.mxu1 }
 0x6de   : > { %v7563_v17 = vsel %vm584_vm0, %v7180_v28, 0  ;;  %v13202_v11 = vand.u32 4294901760, %v8011_v4 }
 0x6df   : > { %v13169_v5 = vand.u32 4294901760, %v7563_v17  ;;  %v7150_v36 = vpop.f32.mrf.mxu2  ;;  %v7305_v7 = vpop.f32.mrf.mxu3 }
 0x6e0   : > { %v7151_v42 = vadd.f32 %v7150_v36, %v7120_v29  ;;  %v7250_v29 = vadd.f32 %v7249_v62, %v7214_v56 }
 0x6e1   : > { %v7587_v57 = vsub.f32 %v7563_v17, %v13169_v5  ;;  %7630 = vmatmul.f32.vlgmr.msrb.gmra.mxu1 %v13169_v5  ;;  %v13206_v17 = vand.u32 4294901760, %v8017_v0 }
 0x6e2   : > { %v7178_v35 = vadd.f32 %v7177_v6, %v7151_v42  ;;  %7880 = vmatpush.msrb.mxu1 %v12956_v49  ;;  %v7246_v6 = vadd.f32 %v7245_v45, %v7206_v50 }
 0x6e3   : > { %v7588_v27 = vand.u32 4294901760, %v7587_v57  ;;  %7660 = vmatmul.f32.vlgmr.msrb.gmra.mxu2 %v7587_v57  ;;  %v7342_v48 = vpop.f32.mrf.mxu0 }
 0x6e4   : > { %v7181_v34 = vsub.f32 %v6988_v23, %v7178_v35  ;;  %7882 = vmatpush.msrb.mxu1 %v12958_v25  ;;  %7913 = vmatpush.msrb.mxu2 %v12985_v31 }
 0x6e5   : > { %v7589_v43 = vsub.f32 %v7587_v57, %v7588_v27  ;;  %7690 = vmatmul.f32.vlgmr.msrb.gmra.mxu3 %v7588_v27  ;;  %v7369_v23 = vpop.f32.mrf.mxu1 }
 0x6e6   : > { %v7566_v9 = vsel %vm584_vm0, %v7181_v34, 0  ;;  %7942 = vmatpush.msrb.mxu3 %v12956_v49  ;;  %7917 = vmatpush.msrb.mxu2 %v12994_v39 }
 0x6e7   : > { %v7590_v12 = vand.u32 4294901760, %v7589_v43  ;;  %v7594_v24 = vand.u32 4294901760, %v7566_v9  ;;  %v7275_v58 = vpop.f32.mrf.mxu2  ;;  %v7311_v33 = vpop.f32.mrf.mxu3 }
 0x6e8   : > { %7944 = vmatpush.msrb.mxu3 %v12958_v25  ;;  %v7276_v22 = vadd.f32 %v7275_v58, %v7246_v6  ;;  %v13743_v6 = vld [vmem:[#allocation34_spill] sm:$0xff] }
 0x6e9   : > { %7591 = vmatmul.f32.vlgmr.msrb.gmra.mxu0 %v7590_v12  ;;  %7634 = vmatmul.f32.gmra.mxu1 %v7594_v24  ;;  %v7595_v26 = vsub.f32 %v7566_v9, %v7594_v24 }
 0x6ea   : > { %7850 = vmatpush.msrb.mxu0 %v12975_v10  ;;  %v7306_v28 = vadd.f32 %v7305_v7, %v7276_v22 }
 0x6eb   : > { %7665 = vmatmul.f32.gmra.mxu2 %v7595_v26  ;;  %v7596_v21 = vand.u32 4294901760, %v7595_v26  ;;  %v7465_v34 = vpop.f32.mrf.mxu0 }
 0x6ec   : > { %7853 = vmatpush.msrb.mxu0 %v12982_v19  ;;  %v7339_v36 = vadd.f32 %v7338_v20, %v7306_v28 }
 0x6ed   : > { %7696 = vmatmul.f32.gmra.mxu3 %v7596_v21  ;;  %v7597_v52 = vsub.f32 %v7595_v26, %v7596_v21  ;;  %v7495_v58 = vpop.f32.mrf.mxu1  ;;  %v5515_v26 = vstv %s10550_s22  ;;  %v13744_v21 = vld [vmem:[#allocation31_spill] sm:$0xff] }
 0x6ee   : > { %v7366_v35 = vadd.f32 %v7365_v44, %v7339_v36  ;;  %v5516_v22 = vadd.f32 %v5515_v26, %v13744_v21 }
 0x6ef   : > { %v7280_v50 = vpop.f32.mrf.mxu2  ;;  %v7598_v45 = vand.u32 4294901760, %v7597_v52  ;;  %v7435_v46 = vpop.f32.mrf.mxu3 }
 0x6f0   : > { %v7281_v42 = vadd.f32 %v7280_v50, %v7250_v29  ;;  %v5518_v29 = vmul.f32 0.2, %v5516_v22 }
 0x6f1   : > { %7599 = vmatmul.f32.gmra.mxu0 %v7598_v45  ;;  %7750 = vmatmul.f32.vlgmr.msra.gmra.mxu1 %v13169_v5 }
 0x6f2   : > { %8013 = vmatpush.msra.mxu1 %v13202_v11  ;;  %v7312_v7 = vadd.f32 %v7311_v33, %v7281_v42 }
 0x6f3   : > { %v7470_v50 = vpop.f32.mrf.mxu0 }
 0x6f4   : > { %8019 = vmatpush.msra.mxu1 %v13206_v17  ;;  %v7343_v62 = vadd.f32 %v7342_v48, %v7312_v7 }
 0x6f5   : > { %v7501_v42 = vpop.f32.mrf.mxu1 }
 0x6f6   : > { %v7370_v12 = vadd.f32 %v7369_v23, %v7343_v62 }
 0x6f7   : > { %v7396_v57 = vpop.f32.mrf.mxu2  ;;  %v7439_v56 = vpop.f32.mrf.mxu3 }
 0x6f8   : > { %v7397_v27 = vadd.f32 %v7396_v57, %v7366_v35  ;;  %v5520_v57 = vmax.f32 %v5516_v22, %v5518_v29 }
 0x6f9   : > { %7723 = vmatmul.f32.vlgmr.msra.gmra.mxu0 %v13169_v5  ;;  %7754 = vmatmul.f32.gmra.mxu1 %v7594_v24  ;;  %v5517_v5 = vadd.f32 %v5515_v26, %v13743_v6 }
 0x6fa   : > { %7974 = vmatpush.msra.mxu0 %v13171_v53  ;;  %v7436_v43 = vadd.f32 %v7435_v46, %v7397_v27 }
 0x6fb   : > { %v5519_v0 = vmul.f32 0.2, %v5517_v5 }
 0x6fc   : > { %7976 = vmatpush.msra.mxu0 %v13176_v16  ;;  %v7466_v20 = vadd.f32 %v7465_v34, %v7436_v43  ;;  %v13218_v43 = vand.u32 4294901760, %v5520_v57 }
 0x6fd   : > { %v5521_v36 = vmax.f32 %v5517_v5, %v5519_v0 }
 0x6fe   : > { %v7496_v44 = vadd.f32 %v7495_v58, %v7466_v20 }
 0x6ff   : > { %v7404_v9 = vpop.f32.mrf.mxu2  ;;  %v7555_v4 = vpop.f32.mrf.mxu3  ;;  %v13215_v7 = vand.u32 4294901760, %v5521_v36 }
 0x700   : > { %v7405_v33 = vadd.f32 %v7404_v9, %v7370_v12 }
 0x701   : > { %7727 = vmatmul.f32.gmra.mxu0 %v7594_v24  ;;  %v13223_v58 = vsub.f32 %v5521_v36, %v13215_v7 }
 0x702   : > { %v7440_v52 = vadd.f32 %v7439_v56, %v7405_v33  ;;  %v13229_v33 = vsub.f32 %v5520_v57, %v13218_v43  ;;  %v13751_v57 = vld [vmem:[#allocation40_spill] sm:$0xff] }
 0x703   : > { %v13233_v21 = vand.u32 4294901760, %v13223_v58 }
 0x704   : > { %v7471_v46 = vadd.f32 %v7470_v50, %v7440_v52 }
 0x705   : > { %v8201_v52 = vsub.f32 %v13223_v58, %v13233_v21 }
 0x706   : > { %v7502_v35 = vadd.f32 %v7501_v42, %v7471_v46  ;;  %v13749_v46 = vld [vmem:[#allocation32_spill] sm:$0xff] }
 0x707   : > { %v7528_v45 = vpop.f32.mrf.mxu2  ;;  %v7559_v56 = vpop.f32.mrf.mxu3 }
 0x708   : > { %v7529_v28 = vadd.f32 %v7528_v45, %v7496_v44 }
 0x70a   : > { %v7556_v48 = vadd.f32 %v7555_v4, %v7529_v28  ;;  %v13237_v4 = vand.u32 4294901760, %v13229_v33  ;;  %v8202_v28 = vand.u32 4294901760, %v8201_v52 }
 0x70c   : > { %v7759_v24 = vsel %vm584_vm0, %v7556_v48, 0  ;;  %v8207_v50 = vsub.f32 %v13229_v33, %v13237_v4  ;;  %v13750_v48 = vld [vmem:[#allocation37_spill] sm:$0xff] }
 0x70d   : > { %v7782_v23 = vand.u32 4294901760, %v7759_v24 }
 0x70e   : > { %v8208_v29 = vand.u32 4294901760, %v8207_v50 }
 0x70f   : > { %v7783_v27 = vsub.f32 %v7759_v24, %v7782_v23  ;;  %v7532_v62 = vpop.f32.mrf.mxu2  ;;  %7826 = vmatmul.f32.vlgmr.msra.gmra.mxu3 %v7782_v23 }
 0x710   : > { %v7533_v34 = vadd.f32 %v7532_v62, %v7502_v35  ;;  %8075 = vmatpush.msra.mxu3 %v13171_v53 }
 0x711   : > { %v7784_v9 = vand.u32 4294901760, %v7783_v27  ;;  %7856 = vmatmul.f32.vlgmr.msrb.gmra.mxu0 %v7783_v27 }
 0x712   : > { %v7560_v12 = vadd.f32 %v7559_v56, %v7533_v34  ;;  %8077 = vmatpush.msra.mxu3 %v13176_v16  ;;  %8108 = vmatpush.msrb.mxu0 %v13190_v32 }
 0x713   : > { %v7785_v26 = vsub.f32 %v7783_v27, %v7784_v9  ;;  %7886 = vmatmul.f32.vlgmr.msrb.gmra.mxu1 %v7784_v9 }
 0x714   : > { %v7762_v20 = vsel %vm584_vm0, %v7560_v12, 0  ;;  %8112 = vmatpush.msrb.mxu0 %v13194_v37  ;;  %8137 = vmatpush.msrb.mxu1 %v13171_v53 }
 0x715   : > { %v7786_v6 = vand.u32 4294901760, %v7785_v26  ;;  %v7790_v5 = vand.u32 4294901760, %v7762_v20 }
 0x716   : > { %8139 = vmatpush.msrb.mxu1 %v13176_v16 }
 0x717   : > { %7787 = vmatmul.f32.vlgmr.msra.gmra.mxu2 %v7786_v6  ;;  %7830 = vmatmul.f32.gmra.mxu3 %v7790_v5  ;;  %v7791_v22 = vsub.f32 %v7762_v20, %v7790_v5 }
 0x718   : > { %8045 = vmatpush.msra.mxu2 %v13180_v61 }
 0x719   : > { %7861 = vmatmul.f32.gmra.mxu0 %v7791_v22  ;;  %v7792_v44 = vand.u32 4294901760, %v7791_v22 }
 0x71a   : > { %8048 = vmatpush.msra.mxu2 %v13185_v55 }
 0x71b   : > { %7892 = vmatmul.f32.gmra.mxu1 %v7792_v44  ;;  %v7793_v0 = vsub.f32 %v7791_v22, %v7792_v44 }
 0x71d   : > { %v7794_v45 = vand.u32 4294901760, %v7793_v0 }
 0x71f   : > { %7795 = vmatmul.f32.gmra.mxu2 %v7794_v45  ;;  %7946 = vmatmul.f32.vlgmr.msrb.gmra.mxu3 %v7782_v23 }
 0x720   : > { %8203 = vmatpush.msrb.mxu3 %v8202_v28 }
 0x721   : > { %7982 = vmatmul.f32.vlgmr.msra.gmra.mxu0 %v12744_v51 }
 0x722   : > { %8209 = vmatpush.msrb.mxu3 %v8208_v29  ;;  %8235 = vmatpush.msra.mxu0 %v13223_v58 }
 0x723   : > { %8021 = vmatmul.f32.vlgmr.msra.gmra.mxu1 %v12675_v2 }
 0x724   : > { %8238 = vmatpush.msra.mxu0 %v13229_v33  ;;  %8265 = vmatpush.msra.mxu1 %v13215_v7 }
 0x726   : > { %8267 = vmatpush.msra.mxu1 %v13218_v43 }
 0x727   : > { %7919 = vmatmul.f32.vlgmr.msrb.gmra.mxu2 %v7782_v23  ;;  %7950 = vmatmul.f32.gmra.mxu3 %v7790_v5  ;;  %v13752_v23 = vld [vmem:[#allocation41_spill] sm:$0xff] }
 0x728   : > { %8164 = vmatpush.msrb.mxu2 %v13215_v7 }
 0x729   : > { %7990 = vmatmul.f32.gmra.mxu0 %v12810_v30 }
 0x72a   : > { %8166 = vmatpush.msrb.mxu2 %v13218_v43 }
 0x72b   : > { %8025 = vmatmul.f32.gmra.mxu1 %v12718_v8 }
 0x72f   : > { %7923 = vmatmul.f32.gmra.mxu2 %v7790_v5  ;;  %8081 = vmatmul.f32.vlgmr.msra.gmra.mxu3 %v12713_v1 }
 0x730   : > { %8327 = vmatpush.msra.mxu3 %v13215_v7 }
 0x731   : > { %8114 = vmatmul.f32.vlgmr.msrb.gmra.mxu0 %v12675_v2 }
 0x732   : > { %8329 = vmatpush.msra.mxu3 %v13218_v43  ;;  %8356 = vmatpush.msrb.mxu0 %v13171_v53 }
 0x733   : > { %8141 = vmatmul.f32.vlgmr.msrb.gmra.mxu1 %v12675_v2 }
 0x734   : > { %8358 = vmatpush.msrb.mxu0 %v13176_v16  ;;  %8395 = vmatpush.msrb.mxu1 %v13202_v11 }
 0x736   : > { %8401 = vmatpush.msrb.mxu1 %v13206_v17  ;;  %v13748_v17 = vld [vmem:[#allocation44_spill] sm:$0xff] }
 0x737   : > { %8051 = vmatmul.f32.vlgmr.msra.gmra.mxu2 %v12705_v15  ;;  %8087 = vmatmul.f32.gmra.mxu3 %v12755_v18 }
 0x738   : > { %8298 = vmatpush.msra.mxu2 %v13233_v21 }
 0x739   : > { %8118 = vmatmul.f32.gmra.mxu0 %v12718_v8 }
 0x73a   : > { %8302 = vmatpush.msra.mxu2 %v13237_v4 }
 0x73b   : > { %8145 = vmatmul.f32.gmra.mxu1 %v12718_v8 }
 0x73f   : > { %8056 = vmatmul.f32.gmra.mxu2 %v12730_v59  ;;  %8211 = vmatmul.f32.vlgmr.msrb.gmra.mxu3 %v12777_v63 }
 0x740   : > { %8457 = vmatpush.msrb.mxu3 %v13171_v53 }
 0x741   : > { %8241 = vmatmul.f32.vlgmr.msra.gmra.mxu0 %v12806_v14 }
 0x742   : > { %8459 = vmatpush.msrb.mxu3 %v13176_v16  ;;  %8490 = vmatpush.msra.mxu0 %v13190_v32 }
 0x743   : > { %8271 = vmatmul.f32.vlgmr.msra.gmra.mxu1 %v12823_v41 }
 0x744   : > { %8494 = vmatpush.msra.mxu0 %v13194_v37  ;;  %8519 = vmatpush.msra.mxu1 %v13171_v53  ;;  %v13745_v53 = vld [vmem:[#allocation33_spill] sm:$0xff]  ;;  %v13747_v37 = vld [vmem:[#allocation36_spill] sm:$0xff] }
 0x746   : > { %8521 = vmatpush.msra.mxu1 %v13176_v16  ;;  %v13746_v16 = vld [vmem:[#allocation45_spill] sm:$0xff] }
 0x747   : > { %8172 = vmatmul.f32.vlgmr.msrb.gmra.mxu2 %v12850_v13  ;;  %8215 = vmatmul.f32.gmra.mxu3 %v12825_v54 }
 0x748   : > { %8427 = vmatpush.msrb.mxu2 %v13180_v61 }
 0x749   : > { %8246 = vmatmul.f32.gmra.mxu0 %v12844_v38 }
 0x74a   : > { %8430 = vmatpush.msrb.mxu2 %v13185_v55 }
 0x74b   : > { %8277 = vmatmul.f32.gmra.mxu1 %v12853_v40 }
 0x74f   : > { %8180 = vmatmul.f32.gmra.mxu2 %v12867_v60  ;;  %8331 = vmatmul.f32.vlgmr.msra.gmra.mxu3 %v12777_v63 }
 0x750   : > { %8585 = vmatpush.msra.mxu3 %v8202_v28 }
 0x751   : > { %8364 = vmatmul.f32.vlgmr.msrb.gmra.mxu0 %v12850_v13 }
 0x752   : > { %8591 = vmatpush.msra.mxu3 %v8208_v29  ;;  %8617 = vmatpush.msrb.mxu0 %v13223_v58 }
 0x753   : > { %8403 = vmatmul.f32.vlgmr.msrb.gmra.mxu1 %v12777_v63 }
 0x754   : > { %8620 = vmatpush.msrb.mxu0 %v13229_v33  ;;  %8647 = vmatpush.msrb.mxu1 %v13215_v7 }
 0x756   : > { %8649 = vmatpush.msrb.mxu1 %v13218_v43 }
 0x757   : > { %8304 = vmatmul.f32.vlgmr.msra.gmra.mxu2 %v12777_v63  ;;  %8335 = vmatmul.f32.gmra.mxu3 %v12825_v54 }
 0x758   : > { %8546 = vmatpush.msra.mxu2 %v13215_v7 }
 0x759   : > { %8372 = vmatmul.f32.gmra.mxu0 %v12867_v60 }
 0x75a   : > { %8548 = vmatpush.msra.mxu2 %v13218_v43 }
 0x75b   : > { %8407 = vmatmul.f32.gmra.mxu1 %v12825_v54 }
 0x75e   : > { %v7631_v55 = vpop.f32.mrf.mxu1 }
 0x75f   : > { %8308 = vmatmul.f32.gmra.mxu2 %v12825_v54  ;;  %8463 = vmatmul.f32.vlgmr.msrb.gmra.mxu3 %v12823_v41 }
 0x760   : > { %8709 = vmatpush.msrb.mxu3 %v13215_v7 }
 0x761   : > { %8496 = vmatmul.f32.vlgmr.msra.gmra.mxu0 %v12777_v63 }
 0x762   : > { %8711 = vmatpush.msrb.mxu3 %v13218_v43  ;;  %8742 = vmatpush.msra.mxu0 %v12920_v3 }
 0x763   : > { %8523 = vmatmul.f32.vlgmr.msra.gmra.mxu1 %v12777_v63 }
 0x764   : > { %8781 = vmatpush.msra.mxu1 %v12945_v47  ;;  %8744 = vmatpush.msra.mxu0 %v13745_v53 }
 0x766   : > { %8787 = vmatpush.msra.mxu1 %v13746_v16  ;;  %v7592_v61 = vpop.f32.mrf.mxu0  ;;  %v7635_v11 = vpop.f32.mrf.mxu1 }
 0x767   : > { %8433 = vmatmul.f32.vlgmr.msrb.gmra.mxu2 %v12806_v14  ;;  %8469 = vmatmul.f32.gmra.mxu3 %v12853_v40  ;;  %v7661_v7 = vpop.f32.mrf.mxu2  ;;  %v7632_v6 = vadd.f32 %v7631_v55, %v7592_v61 }
 0x768   : > { %8680 = vmatpush.msrb.mxu2 %v13233_v21  ;;  %v7691_v24 = vpop.f32.mrf.mxu3 }
 0x769   : > { %8500 = vmatmul.f32.gmra.mxu0 %v12825_v54  ;;  %v7662_v44 = vadd.f32 %v7661_v7, %v7632_v6 }
 0x76a   : > { %8684 = vmatpush.msrb.mxu2 %v13237_v4 }
 0x76b   : > { %8527 = vmatmul.f32.gmra.mxu1 %v12825_v54  ;;  %v7692_v0 = vadd.f32 %v7691_v24, %v7662_v44 }
 0x76e   : > { %v7600_v32 = vpop.f32.mrf.mxu0  ;;  %v7751_v42 = vpop.f32.mrf.mxu1 }
 0x76f   : > { %8438 = vmatmul.f32.gmra.mxu2 %v12844_v38  ;;  %8593 = vmatmul.f32.vlgmr.msra.gmra.mxu3 %v12675_v2  ;;  %v7666_v43 = vpop.f32.mrf.mxu2  ;;  %v7636_v50 = vadd.f32 %v7635_v11, %v7600_v32 }
 0x770   : > { %8843 = vmatpush.msra.mxu3 %v12920_v3  ;;  %v7697_v62 = vpop.f32.mrf.mxu3 }
 0x771   : > { %8623 = vmatmul.f32.vlgmr.msrb.gmra.mxu0 %v12705_v15 }
 0x772   : > { %8845 = vmatpush.msra.mxu3 %v13745_v53  ;;  %8876 = vmatpush.msrb.mxu0 %v13747_v37 }
 0x773   : > { %8653 = vmatmul.f32.vlgmr.msrb.gmra.mxu1 %v12713_v1 }
 0x774   : > { %8905 = vmatpush.msrb.mxu1 %v12920_v3  ;;  %8880 = vmatpush.msrb.mxu0 %v13748_v17 }
 0x776   : > { %8907 = vmatpush.msrb.mxu1 %v13745_v53  ;;  %v7724_v36 = vpop.f32.mrf.mxu0  ;;  %v7755_v27 = vpop.f32.mrf.mxu1 }
 0x777   : > { %8554 = vmatmul.f32.vlgmr.msra.gmra.mxu2 %v12744_v51  ;;  %8597 = vmatmul.f32.gmra.mxu3 %v12718_v8  ;;  %v7725_v28 = vadd.f32 %v7724_v36, %v7692_v0 }
 0x778   : > { %8813 = vmatpush.msra.mxu2 %v13749_v46  ;;  %v7667_v46 = vadd.f32 %v7666_v43, %v7636_v50 }
 0x779   : > { %8628 = vmatmul.f32.gmra.mxu0 %v12730_v59  ;;  %v7752_v16 = vadd.f32 %v7751_v42, %v7725_v28  ;;  %v5569_v28 = vstv %s10559_s26 }
 0x77a   : > { %8816 = vmatpush.msra.mxu2 %v13750_v48 }
 0x77b   : > { %8659 = vmatmul.f32.gmra.mxu1 %v12755_v18 }
 0x77e   : > { %v7728_v35 = vpop.f32.mrf.mxu0 }
 0x77f   : > { %8562 = vmatmul.f32.gmra.mxu2 %v12810_v30  ;;  %8713 = vmatmul.f32.vlgmr.msrb.gmra.mxu3 %v12675_v2 }
 0x780   : > { %8977 = vmatpush.msrb.mxu3 %v13751_v57 }
 0x782   : > { %8983 = vmatpush.msrb.mxu3 %v13752_v23 }
 0x787   : > { %8686 = vmatmul.f32.vlgmr.msrb.gmra.mxu2 %v12675_v2  ;;  %8717 = vmatmul.f32.gmra.mxu3 %v12718_v8 }
 0x788   : > { %8938 = vmatpush.msrb.mxu2 %v12956_v49 }
 0x78a   : > { %8940 = vmatpush.msrb.mxu2 %v12958_v25 }
 0x78e   : > { %v7857_v56 = vpop.f32.mrf.mxu0 }
 0x78f   : > { %8690 = vmatmul.f32.gmra.mxu2 %v12718_v8 }
 0x790   : > { %v7887_v34 = vpop.f32.mrf.mxu1 }
 0x792   : > { %v7827_v9 = vpop.f32.mrf.mxu3 }
 0x796   : > { %v7862_v12 = vpop.f32.mrf.mxu0 }
 0x798   : > { %v7893_v58 = vpop.f32.mrf.mxu1 }
 0x79a   : > { %v7788_v26 = vpop.f32.mrf.mxu2  ;;  %v7831_v20 = vpop.f32.mrf.mxu3 }
 0x79b   : > { %v7828_v5 = vadd.f32 %v7827_v9, %v7788_v26  ;;  %v7698_v9 = vadd.f32 %v7697_v62, %v7667_v46 }
 0x79d   : > { %v7858_v52 = vadd.f32 %v7857_v56, %v7828_v5  ;;  %v7729_v7 = vadd.f32 %v7728_v35, %v7698_v9 }
 0x79e   : > { %v7983_v33 = vpop.f32.mrf.mxu0 }
 0x79f   : > { %v7888_v23 = vadd.f32 %v7887_v34, %v7858_v52  ;;  %v7756_v34 = vadd.f32 %v7755_v27, %v7729_v7 }
 0x7a0   : > { %v8022_v21 = vpop.f32.mrf.mxu1 }
 0x7a1   : > { %v8023_v5 = vadd.f32 %v8022_v21, %v7983_v33 }
 0x7a2   : > { %v7796_v22 = vpop.f32.mrf.mxu2  ;;  %v7947_v4 = vpop.f32.mrf.mxu3 }
 0x7a3   : > { %v7832_v29 = vadd.f32 %v7831_v20, %v7796_v22 }
 0x7a5   : > { %v7863_v61 = vadd.f32 %v7862_v12, %v7832_v29 }
 0x7a6   : > { %v7991_v45 = vpop.f32.mrf.mxu0 }
 0x7a7   : > { %v7894_v32 = vadd.f32 %v7893_v58, %v7863_v61 }
 0x7a8   : > { %v8026_v37 = vpop.f32.mrf.mxu1 }
 0x7a9   : > { %v8027_v29 = vadd.f32 %v8026_v37, %v7991_v45 }
 0x7aa   : > { %v7920_v57 = vpop.f32.mrf.mxu2  ;;  %v7951_v48 = vpop.f32.mrf.mxu3 }
 0x7ab   : > { %v7921_v17 = vadd.f32 %v7920_v57, %v7888_v23 }
 0x7ad   : > { %v7948_v55 = vadd.f32 %v7947_v4, %v7921_v17 }
 0x7ae   : > { %v8115_v11 = vpop.f32.mrf.mxu0 }
 0x7af   : > { %v7954_v26 = vsub.f32 %v7752_v16, %v7948_v55  ;;  %v13753_v55 = vld [vmem:[#allocation35_spill] sm:$0xff] }
 0x7b0   : > { %v8142_v6 = vpop.f32.mrf.mxu1  ;;  %v5571_v9 = vadd.f32 %v5569_v28, %v13753_v55 }
 0x7b1   : > { %10569 = vst.msk [vmem:[%s13160_s6 + $0x10] sm:$0xff] %vm584_vm0, %v7954_v26  ;;  %v13754_v26 = vld [vmem:[#allocation42_spill] sm:$0xff] }
 0x7b2   : > { %v7924_v24 = vpop.f32.mrf.mxu2  ;;  %v8082_v36 = vpop.f32.mrf.mxu3  ;;  %v5570_v7 = vadd.f32 %v5569_v28, %v13754_v26 }
 0x7b3   : > { %v7925_v56 = vadd.f32 %v7924_v24, %v7894_v32 }
 0x7b5   : > { %v7952_v20 = vadd.f32 %v7951_v48, %v7925_v56 }
 0x7b6   : > { %v8119_v23 = vpop.f32.mrf.mxu0 }
 0x7b7   : > { %v7955_v43 = vsub.f32 %v7756_v34, %v7952_v20 }
 0x7b8   : > { %v8146_v17 = vpop.f32.mrf.mxu1 }
 0x7b9   : > { %10570 = vst.msk [vmem:[%s13160_s6 + $0x18] sm:$0xff] %vm584_vm0, %v7955_v43  ;;  %v5573_v43 = vmul.f32 0.2, %v5571_v9 }
 0x7ba   : > { %v8052_v42 = vpop.f32.mrf.mxu2  ;;  %v8088_v57 = vpop.f32.mrf.mxu3 }
 0x7bb   : > { %v8053_v4 = vadd.f32 %v8052_v42, %v8023_v5  ;;  %v5575_v45 = vmax.f32 %v5571_v9, %v5573_v43 }
 0x7bd   : > { %v8083_v0 = vadd.f32 %v8082_v36, %v8053_v4 }
 0x7be   : > { %v8242_v35 = vpop.f32.mrf.mxu0 }
 0x7bf   : > { %v8116_v32 = vadd.f32 %v8115_v11, %v8083_v0 }
 0x7c0   : > { %v8272_v62 = vpop.f32.mrf.mxu1 }
 0x7c2   : > { %v8057_v46 = vpop.f32.mrf.mxu2  ;;  %v8212_v16 = vpop.f32.mrf.mxu3 }
 0x7c3   : > { %v8058_v24 = vadd.f32 %v8057_v46, %v8027_v29 }
 0x7c5   : > { %v8089_v36 = vadd.f32 %v8088_v57, %v8058_v24 }
 0x7c6   : > { %v8247_v22 = vpop.f32.mrf.mxu0 }
 0x7c7   : > { %v8120_v4 = vadd.f32 %v8119_v23, %v8089_v36 }
 0x7c8   : > { %v8278_v52 = vpop.f32.mrf.mxu1 }
 0x7c9   : > { %v8147_v57 = vadd.f32 %v8146_v17, %v8120_v4 }
 0x7ca   : > { %v8173_v12 = vpop.f32.mrf.mxu2  ;;  %v8216_v58 = vpop.f32.mrf.mxu3 }
 0x7cb   : > { %v8213_v27 = vadd.f32 %v8212_v16, %v8173_v12  ;;  %v5572_v16 = vmul.f32 0.2, %v5570_v7  ;;  %v8143_v12 = vadd.f32 %v8142_v6, %v8116_v32 }
 0x7cd   : > { %v8243_v50 = vadd.f32 %v8242_v35, %v8213_v27  ;;  %v5574_v46 = vmax.f32 %v5570_v7, %v5572_v16 }
 0x7ce   : > { %v8365_v61 = vpop.f32.mrf.mxu0 }
 0x7cf   : > { %v8273_v56 = vadd.f32 %v8272_v62, %v8243_v50  ;;  %v13349_v50 = vand.u32 4294901760, %v5575_v45  ;;  %v13354_v23 = vand.u32 4294901760, %v5574_v46 }
 0x7d0   : > { %v8404_v42 = vpop.f32.mrf.mxu1 }
 0x7d1   : > { %v13358_v55 = vsub.f32 %v5575_v45, %v13349_v50  ;;  %v13363_v26 = vsub.f32 %v5574_v46, %v13354_v23 }
 0x7d2   : > { %v8181_v48 = vpop.f32.mrf.mxu2  ;;  %v8332_v44 = vpop.f32.mrf.mxu3 }
 0x7d3   : > { %v8217_v34 = vadd.f32 %v8216_v58, %v8181_v48  ;;  %v13372_v43 = vand.u32 4294901760, %v13363_v26 }
 0x7d5   : > { %v8248_v35 = vadd.f32 %v8247_v22, %v8217_v34  ;;  %v13368_v34 = vand.u32 4294901760, %v13358_v55 }
 0x7d6   : > { %v8373_v11 = vpop.f32.mrf.mxu0 }
 0x7d7   : > { %v8279_v27 = vadd.f32 %v8278_v52, %v8248_v35  ;;  %v9170_v36 = vsub.f32 %v13358_v55, %v13368_v34 }
 0x7d8   : > { %v8408_v52 = vpop.f32.mrf.mxu1 }
 0x7d9   : > { %v13380_v4 = vand.u32 4294901760, %v9170_v36 }
 0x7da   : > { %v8305_v33 = vpop.f32.mrf.mxu2  ;;  %v8336_v21 = vpop.f32.mrf.mxu3 }
 0x7db   : > { %v8306_v20 = vadd.f32 %v8305_v33, %v8273_v56 }
 0x7dd   : > { %v8333_v5 = vadd.f32 %v8332_v44, %v8306_v20  ;;  %v8405_v20 = vadd.f32 %v8404_v42, %v8365_v61 }
 0x7df   : > { %v8339_v37 = vsub.f32 %v8143_v12, %v8333_v5 }
 0x7e0   : > { %v8524_v35 = vpop.f32.mrf.mxu1 }
 0x7e1   : > { %v8722_v28 = vsel %vm584_vm0, %v8339_v37, 0  ;;  %v9176_v37 = vsub.f32 %v13363_v26, %v13372_v43 }
 0x7e2   : > { %v13347_v62 = vand.u32 4294901760, %v8722_v28  ;;  %v8309_v58 = vpop.f32.mrf.mxu2  ;;  %v8464_v48 = vpop.f32.mrf.mxu3 }
 0x7e3   : > { %v8310_v0 = vadd.f32 %v8309_v58, %v8279_v27  ;;  %v13384_v46 = vand.u32 4294901760, %v9176_v37 }
 0x7e4   : > { %v8746_v6 = vsub.f32 %v8722_v28, %v13347_v62  ;;  %8789 = vmatmul.f32.vlgmr.msra.gmra.mxu1 %v13347_v62  ;;  %v8409_v28 = vadd.f32 %v8408_v52, %v8373_v11 }
 0x7e5   : > { %v8337_v22 = vadd.f32 %v8336_v21, %v8310_v0  ;;  %9039 = vmatpush.msra.mxu1 %v12956_v49  ;;  %v8497_v21 = vpop.f32.mrf.mxu0 }
 0x7e6   : > { %v8747_v44 = vand.u32 4294901760, %v8746_v6  ;;  %8819 = vmatmul.f32.vlgmr.msra.gmra.mxu2 %v8746_v6 }
 0x7e7   : > { %v8340_v29 = vsub.f32 %v8147_v57, %v8337_v22  ;;  %9041 = vmatpush.msra.mxu1 %v12958_v25  ;;  %9072 = vmatpush.msra.mxu2 %v12985_v31 }
 0x7e8   : > { %v8748_v9 = vsub.f32 %v8746_v6, %v8747_v44  ;;  %8849 = vmatmul.f32.vlgmr.msra.gmra.mxu3 %v8747_v44  ;;  %v8528_v22 = vpop.f32.mrf.mxu1 }
 0x7e9   : > { %v8725_v17 = vsel %vm584_vm0, %v8340_v29, 0  ;;  %9101 = vmatpush.msra.mxu3 %v12956_v49  ;;  %9076 = vmatpush.msra.mxu2 %v12994_v39 }
 0x7ea   : > { %v8749_v7 = vand.u32 4294901760, %v8748_v9  ;;  %v8753_v32 = vand.u32 4294901760, %v8725_v17  ;;  %v8434_v24 = vpop.f32.mrf.mxu2  ;;  %v8470_v56 = vpop.f32.mrf.mxu3 }
 0x7eb   : > { %9103 = vmatpush.msra.mxu3 %v12958_v25  ;;  %v8435_v12 = vadd.f32 %v8434_v24, %v8405_v20 }
 0x7ec   : > { %8750 = vmatmul.f32.vlgmr.msra.gmra.mxu0 %v8749_v7  ;;  %8793 = vmatmul.f32.gmra.mxu1 %v8753_v32  ;;  %v8754_v33 = vsub.f32 %v8725_v17, %v8753_v32 }
 0x7ed   : > { %9009 = vmatpush.msra.mxu0 %v12975_v10  ;;  %v8465_v45 = vadd.f32 %v8464_v48, %v8435_v12  ;;  %v8501_v58 = vpop.f32.mrf.mxu0  ;;  %v13756_v12 = vld [vmem:[#allocation38_spill] sm:$0xff] }
 0x7ee   : > { %8824 = vmatmul.f32.gmra.mxu2 %v8754_v33  ;;  %v8755_v16 = vand.u32 4294901760, %v8754_v33 }
 0x7ef   : > { %9012 = vmatpush.msra.mxu0 %v12982_v19  ;;  %v8498_v0 = vadd.f32 %v8497_v21, %v8465_v45  ;;  %v5623_v21 = vstv %s10568_s15 }
 0x7f0   : > { %8855 = vmatmul.f32.gmra.mxu3 %v8755_v16  ;;  %v8756_v5 = vsub.f32 %v8754_v33, %v8755_v16  ;;  %v8654_v33 = vpop.f32.mrf.mxu1  ;;  %v13755_v16 = vld [vmem:[#allocation39_spill] sm:$0xff]  ;;  %v5624_v36 = vadd.f32 %v5623_v21, %v13756_v12 }
 0x7f1   : > { %v8525_v44 = vadd.f32 %v8524_v35, %v8498_v0 }
 0x7f2   : > { %v8439_v61 = vpop.f32.mrf.mxu2  ;;  %v8757_v42 = vand.u32 4294901760, %v8756_v5  ;;  %v8594_v27 = vpop.f32.mrf.mxu3 }
 0x7f3   : > { %v8440_v6 = vadd.f32 %v8439_v61, %v8409_v28 }
 0x7f4   : > { %8758 = vmatmul.f32.gmra.mxu0 %v8757_v42  ;;  %8909 = vmatmul.f32.vlgmr.msrb.gmra.mxu1 %v13347_v62 }
 0x7f5   : > { %9172 = vmatpush.msrb.mxu1 %v13380_v4  ;;  %v8471_v48 = vadd.f32 %v8470_v56, %v8440_v6  ;;  %v8624_v9 = vpop.f32.mrf.mxu0 }
 0x7f7   : > { %9178 = vmatpush.msrb.mxu1 %v13384_v46  ;;  %v8502_v52 = vadd.f32 %v8501_v58, %v8471_v48  ;;  %v5626_v58 = vmul.f32 0.2, %v5624_v36 }
 0x7f9   : > { %v8529_v24 = vadd.f32 %v8528_v22, %v8502_v52  ;;  %v5628_v22 = vmax.f32 %v5624_v36, %v5626_v58 }
 0x7fa   : > { %v8555_v57 = vpop.f32.mrf.mxu2  ;;  %v8598_v11 = vpop.f32.mrf.mxu3 }
 0x7fb   : > { %v8556_v29 = vadd.f32 %v8555_v57, %v8525_v44  ;;  %v8660_v57 = vpop.f32.mrf.mxu1 }
 0x7fc   : > { %8882 = vmatmul.f32.vlgmr.msrb.gmra.mxu0 %v13347_v62  ;;  %8913 = vmatmul.f32.gmra.mxu1 %v8753_v32  ;;  %v5625_v62 = vadd.f32 %v5623_v21, %v13755_v16 }
 0x7fd   : > { %9133 = vmatpush.msrb.mxu0 %v13349_v50  ;;  %v8595_v17 = vadd.f32 %v8594_v27, %v8556_v29  ;;  %v8629_v42 = vpop.f32.mrf.mxu0 }
 0x7fe   : > { %v5627_v61 = vmul.f32 0.2, %v5625_v62 }
 0x7ff   : > { %9135 = vmatpush.msrb.mxu0 %v13354_v23  ;;  %v8625_v20 = vadd.f32 %v8624_v9, %v8595_v17 }
 0x800   : > { %v5629_v6 = vmax.f32 %v5625_v62, %v5627_v61 }
 0x801   : > { %v8655_v5 = vadd.f32 %v8654_v33, %v8625_v20 }
 0x802   : > { %v8563_v7 = vpop.f32.mrf.mxu2  ;;  %v8714_v35 = vpop.f32.mrf.mxu3  ;;  %v13393_v29 = vand.u32 4294901760, %v5629_v6 }
 0x803   : > { %v8564_v56 = vadd.f32 %v8563_v7, %v8529_v24  ;;  %v13396_v7 = vand.u32 4294901760, %v5628_v22 }
 0x804   : > { %8886 = vmatmul.f32.gmra.mxu0 %v8753_v32  ;;  %v13401_v21 = vsub.f32 %v5629_v6, %v13393_v29 }
 0x805   : > { %v8599_v37 = vadd.f32 %v8598_v11, %v8564_v56  ;;  %v13407_v16 = vsub.f32 %v5628_v22, %v13396_v7 }
 0x806   : > { %v13411_v36 = vand.u32 4294901760, %v13401_v21 }
 0x807   : > { %v8630_v27 = vadd.f32 %v8629_v42, %v8599_v37 }
 0x808   : > { %v9360_v61 = vsub.f32 %v13401_v21, %v13411_v36 }
 0x809   : > { %v8661_v48 = vadd.f32 %v8660_v57, %v8630_v27 }
 0x80a   : > { %v8687_v45 = vpop.f32.mrf.mxu2  ;;  %v8718_v11 = vpop.f32.mrf.mxu3  ;;  %v9361_v58 = vand.u32 4294901760, %v9360_v61 }
 0x80b   : > { %v8688_v28 = vadd.f32 %v8687_v45, %v8655_v5  ;;  %v13415_v5 = vand.u32 4294901760, %v13407_v16 }
 0x80d   : > { %v8715_v0 = vadd.f32 %v8714_v35, %v8688_v28  ;;  %v9366_v45 = vsub.f32 %v13407_v16, %v13415_v5 }
 0x80f   : > { %v8918_v32 = vsel %vm584_vm0, %v8715_v0, 0  ;;  %v9367_v27 = vand.u32 4294901760, %v9366_v45 }
 0x810   : > { %v8941_v44 = vand.u32 4294901760, %v8918_v32 }
 0x812   : > { %v8942_v52 = vsub.f32 %v8918_v32, %v8941_v44  ;;  %v8691_v9 = vpop.f32.mrf.mxu2  ;;  %8985 = vmatmul.f32.vlgmr.msrb.gmra.mxu3 %v8941_v44 }
 0x813   : > { %v8692_v17 = vadd.f32 %v8691_v9, %v8661_v48  ;;  %9234 = vmatpush.msrb.mxu3 %v13349_v50 }
 0x814   : > { %v8943_v24 = vand.u32 4294901760, %v8942_v52  ;;  %9015 = vmatmul.f32.vlgmr.msra.gmra.mxu0 %v8942_v52 }
 0x815   : > { %v8719_v33 = vadd.f32 %v8718_v11, %v8692_v17  ;;  %9236 = vmatpush.msrb.mxu3 %v13354_v23  ;;  %9267 = vmatpush.msra.mxu0 %v13368_v34 }
 0x816   : > { %v8944_v20 = vsub.f32 %v8942_v52, %v8943_v24  ;;  %9045 = vmatmul.f32.vlgmr.msra.gmra.mxu1 %v8943_v24 }
 0x817   : > { %v8921_v56 = vsel %vm584_vm0, %v8719_v33, 0  ;;  %9271 = vmatpush.msra.mxu0 %v13372_v43  ;;  %9296 = vmatpush.msra.mxu1 %v13349_v50 }
 0x818   : > { %v8945_v62 = vand.u32 4294901760, %v8944_v20  ;;  %v8949_v12 = vand.u32 4294901760, %v8921_v56 }
 0x819   : > { %9298 = vmatpush.msra.mxu1 %v13354_v23 }
 0x81a   : > { %8946 = vmatmul.f32.vlgmr.msrb.gmra.mxu2 %v8945_v62  ;;  %8989 = vmatmul.f32.gmra.mxu3 %v8949_v12  ;;  %v8950_v35 = vsub.f32 %v8921_v56, %v8949_v12 }
 0x81b   : > { %9204 = vmatpush.msrb.mxu2 %v13358_v55 }
 0x81c   : > { %9020 = vmatmul.f32.gmra.mxu0 %v8950_v35  ;;  %v8951_v37 = vand.u32 4294901760, %v8950_v35 }
 0x81d   : > { %9207 = vmatpush.msrb.mxu2 %v13363_v26 }
 0x81e   : > { %9051 = vmatmul.f32.gmra.mxu1 %v8951_v37  ;;  %v8952_v42 = vsub.f32 %v8950_v35, %v8951_v37 }
 0x820   : > { %v8953_v28 = vand.u32 4294901760, %v8952_v42 }
 0x822   : > { %8954 = vmatmul.f32.gmra.mxu2 %v8953_v28  ;;  %9105 = vmatmul.f32.vlgmr.msra.gmra.mxu3 %v8941_v44 }
 0x823   : > { %9362 = vmatpush.msra.mxu3 %v9361_v58 }
 0x824   : > { %9141 = vmatmul.f32.vlgmr.msrb.gmra.mxu0 %v12744_v51 }
 0x825   : > { %9368 = vmatpush.msra.mxu3 %v9367_v27  ;;  %9394 = vmatpush.msrb.mxu0 %v13401_v21 }
 0x826   : > { %9180 = vmatmul.f32.vlgmr.msrb.gmra.mxu1 %v12675_v2 }
 0x827   : > { %9397 = vmatpush.msrb.mxu0 %v13407_v16  ;;  %9424 = vmatpush.msrb.mxu1 %v13393_v29 }
 0x829   : > { %9426 = vmatpush.msrb.mxu1 %v13396_v7 }
 0x82a   : > { %9078 = vmatmul.f32.vlgmr.msra.gmra.mxu2 %v8941_v44  ;;  %9109 = vmatmul.f32.gmra.mxu3 %v8949_v12 }
 0x82b   : > { %9323 = vmatpush.msra.mxu2 %v13393_v29 }
 0x82c   : > { %9149 = vmatmul.f32.gmra.mxu0 %v12810_v30 }
 0x82d   : > { %9325 = vmatpush.msra.mxu2 %v13396_v7 }
 0x82e   : > { %9184 = vmatmul.f32.gmra.mxu1 %v12718_v8 }
 0x832   : > { %9082 = vmatmul.f32.gmra.mxu2 %v8949_v12  ;;  %9240 = vmatmul.f32.vlgmr.msrb.gmra.mxu3 %v12713_v1 }
 0x833   : > { %9486 = vmatpush.msrb.mxu3 %v13393_v29 }
 0x834   : > { %9273 = vmatmul.f32.vlgmr.msra.gmra.mxu0 %v12675_v2 }
 0x835   : > { %9488 = vmatpush.msrb.mxu3 %v13396_v7  ;;  %9515 = vmatpush.msra.mxu0 %v13349_v50 }
 0x836   : > { %9300 = vmatmul.f32.vlgmr.msra.gmra.mxu1 %v12675_v2 }
 0x837   : > { %9517 = vmatpush.msra.mxu0 %v13354_v23  ;;  %9554 = vmatpush.msra.mxu1 %v13380_v4 }
 0x839   : > { %9560 = vmatpush.msra.mxu1 %v13384_v46 }
 0x83a   : > { %9210 = vmatmul.f32.vlgmr.msrb.gmra.mxu2 %v12705_v15  ;;  %9246 = vmatmul.f32.gmra.mxu3 %v12755_v18 }
 0x83b   : > { %9457 = vmatpush.msrb.mxu2 %v13411_v36 }
 0x83c   : > { %9277 = vmatmul.f32.gmra.mxu0 %v12718_v8 }
 0x83d   : > { %9461 = vmatpush.msrb.mxu2 %v13415_v5 }
 0x83e   : > { %9304 = vmatmul.f32.gmra.mxu1 %v12718_v8 }
 0x842   : > { %9215 = vmatmul.f32.gmra.mxu2 %v12730_v59  ;;  %9370 = vmatmul.f32.vlgmr.msra.gmra.mxu3 %v12777_v63 }
 0x843   : > { %9616 = vmatpush.msra.mxu3 %v13349_v50 }
 0x844   : > { %9400 = vmatmul.f32.vlgmr.msrb.gmra.mxu0 %v12806_v14 }
 0x845   : > { %9618 = vmatpush.msra.mxu3 %v13354_v23  ;;  %9649 = vmatpush.msrb.mxu0 %v13368_v34 }
 0x846   : > { %9430 = vmatmul.f32.vlgmr.msrb.gmra.mxu1 %v12823_v41 }
 0x847   : > { %9653 = vmatpush.msrb.mxu0 %v13372_v43  ;;  %9678 = vmatpush.msrb.mxu1 %v13349_v50 }
 0x849   : > { %9680 = vmatpush.msrb.mxu1 %v13354_v23 }
 0x84a   : > { %9331 = vmatmul.f32.vlgmr.msra.gmra.mxu2 %v12850_v13  ;;  %9374 = vmatmul.f32.gmra.mxu3 %v12825_v54 }
 0x84b   : > { %9586 = vmatpush.msra.mxu2 %v13358_v55 }
 0x84c   : > { %9405 = vmatmul.f32.gmra.mxu0 %v12844_v38 }
 0x84d   : > { %9589 = vmatpush.msra.mxu2 %v13363_v26 }
 0x84e   : > { %9436 = vmatmul.f32.gmra.mxu1 %v12853_v40 }
 0x852   : > { %9339 = vmatmul.f32.gmra.mxu2 %v12867_v60  ;;  %9490 = vmatmul.f32.vlgmr.msrb.gmra.mxu3 %v12777_v63 }
 0x853   : > { %9744 = vmatpush.msrb.mxu3 %v9361_v58 }
 0x854   : > { %9523 = vmatmul.f32.vlgmr.msra.gmra.mxu0 %v12850_v13  ;;  %v13757_v13 = vld [vmem:[#allocation45_spill] sm:$0xff] }
 0x855   : > { %9750 = vmatpush.msrb.mxu3 %v9367_v27  ;;  %9776 = vmatpush.msra.mxu0 %v13401_v21 }
 0x856   : > { %9562 = vmatmul.f32.vlgmr.msra.gmra.mxu1 %v12777_v63 }
 0x857   : > { %9779 = vmatpush.msra.mxu0 %v13407_v16  ;;  %9806 = vmatpush.msra.mxu1 %v13393_v29 }
 0x859   : > { %9808 = vmatpush.msra.mxu1 %v13396_v7 }
 0x85a   : > { %9463 = vmatmul.f32.vlgmr.msrb.gmra.mxu2 %v12777_v63  ;;  %9494 = vmatmul.f32.gmra.mxu3 %v12825_v54 }
 0x85b   : > { %9705 = vmatpush.msrb.mxu2 %v13393_v29 }
 0x85c   : > { %9531 = vmatmul.f32.gmra.mxu0 %v12867_v60 }
 0x85d   : > { %9707 = vmatpush.msrb.mxu2 %v13396_v7 }
 0x85e   : > { %9566 = vmatmul.f32.gmra.mxu1 %v12825_v54 }
 0x861   : > { %v8790_v60 = vpop.f32.mrf.mxu1 }
 0x862   : > { %9467 = vmatmul.f32.gmra.mxu2 %v12825_v54  ;;  %9622 = vmatmul.f32.vlgmr.msra.gmra.mxu3 %v12823_v41 }
 0x863   : > { %9868 = vmatpush.msra.mxu3 %v13393_v29 }
 0x864   : > { %9655 = vmatmul.f32.vlgmr.msrb.gmra.mxu0 %v12777_v63 }
 0x865   : > { %9870 = vmatpush.msra.mxu3 %v13396_v7  ;;  %9901 = vmatpush.msrb.mxu0 %v12920_v3 }
 0x866   : > { %9682 = vmatmul.f32.vlgmr.msrb.gmra.mxu1 %v12777_v63 }
 0x867   : > { %9940 = vmatpush.msrb.mxu1 %v12945_v47  ;;  %9903 = vmatpush.msrb.mxu0 %v13745_v53  ;;  %v13759_v47 = vld [vmem:[#allocation44_spill] sm:$0xff] }
 0x869   : > { %9946 = vmatpush.msrb.mxu1 %v13757_v13  ;;  %v8751_v41 = vpop.f32.mrf.mxu0 }
 0x86a   : > { %9592 = vmatmul.f32.vlgmr.msra.gmra.mxu2 %v12806_v14  ;;  %9628 = vmatmul.f32.gmra.mxu3 %v12853_v40  ;;  %v13758_v14 = vld [vmem:[#allocation36_spill] sm:$0xff]  ;;  %v8794_v40 = vpop.f32.mrf.mxu1  ;;  %v8791_v6 = vadd.f32 %v8790_v60, %v8751_v41 }
 0x86b   : > { %9839 = vmatpush.msra.mxu2 %v13411_v36 }
 0x86c   : > { %9659 = vmatmul.f32.gmra.mxu0 %v12825_v54 }
 0x86d   : > { %9843 = vmatpush.msra.mxu2 %v13415_v5 }
 0x86e   : > { %9686 = vmatmul.f32.gmra.mxu1 %v12825_v54  ;;  %v13760_v54 = vld [vmem:[#allocation32_spill] sm:$0xff] }
 0x871   : > { %v8759_v63 = vpop.f32.mrf.mxu0 }
 0x872   : > { %9597 = vmatmul.f32.gmra.mxu2 %v12844_v38  ;;  %9752 = vmatmul.f32.vlgmr.msrb.gmra.mxu3 %v12675_v2  ;;  %v8910_v38 = vpop.f32.mrf.mxu1  ;;  %v8795_v9 = vadd.f32 %v8794_v40, %v8759_v63 }
 0x873   : > { %10002 = vmatpush.msrb.mxu3 %v12920_v3 }
 0x874   : > { %9782 = vmatmul.f32.vlgmr.msra.gmra.mxu0 %v12705_v15  ;;  %v13761_v15 = vld [vmem:[#allocation37_spill] sm:$0xff] }
 0x875   : > { %10004 = vmatpush.msrb.mxu3 %v13745_v53  ;;  %10035 = vmatpush.msra.mxu0 %v13758_v14 }
 0x876   : > { %9812 = vmatmul.f32.vlgmr.msra.gmra.mxu1 %v12713_v1 }
 0x877   : > { %10064 = vmatpush.msra.mxu1 %v12920_v3  ;;  %10039 = vmatpush.msra.mxu0 %v13759_v47  ;;  %v8850_v3 = vpop.f32.mrf.mxu3 }
 0x879   : > { %10066 = vmatpush.msra.mxu1 %v13745_v53  ;;  %v8883_v1 = vpop.f32.mrf.mxu0  ;;  %v13762_v53 = vld [vmem:[#allocation40_spill] sm:$0xff] }
 0x87a   : > { %9713 = vmatmul.f32.vlgmr.msrb.gmra.mxu2 %v12744_v51  ;;  %9756 = vmatmul.f32.gmra.mxu3 %v12718_v8  ;;  %v13763_v51 = vld [vmem:[#allocation41_spill] sm:$0xff]  ;;  %v8914_v23 = vpop.f32.mrf.mxu1 }
 0x87b   : > { %9972 = vmatpush.msrb.mxu2 %v13760_v54 }
 0x87c   : > { %9787 = vmatmul.f32.gmra.mxu0 %v12730_v59  ;;  %v8820_v59 = vpop.f32.mrf.mxu2 }
 0x87d   : > { %9975 = vmatpush.msrb.mxu2 %v13761_v15  ;;  %v8821_v48 = vadd.f32 %v8820_v59, %v8791_v6 }
 0x87e   : > { %9818 = vmatmul.f32.gmra.mxu1 %v12755_v18 }
 0x87f   : > { %v8856_v18 = vpop.f32.mrf.mxu3  ;;  %v8851_v52 = vadd.f32 %v8850_v3, %v8821_v48 }
 0x881   : > { %v8887_v50 = vpop.f32.mrf.mxu0 }
 0x882   : > { %9721 = vmatmul.f32.gmra.mxu2 %v12810_v30  ;;  %9872 = vmatmul.f32.vlgmr.msra.gmra.mxu3 %v12675_v2 }
 0x883   : > { %10136 = vmatpush.msra.mxu3 %v13762_v53 }
 0x884   : > { %v8825_v26 = vpop.f32.mrf.mxu2 }
 0x885   : > { %10142 = vmatpush.msra.mxu3 %v13763_v51  ;;  %v8826_v21 = vadd.f32 %v8825_v26, %v8795_v9 }
 0x887   : > { %v8857_v36 = vadd.f32 %v8856_v18, %v8826_v21 }
 0x889   : > { %v8888_v5 = vadd.f32 %v8887_v50, %v8857_v36 }
 0x88a   : > { %9845 = vmatmul.f32.vlgmr.msra.gmra.mxu2 %v12675_v2  ;;  %9876 = vmatmul.f32.gmra.mxu3 %v12718_v8 }
 0x88b   : > { %10097 = vmatpush.msra.mxu2 %v12956_v49  ;;  %v8915_v58 = vadd.f32 %v8914_v23, %v8888_v5 }
 0x88d   : > { %10099 = vmatpush.msra.mxu2 %v12958_v25 }
 0x891   : > { %v9016_v30 = vpop.f32.mrf.mxu0 }
 0x892   : > { %9849 = vmatmul.f32.gmra.mxu2 %v12718_v8  ;;  %v8884_v8 = vadd.f32 %v8883_v1, %v8851_v52 }
 0x893   : > { %v9046_v55 = vpop.f32.mrf.mxu1 }
 0x894   : > { %v8911_v16 = vadd.f32 %v8910_v38, %v8884_v8 }
 0x895   : > { %v8986_v34 = vpop.f32.mrf.mxu3 }
 0x899   : > { %v9021_v43 = vpop.f32.mrf.mxu0 }
 0x89b   : > { %v9052_v4 = vpop.f32.mrf.mxu1 }
 0x89d   : > { %v8947_v46 = vpop.f32.mrf.mxu2  ;;  %v8990_v0 = vpop.f32.mrf.mxu3 }
 0x89e   : > { %v8987_v57 = vadd.f32 %v8986_v34, %v8947_v46 }
 0x8a0   : > { %v9017_v29 = vadd.f32 %v9016_v30, %v8987_v57 }
 0x8a1   : > { %v9142_v2 = vpop.f32.mrf.mxu0 }
 0x8a2   : > { %v9047_v7 = vadd.f32 %v9046_v55, %v9017_v29 }
 0x8a3   : > { %v9181_v32 = vpop.f32.mrf.mxu1 }
 0x8a4   : > { %v9182_v53 = vadd.f32 %v9181_v32, %v9142_v2 }
 0x8a5   : > { %v8955_v22 = vpop.f32.mrf.mxu2  ;;  %v9106_v44 = vpop.f32.mrf.mxu3 }
 0x8a6   : > { %v8991_v17 = vadd.f32 %v8990_v0, %v8955_v22 }
 0x8a8   : > { %v9022_v62 = vadd.f32 %v9021_v43, %v8991_v17 }
 0x8a9   : > { %v9150_v11 = vpop.f32.mrf.mxu0 }
 0x8aa   : > { %v9053_v37 = vadd.f32 %v9052_v4, %v9022_v62 }
 0x8ab   : > { %v9185_v56 = vpop.f32.mrf.mxu1 }
 0x8ac   : > { %v9186_v34 = vadd.f32 %v9185_v56, %v9150_v11 }
 0x8ad   : > { %v9079_v24 = vpop.f32.mrf.mxu2  ;;  %v9110_v33 = vpop.f32.mrf.mxu3 }
 0x8ae   : > { %v9080_v20 = vadd.f32 %v9079_v24, %v9047_v7 }
 0x8b0   : > { %v9107_v12 = vadd.f32 %v9106_v44, %v9080_v20 }
 0x8b1   : > { %v9274_v61 = vpop.f32.mrf.mxu0 }
 0x8b2   : > { %v9113_v35 = vsub.f32 %v8911_v16, %v9107_v12 }
 0x8b3   : > { %v9301_v13 = vpop.f32.mrf.mxu1 }
 0x8b4   : > { %10571 = vst.msk [vmem:[%s13160_s6 + $0x20] sm:$0xff] %vm584_vm0, %v9113_v35 }
 0x8b5   : > { %v9083_v42 = vpop.f32.mrf.mxu2  ;;  %v9241_v45 = vpop.f32.mrf.mxu3 }
 0x8b6   : > { %v9084_v28 = vadd.f32 %v9083_v42, %v9053_v37 }
 0x8b8   : > { %v9111_v27 = vadd.f32 %v9110_v33, %v9084_v28 }
 0x8b9   : > { %v9278_v14 = vpop.f32.mrf.mxu0 }
 0x8ba   : > { %v9114_v41 = vsub.f32 %v8915_v58, %v9111_v27 }
 0x8bb   : > { %v9305_v40 = vpop.f32.mrf.mxu1 }
 0x8bc   : > { %10572 = vst.msk [vmem:[%s13160_s6 + $0x28] sm:$0xff] %vm584_vm0, %v9114_v41 }
 0x8bd   : > { %v9211_v60 = vpop.f32.mrf.mxu2  ;;  %v9247_v63 = vpop.f32.mrf.mxu3 }
 0x8be   : > { %v9212_v50 = vadd.f32 %v9211_v60, %v9182_v53 }
 0x8c0   : > { %v9242_v55 = vadd.f32 %v9241_v45, %v9212_v50 }
 0x8c1   : > { %v9401_v15 = vpop.f32.mrf.mxu0 }
 0x8c2   : > { %v9275_v4 = vadd.f32 %v9274_v61, %v9242_v55 }
 0x8c3   : > { %v9431_v1 = vpop.f32.mrf.mxu1 }
 0x8c4   : > { %v9302_v29 = vadd.f32 %v9301_v13, %v9275_v4 }
 0x8c5   : > { %v9216_v47 = vpop.f32.mrf.mxu2  ;;  %v9371_v54 = vpop.f32.mrf.mxu3 }
 0x8c6   : > { %v9217_v46 = vadd.f32 %v9216_v47, %v9186_v34 }
 0x8c8   : > { %v9248_v2 = vadd.f32 %v9247_v63, %v9217_v46 }
 0x8c9   : > { %v9406_v51 = vpop.f32.mrf.mxu0 }
 0x8ca   : > { %v9279_v8 = vadd.f32 %v9278_v14, %v9248_v2 }
 0x8cb   : > { %v9437_v30 = vpop.f32.mrf.mxu1 }
 0x8cc   : > { %v9306_v16 = vadd.f32 %v9305_v40, %v9279_v8 }
 0x8cd   : > { %v9332_v38 = vpop.f32.mrf.mxu2  ;;  %v9375_v3 = vpop.f32.mrf.mxu3 }
 0x8ce   : > { %v9372_v59 = vadd.f32 %v9371_v54, %v9332_v38 }
 0x8d0   : > { %v9402_v26 = vadd.f32 %v9401_v15, %v9372_v59 }
 0x8d1   : > { %v9524_v43 = vpop.f32.mrf.mxu0 }
 0x8d2   : > { %v9432_v0 = vadd.f32 %v9431_v1, %v9402_v26 }
 0x8d3   : > { %v9563_v48 = vpop.f32.mrf.mxu1 }
 0x8d4   : > { %v9564_v13 = vadd.f32 %v9563_v48, %v9524_v43 }
 0x8d5   : > { %v9340_v23 = vpop.f32.mrf.mxu2  ;;  %v9491_v18 = vpop.f32.mrf.mxu3 }
 0x8d6   : > { %v9376_v6 = vadd.f32 %v9375_v3, %v9340_v23 }
 0x8d8   : > { %v9407_v32 = vadd.f32 %v9406_v51, %v9376_v6 }
 0x8d9   : > { %v9532_v24 = vpop.f32.mrf.mxu0 }
 0x8da   : > { %v9438_v17 = vadd.f32 %v9437_v30, %v9407_v32 }
 0x8db   : > { %v9567_v36 = vpop.f32.mrf.mxu1 }
 0x8dc   : > { %v9568_v40 = vadd.f32 %v9567_v36, %v9532_v24 }
 0x8dd   : > { %v9464_v57 = vpop.f32.mrf.mxu2  ;;  %v9495_v22 = vpop.f32.mrf.mxu3 }
 0x8de   : > { %v9465_v44 = vadd.f32 %v9464_v57, %v9432_v0 }
 0x8e0   : > { %v9492_v52 = vadd.f32 %v9491_v18, %v9465_v44 }
 0x8e1   : > { %v9656_v27 = vpop.f32.mrf.mxu0 }
 0x8e2   : > { %v9498_v9 = vsub.f32 %v9302_v29, %v9492_v52 }
 0x8e4   : > { %v9881_v7 = vsel %vm584_vm0, %v9498_v9, 0 }
 0x8e5   : > { %v9904_v11 = vand.u32 4294901760, %v9881_v7  ;;  %v9468_v33 = vpop.f32.mrf.mxu2  ;;  %v9623_v21 = vpop.f32.mrf.mxu3 }
 0x8e6   : > { %v9469_v20 = vadd.f32 %v9468_v33, %v9438_v17 }
 0x8e7   : > { %v9905_v56 = vsub.f32 %v9881_v7, %v9904_v11  ;;  %9948 = vmatmul.f32.vlgmr.msrb.gmra.mxu1 %v9904_v11 }
 0x8e8   : > { %v9496_v62 = vadd.f32 %v9495_v22, %v9469_v20  ;;  %10198 = vmatpush.msrb.mxu1 %v12956_v49 }
 0x8e9   : > { %v9906_v12 = vand.u32 4294901760, %v9905_v56  ;;  %9978 = vmatmul.f32.vlgmr.msrb.gmra.mxu2 %v9905_v56  ;;  %v9660_v47 = vpop.f32.mrf.mxu0 }
 0x8ea   : > { %v9499_v35 = vsub.f32 %v9306_v16, %v9496_v62  ;;  %10200 = vmatpush.msrb.mxu1 %v12958_v25  ;;  %10231 = vmatpush.msrb.mxu2 %v12985_v31 }
 0x8eb   : > { %v9907_v5 = vsub.f32 %v9905_v56, %v9906_v12  ;;  %10008 = vmatmul.f32.vlgmr.msrb.gmra.mxu3 %v9906_v12 }
 0x8ec   : > { %v9884_v37 = vsel %vm584_vm0, %v9499_v35, 0  ;;  %10260 = vmatpush.msrb.mxu3 %v12956_v49  ;;  %10235 = vmatpush.msrb.mxu2 %v12994_v39  ;;  %v9683_v49 = vpop.f32.mrf.mxu1 }
 0x8ed   : > { %v9908_v61 = vand.u32 4294901760, %v9907_v5  ;;  %v9912_v42 = vand.u32 4294901760, %v9884_v37  ;;  %v9593_v45 = vpop.f32.mrf.mxu2  ;;  %v9629_v28 = vpop.f32.mrf.mxu3 }
 0x8ee   : > { %10262 = vmatpush.msrb.mxu3 %v12958_v25  ;;  %v9594_v41 = vadd.f32 %v9593_v45, %v9564_v13 }
 0x8ef   : > { %9909 = vmatmul.f32.vlgmr.msrb.gmra.mxu0 %v9908_v61  ;;  %9952 = vmatmul.f32.gmra.mxu1 %v9912_v42  ;;  %v9913_v58 = vsub.f32 %v9884_v37, %v9912_v42 }
 0x8f0   : > { %10168 = vmatpush.msrb.mxu0 %v12975_v10  ;;  %v9624_v14 = vadd.f32 %v9623_v21, %v9594_v41 }
 0x8f1   : > { %9983 = vmatmul.f32.gmra.mxu2 %v9913_v58  ;;  %v9914_v31 = vand.u32 4294901760, %v9913_v58  ;;  %v9783_v50 = vpop.f32.mrf.mxu0 }
 0x8f2   : > { %10171 = vmatpush.msrb.mxu0 %v12982_v19  ;;  %v9657_v54 = vadd.f32 %v9656_v27, %v9624_v14 }
 0x8f3   : > { %10014 = vmatmul.f32.gmra.mxu3 %v9914_v31  ;;  %v9915_v39 = vsub.f32 %v9913_v58, %v9914_v31 }
 0x8f4   : > { %v9687_v10 = vpop.f32.mrf.mxu1  ;;  %v9684_v38 = vadd.f32 %v9683_v49, %v9657_v54 }
 0x8f5   : > { %v9598_v60 = vpop.f32.mrf.mxu2  ;;  %v9916_v63 = vand.u32 4294901760, %v9915_v39  ;;  %v9753_v25 = vpop.f32.mrf.mxu3 }
 0x8f6   : > { %v9599_v15 = vadd.f32 %v9598_v60, %v9568_v40 }
 0x8f7   : > { %9917 = vmatmul.f32.gmra.mxu0 %v9916_v63  ;;  %10068 = vmatmul.f32.vlgmr.msra.gmra.mxu1 %v9904_v11 }
 0x8f8   : > { %v9630_v3 = vadd.f32 %v9629_v28, %v9599_v15 }
 0x8f9   : > { %v9788_v46 = vpop.f32.mrf.mxu0 }
 0x8fa   : > { %v9661_v51 = vadd.f32 %v9660_v47, %v9630_v3 }
 0x8fc   : > { %v9688_v18 = vadd.f32 %v9687_v10, %v9661_v51  ;;  %v9813_v30 = vpop.f32.mrf.mxu1 }
 0x8fd   : > { %v9714_v1 = vpop.f32.mrf.mxu2  ;;  %v9757_v53 = vpop.f32.mrf.mxu3 }
 0x8fe   : > { %v9715_v19 = vadd.f32 %v9714_v1, %v9684_v38 }
 0x8ff   : > { %10041 = vmatmul.f32.vlgmr.msra.gmra.mxu0 %v9904_v11  ;;  %10072 = vmatmul.f32.gmra.mxu1 %v9912_v42 }
 0x900   : > { %v9754_v59 = vadd.f32 %v9753_v25, %v9715_v19 }
 0x902   : > { %v9784_v55 = vadd.f32 %v9783_v50, %v9754_v59 }
 0x904   : > { %v9814_v43 = vadd.f32 %v9813_v30, %v9784_v55  ;;  %v9819_v44 = vpop.f32.mrf.mxu1 }
 0x905   : > { %v9722_v23 = vpop.f32.mrf.mxu2  ;;  %v9873_v34 = vpop.f32.mrf.mxu3 }
 0x906   : > { %v9723_v26 = vadd.f32 %v9722_v23, %v9688_v18 }
 0x907   : > { %10045 = vmatmul.f32.gmra.mxu0 %v9912_v42 }
 0x908   : > { %v9758_v4 = vadd.f32 %v9757_v53, %v9723_v26 }
 0x90a   : > { %v9789_v57 = vadd.f32 %v9788_v46, %v9758_v4 }
 0x90c   : > { %v9820_v2 = vadd.f32 %v9819_v44, %v9789_v57 }
 0x90d   : > { %v9846_v0 = vpop.f32.mrf.mxu2  ;;  %v9877_v9 = vpop.f32.mrf.mxu3 }
 0x90e   : > { %v9847_v6 = vadd.f32 %v9846_v0, %v9814_v43 }
 0x910   : > { %v9874_v22 = vadd.f32 %v9873_v34, %v9847_v6 }
 0x912   : > { %v10077_v48 = vsel %vm584_vm0, %v9874_v22, 0 }
 0x913   : > { %v10100_v29 = vand.u32 4294901760, %v10077_v48 }
 0x915   : > { %v10101_v32 = vsub.f32 %v10077_v48, %v10100_v29  ;;  %v9850_v52 = vpop.f32.mrf.mxu2  ;;  %10144 = vmatmul.f32.vlgmr.msra.gmra.mxu3 %v10100_v29 }
 0x916   : > { %v9851_v8 = vadd.f32 %v9850_v52, %v9820_v2 }
 0x917   : > { %v10102_v17 = vand.u32 4294901760, %v10101_v32  ;;  %10174 = vmatmul.f32.vlgmr.msrb.gmra.mxu0 %v10101_v32 }
 0x918   : > { %v9878_v7 = vadd.f32 %v9877_v9, %v9851_v8 }
 0x919   : > { %v10103_v24 = vsub.f32 %v10101_v32, %v10102_v17  ;;  %10204 = vmatmul.f32.vlgmr.msrb.gmra.mxu1 %v10102_v17 }
 0x91a   : > { %v10080_v11 = vsel %vm584_vm0, %v9878_v7, 0 }
 0x91b   : > { %v10104_v33 = vand.u32 4294901760, %v10103_v24  ;;  %v10108_v21 = vand.u32 4294901760, %v10080_v11 }
 0x91d   : > { %v10109_v20 = vsub.f32 %v10080_v11, %v10108_v21  ;;  %10105 = vmatmul.f32.vlgmr.msra.gmra.mxu2 %v10104_v33  ;;  %10148 = vmatmul.f32.gmra.mxu3 %v10108_v21 }
 0x91f   : > { %10179 = vmatmul.f32.gmra.mxu0 %v10109_v20  ;;  %v10110_v56 = vand.u32 4294901760, %v10109_v20 }
 0x921   : > { %10210 = vmatmul.f32.gmra.mxu1 %v10110_v56  ;;  %v10111_v16 = vsub.f32 %v10109_v20, %v10110_v56 }
 0x923   : > { %v10112_v62 = vand.u32 4294901760, %v10111_v16 }
 0x925   : > { %10113 = vmatmul.f32.gmra.mxu2 %v10112_v62  ;;  %10264 = vmatmul.f32.vlgmr.msrb.gmra.mxu3 %v10100_v29 }
 0x92d   : > { %10237 = vmatmul.f32.vlgmr.msrb.gmra.mxu2 %v10100_v29  ;;  %10268 = vmatmul.f32.gmra.mxu3 %v10108_v21 }
 0x935   : > { %10241 = vmatmul.f32.gmra.mxu2 %v10108_v21 }
 0x964   : > { %v9949_v36 = vpop.f32.mrf.mxu1 }
 0x96c   : > { %v9910_v12 = vpop.f32.mrf.mxu0  ;;  %v9979_v37 = vpop.f32.mrf.mxu2 }
 0x96d   : > { %v9953_v61 = vpop.f32.mrf.mxu1  ;;  %v9950_v49 = vadd.f32 %v9949_v36, %v9910_v12 }
 0x96e   : > { %v10009_v35 = vpop.f32.mrf.mxu3 }
 0x96f   : > { %v9980_v25 = vadd.f32 %v9979_v37, %v9950_v49 }
 0x971   : > { %v10010_v54 = vadd.f32 %v10009_v35, %v9980_v25 }
 0x974   : > { %v9918_v5 = vpop.f32.mrf.mxu0  ;;  %v9984_v28 = vpop.f32.mrf.mxu2 }
 0x975   : > { %v10069_v58 = vpop.f32.mrf.mxu1  ;;  %v9954_v15 = vadd.f32 %v9953_v61, %v9918_v5 }
 0x976   : > { %v10015_v42 = vpop.f32.mrf.mxu3 }
 0x977   : > { %v9985_v53 = vadd.f32 %v9984_v28, %v9954_v15 }
 0x979   : > { %v10016_v30 = vadd.f32 %v10015_v42, %v9985_v53 }
 0x97c   : > { %v10042_v45 = vpop.f32.mrf.mxu0 }
 0x97d   : > { %v10073_v41 = vpop.f32.mrf.mxu1  ;;  %v10043_v1 = vadd.f32 %v10042_v45, %v10010_v54 }
 0x97f   : > { %v10070_v59 = vadd.f32 %v10069_v58, %v10043_v1 }
 0x984   : > { %v10046_v13 = vpop.f32.mrf.mxu0 }
 0x985   : > { %v10047_v34 = vadd.f32 %v10046_v13, %v10016_v30 }
 0x987   : > { %v10074_v6 = vadd.f32 %v10073_v41, %v10047_v34 }
 0x994   : > { %v10175_v63 = vpop.f32.mrf.mxu0 }
 0x996   : > { %v10205_v47 = vpop.f32.mrf.mxu1 }
 0x998   : > { %v10145_v27 = vpop.f32.mrf.mxu3 }
 0x99c   : > { %v10180_v50 = vpop.f32.mrf.mxu0 }
 0x99e   : > { %v10211_v26 = vpop.f32.mrf.mxu1 }
 0x9a0   : > { %v10106_v31 = vpop.f32.mrf.mxu2  ;;  %v10149_v39 = vpop.f32.mrf.mxu3 }
 0x9a1   : > { %v10146_v60 = vadd.f32 %v10145_v27, %v10106_v31 }
 0x9a3   : > { %v10176_v40 = vadd.f32 %v10175_v63, %v10146_v60 }
 0x9a5   : > { %v10206_v38 = vadd.f32 %v10205_v47, %v10176_v40 }
 0x9a8   : > { %v10114_v14 = vpop.f32.mrf.mxu2  ;;  %v10265_v3 = vpop.f32.mrf.mxu3 }
 0x9a9   : > { %v10150_v10 = vadd.f32 %v10149_v39, %v10114_v14 }
 0x9ab   : > { %v10181_v23 = vadd.f32 %v10180_v50, %v10150_v10 }
 0x9ad   : > { %v10212_v43 = vadd.f32 %v10211_v26, %v10181_v23 }
 0x9b0   : > { %v10238_v19 = vpop.f32.mrf.mxu2  ;;  %v10269_v0 = vpop.f32.mrf.mxu3 }
 0x9b1   : > { %v10239_v51 = vadd.f32 %v10238_v19, %v10206_v38 }
 0x9b3   : > { %v10266_v18 = vadd.f32 %v10265_v3, %v10239_v51 }
 0x9b5   : > { %v10272_v55 = vsub.f32 %v10070_v59, %v10266_v18 }
 0x9b7   : > { %10573 = vst.msk [vmem:[%s13160_s6 + $0x30] sm:$0xff] %vm584_vm0, %v10272_v55 }
 0x9b8   : > { %v10242_v4 = vpop.f32.mrf.mxu2 }
 0x9b9   : > { %v10243_v46 = vadd.f32 %v10242_v4, %v10212_v43 }
 0x9bb   : > { %v10270_v57 = vadd.f32 %v10269_v0, %v10243_v46 }
 0x9bd   : > { %v10273_v22 = vsub.f32 %v10074_v6, %v10270_v57 }
 0x9bf   : > { %10574 = vst.msk [vmem:[%s13160_s6 + $0x38] sm:$0xff] %vm584_vm0, %v10273_v22 }
 0x9c0   : > { %11060 = shalt.err (!%p11057_p9)
}
 0x9c1   : > { %s11137_s4 = smov 128   ;;  %s11138_s6 = smov 8  }
 0x9c2   : > { %10624 = dma.vmem_to_hbm [thread:$0]  (%p11340_p4), %s10291_s13, 1024, %s10293_s27, %s10278_s24, %s11137_s4, %s11137_s4, %s11138_s6  }
 0x9c3 PF: > { %s10307_s15 = sand.u32 1, %s11111_s17   ;;  %p13764_p10 = scmp.ge.s32.totalorder %s11123_s20, 2 }
 0x9c4   : > { %s10308_s29 = scalar_lea.sflag [#allocation4], %s10307_s15 }
 0x9c5   : > { %p10662_p13 = pnand %p13764_p10, %p11344_p6 }
 0x9c7   : > { %p10663_p11 = pneg %p10662_p13 }
 0x9c9   : > { %11106 = dma.done.wait (%p10663_p11), %s10308_s29, 1024  }
 0x9ca   : > { %11108 = vsyncadd (%p10663_p11), %s10308_s29, 4294966272  ;;  %p30_p0 = scmp.ge.s32.totalorder %s11314_s30, 4   ;;  %s13765_s17 = smov %s11115_s18 }
 0x9cb   : > { %s13766_s18 = smov %s11119_s19  ;;  %s13767_s19 = smov %s11325_s14 }
 0x9cc   : > { %s13768_s20 = smov %s11314_s30  ;;  %32 = sbr.rel (!%p30_p0) target bundleno = 18 (0x12), region = 156 }
 0x9d1   :  { %10314 = vsyncpa [#allocation3], 1 }
 0x9d2   :  { %10316 = vsyncpa [#allocation3 + $0x1], 1 }
 0x9d3   :  { %10317 = vsyncpa [#allocation10], 1 }
 0x9d4   :  { %10318 = vsyncpa [#allocation13], 1 }
 0x9d5   :  { %10319 = vsyncpa [#allocation16], 1 }
 0x9d6   :  { %10320 = vsyncpa [#allocation19], 1 }
 0x9d7   :  { %10321 = vsyncpa [#allocation4], 1 }
 0x9d8   :  { %10323 = vsyncpa [#allocation4 + $0x1], 1 }
 0x9d9   :  { %10324 = vsyncpa [#allocation5], 1 }
 0x9da   :  { %10326 = vsyncpa [#allocation5 + $0x1], 1 }
 0x9db   :  { %10327 = vsyncpa [#allocation7], 1 }

</bundles_post_ra>
